<compile_context>
chip_gen: v7x
topology: tpu7x:2x2x1
jax: 0.10.0
libtpu: 0.0.40
codegen_flags: <defaults>
</compile_context>

<pallas_src>
import functools

import numpy as np
import jax
import jax.numpy as jnp
from jax.experimental import pallas as pl
from jax.experimental.pallas import tpu as pltpu


# ----------------------------------------------------------------------------
# Fused kernel: per-frame CNN + fc + LSTM layer-0 projection + 2-layer LSTM
#               + last-step ReLU + fc1
# ----------------------------------------------------------------------------
def _fused_kernel(x_ref, w1_ref, b1_ref, w2_ref, b2_ref, w3_ref, b3_ref,
                  wfc_ref, bfc_ref, wih0_ref, b0_ref, whh0_ref,
                  wih1_ref, whh1_ref, b1l_ref, wfc1_ref, bfc1_ref,
                  o_ref, *, batch, seq_len, hidden):
    # ------------------ per-frame CNN: 5 chained MXU matmuls -----------------
    x = x_ref[...]                                           # (B*T, 48) CHW frames

    # conv1 (3x3, pad 1) + ReLU as one effective matmul -> (N, 16 pos * 8 ch)
    y1 = jnp.dot(x, w1_ref[...], preferred_element_type=jnp.float32) + b1_ref[...]
    y1 = jnp.maximum(y1, 0.0)
    # pool1 (2x2/2): columns ordered (di, dj, oi, oj, ch) so each pooling
    # window is a max over 4 contiguous 32-lane slices.
    q = w1_ref.shape[1] // 4
    p1 = jnp.maximum(jnp.maximum(y1[:, 0:q], y1[:, q:2 * q]),
                     jnp.maximum(y1[:, 2 * q:3 * q], y1[:, 3 * q:4 * q]))   # (N, 32)

    # conv2 (3x3, pad 1 on the 2x2 pooled map) + ReLU -> (N, 4 pos * 16 ch)
    y2 = jnp.dot(p1, w2_ref[...], preferred_element_type=jnp.float32) + b2_ref[...]
    y2 = jnp.maximum(y2, 0.0)
    # pool2 (2x2/2): max over 4 contiguous 16-lane slices -> (N, 16)
    r = w2_ref.shape[1] // 4
    p2 = jnp.maximum(jnp.maximum(y2[:, 0:r], y2[:, r:2 * r]),
                     jnp.maximum(y2[:, 2 * r:3 * r], y2[:, 3 * r:4 * r]))

    # conv3 (1x1) + ReLU; pool3 (1x1 stride 1) and flatten are identity -> (N, 32)
    y3 = jnp.dot(p2, w3_ref[...], preferred_element_type=jnp.float32) + b3_ref[...]
    y3 = jnp.maximum(y3, 0.0)

    # Dropout(p=0.5) is identity in eval/inference mode.
    # TODO(synk): stochastic training-mode dropout mask not implemented.

    # fc (32 -> 64) + ReLU -> (N, 64)
    f = jnp.dot(y3, wfc_ref[...], preferred_element_type=jnp.float32) + bfc_ref[...]
    f = jnp.maximum(f, 0.0)

    # Hoisted LSTM layer-0 input projection + folded layer-0 biases -> (N, 4H)
    xw0 = jnp.dot(f, wih0_ref[...], preferred_element_type=jnp.float32) + b0_ref[...]
    # rows are batch-major (b*T + t); tile-aligned split of the sublane dim.
    xw0 = xw0.reshape(batch, seq_len, 4 * hidden)

    # --------------------------- 2-layer LSTM head ----------------------------
    whh0 = whh0_ref[...]                                     # (H, 4H)
    wih1 = wih1_ref[...]                                     # (H, 4H)
    whh1 = whh1_ref[...]                                     # (H, 4H)
    b1l = jnp.broadcast_to(b1l_ref[...], (batch, 4 * hidden))  # hoisted broadcast

    h0 = jnp.zeros((batch, hidden), jnp.float32)
    c0 = jnp.zeros((batch, hidden), jnp.float32)
    h1 = jnp.zeros((batch, hidden), jnp.float32)
    c1 = jnp.zeros((batch, hidden), jnp.float32)

    def sig(v):                                   # EUP tanh, no divide
        return 0.5 * jnp.tanh(0.5 * v) + 0.5

    def act(gates, c):                            # gate order i, f, g, o
        i = sig(gates[:, 0 * hidden:1 * hidden])
        fg = sig(gates[:, 1 * hidden:2 * hidden])
        g = jnp.tanh(gates[:, 2 * hidden:3 * hidden])
        o = sig(gates[:, 3 * hidden:4 * hidden])
        c_new = fg * c + i * g
        return o * jnp.tanh(c_new), c_new

    for t in range(seq_len):                      # static unroll (T small)
        # layer 0: x_t @ wih0 + biases were hoisted into the CNN chain above.
        g0 = xw0[:, t, :] + jnp.dot(h0, whh0, preferred_element_type=jnp.float32)
        h0, c0 = act(g0, c0)
        # layer 1: no per-step concat — the whh1 matmul depends only on last
        # step's h1, so it can issue while layer 0 is still in flight.
        g1 = (jnp.dot(h0, wih1, preferred_element_type=jnp.float32)
              + jnp.dot(h1, whh1, preferred_element_type=jnp.float32) + b1l)
        h1, c1 = act(g1, c1)

    hr = jnp.maximum(h1, 0.0)                     # ReLU on out[:, -1, :]
    out = jnp.dot(hr, wfc1_ref[...], preferred_element_type=jnp.float32) + bfc1_ref[...]
    o_ref[...] = out.astype(o_ref.dtype)


def pallas_forward(inputs, prep):
    """inputs: (B, T, 3, 4, 4) -> logits (B, num_classes). One pallas_call."""
    B, T, C, H, W = inputs.shape
    Hd = prep['whh0'].shape[0]
    nc = prep['wfc1'].shape[1]

    # Free contiguous reshape: rows are batch-major (b*T + t), CHW-flattened
    # frames matching the w1big row order. No transpose / pad HLOs.
    x = inputs.reshape(B * T, C * H * W)

    weights = (prep['w1big'], prep['b1big'], prep['w2big'], prep['b2big'],
               prep['w3'], prep['b3'], prep['wfc'], prep['bfc'],
               prep['wih0'], prep['b0'], prep['whh0'],
               prep['wih1'], prep['whh1'], prep['b1l'],
               prep['wfc1'], prep['bfc1'])

    def full(arr):
        n = arr.ndim
        return pl.BlockSpec(arr.shape, lambda i, _n=n: (0,) * _n)

    kernel = functools.partial(_fused_kernel, batch=B, seq_len=T, hidden=Hd)
    return pl.pallas_call(
        kernel,
        out_shape=jax.ShapeDtypeStruct((B, nc), jnp.float32),
        grid=(1,),                                 # single step: latency-bound
        in_specs=[full(x)] + [full(w) for w in weights],
        out_specs=pl.BlockSpec((B, nc), lambda i: (0, 0)),
    )(x, *weights)


# ----------------------------------------------------------------------------
# Parameter setup / one-time weight packing (host side, plain numpy/JAX)
# ----------------------------------------------------------------------------
def init_params(key):
    ks = jax.random.split(key, 18)

    def u(k, shape, fan_in):
        bound = 1.0 / np.sqrt(fan_in)
        return jax.random.uniform(k, shape, jnp.float32, -bound, bound)

    p = {}
    # conv weights in HWIO layout (= PyTorch OIHW transposed)
    p['w1'] = u(ks[0], (3, 3, 3, 8), 27);    p['b1'] = u(ks[1], (8,), 27)
    p['w2'] = u(ks[2], (3, 3, 8, 16), 72);   p['b2'] = u(ks[3], (16,), 72)
    p['w3'] = u(ks[4], (1, 1, 16, 32), 16);  p['b3'] = u(ks[5], (32,), 16)
    p['wfc'] = u(ks[6], (32, 64), 32);       p['bfc'] = u(ks[7], (64,), 32)
    # LSTM (weights stored (in, 4*hidden); gate order i, f, g, o).
    # NOTE: importing from PyTorch's (4*hidden, in) layout requires a transpose.
    p['wih0'] = u(ks[8], (64, 256), 64);     p['whh0'] = u(ks[9], (64, 256), 64)
    p['bih0'] = u(ks[10], (256,), 64);       p['bhh0'] = u(ks[11], (256,), 64)
    p['wih1'] = u(ks[12], (64, 256), 64);    p['whh1'] = u(ks[13], (64, 256), 64)
    p['bih1'] = u(ks[14], (256,), 64);       p['bhh1'] = u(ks[15], (256,), 64)
    p['wfc1'] = u(ks[16], (64, 2), 64);      p['bfc1'] = u(ks[17], (2,), 64)
    return p


def prepare_params(p):
    """Pack PyTorch-style params into the effective weights the kernel uses."""
    w1 = np.asarray(p['w1'], np.float32)     # (3,3,3,8)  HWIO
    w2 = np.asarray(p['w2'], np.float32)     # (3,3,8,16)
    w3 = np.asarray(p['w3'], np.float32)     # (1,1,16,32)

    # conv1 on the 4x4 frame as one dense matmul: (48 = C*H*W, 128 = 16 pos * 8 ch).
    # Rows use CHW flattening (ci*16 + iy*4 + ix).  Columns are ordered
    # (di, dj, oi, oj, co) with output pixel (y, x) = (2*oi+di, 2*oj+dj) so the
    # 2x2 max-pool becomes a max over four contiguous 32-lane slices.
    w1big = np.zeros((48, 128), np.float32)
    for oi in range(2):
        for oj in range(2):
            for di in range(2):
                for dj in range(2):
                    y, x = 2 * oi + di, 2 * oj + dj
                    col = di * 64 + dj * 32 + oi * 16 + oj * 8
                    for ky in range(3):
                        for kx in range(3):
                            iy, ix = y + ky - 1, x + kx - 1
                            if 0 <= iy < 4 and 0 <= ix < 4:
                                for ci in range(3):
                                    w1big[ci * 16 + iy * 4 + ix, col:col + 8] += w1[ky, kx, ci]
    b1big = np.tile(np.asarray(p['b1'], np.float32), 16)

    # conv2 (3x3 pad 1 on the 2x2 pooled map) as one dense matmul: (32, 64).
    # Rows: pooled-map position-major (pos*8 + ci); columns: output-position
    # major (pos*16 + co) so pool2 is a max over four 16-lane slices.
    w2big = np.zeros((32, 64), np.float32)
    for oy in range(2):
        for ox in range(2):
            col = (oy * 2 + ox) * 16
            for iy in range(2):
                for ix in range(2):
                    ky, kx = iy - oy + 1, ix - ox + 1
                    row = (iy * 2 + ix) * 8
                    w2big[row:row + 8, col:col + 16] += w2[ky, kx]
    b2big = np.tile(np.asarray(p['b2'], np.float32), 4)

    return {
        'w1big': jnp.asarray(w1big),
        'b1big': jnp.asarray(b1big).reshape(1, 128),
        'w2big': jnp.asarray(w2big),
        'b2big': jnp.asarray(b2big).reshape(1, 64),
        'w3': jnp.asarray(w3.reshape(16, 32)),
        'b3': jnp.asarray(p['b3']).reshape(1, 32),
        'wfc': jnp.asarray(p['wfc']),
        'bfc': jnp.asarray(p['bfc']).reshape(1, 64),
        'wih0': jnp.asarray(p['wih0']),
        'b0': jnp.asarray(p['bih0'] + p['bhh0']).reshape(1, 256),   # folded layer-0 bias
        'whh0': jnp.asarray(p['whh0']),
        'wih1': jnp.asarray(p['wih1']),          # kept split: no per-step concat
        'whh1': jnp.asarray(p['whh1']),
        'b1l': jnp.asarray(p['bih1'] + p['bhh1']).reshape(1, 256),  # folded layer-1 bias
        'wfc1': jnp.asarray(p['wfc1']),
        'bfc1': jnp.asarray(p['bfc1']).reshape(1, 2),
    }


# ----------------------------------------------------------------------------
# Pure-JAX reference (independent: lax.conv / reduce_window) for verification
# ----------------------------------------------------------------------------
def reference_forward(inputs, p):
    B, T, C, H, W = inputs.shape
    N = B * T
    x = jnp.transpose(inputs.reshape(N, C, H, W), (0, 2, 3, 1))

    def conv_relu(x, w, b, pad):
        y = jax.lax.conv_general_dilated(
            x, w, window_strides=(1, 1), padding=[(pad, pad), (pad, pad)],
            dimension_numbers=('NHWC', 'HWIO', 'NHWC'),
            precision=jax.lax.Precision.HIGHEST)
        return jax.nn.relu(y + b)

    def maxpool(x):
        return jax.lax.reduce_window(x, -jnp.inf, jax.lax.max,
                                     (1, 2, 2, 1), (1, 2, 2, 1), 'VALID')

    y = maxpool(conv_relu(x, p['w1'], p['b1'], 1))
    y = maxpool(conv_relu(y, p['w2'], p['b2'], 1))
    y = conv_relu(y, p['w3'], p['b3'], 0)
    y = y.reshape(N, 32)
    feat = jax.nn.relu(y @ p['wfc'] + p['bfc'])
    xs = feat.reshape(B, T, 64)

    Hd = 64
    h = [jnp.zeros((B, Hd)), jnp.zeros((B, Hd))]
    c = [jnp.zeros((B, Hd)), jnp.zeros((B, Hd))]

    def cell(x_t, h, c, wih, whh, bih, bhh):
        g = x_t @ wih + h @ whh + bih + bhh
        i = jax.nn.sigmoid(g[:, :Hd])
        f = jax.nn.sigmoid(g[:, Hd:2 * Hd])
        gg = jnp.tanh(g[:, 2 * Hd:3 * Hd])
        o = jax.nn.sigmoid(g[:, 3 * Hd:])
        c2 = f * c + i * gg
        return o * jnp.tanh(c2), c2

    for t in range(T):
        x_t = xs[:, t, :]
        h[0], c[0] = cell(x_t, h[0], c[0], p['wih0'], p['whh0'], p['bih0'], p['bhh0'])
        h[1], c[1] = cell(h[0], h[1], c[1], p['wih1'], p['whh1'], p['bih1'], p['bhh1'])

    return jax.nn.relu(h[1]) @ p['wfc1'] + p['bfc1']


# ----------------------------------------------------------------------------
if __name__ == "__main__":
    key = jax.random.PRNGKey(0)
    kx, kp = jax.random.split(key)

    B, T, C, H, W = 2, 8, 3, 4, 4        # spatial 4x4 implied by fc = Linear(32, 64)
    inputs = jax.random.normal(kx, (B, T, C, H, W), jnp.float32)
    params = init_params(kp)
    prep = prepare_params(params)        # one-time weight packing

    fwd = jax.jit(pallas_forward)
    out = jax.block_until_ready(fwd(inputs, prep))
    assert out.shape == (B, 2), out.shape

    ref = reference_forward(inputs, params)
    np.testing.assert_allclose(np.asarray(out), np.asarray(ref),
                               atol=3e-3, rtol=3e-3)
    print("KERNEL_OK")
</pallas_src>

<mosaic_0001>
module attributes {stable_mosaic.version = 11 : i64} {
  func.func @_fused_kernel(%arg0: i32, %arg1: memref<16x48xf32, #tpu.memory_space<vmem>>, %arg2: memref<48x128xf32, #tpu.memory_space<vmem>>, %arg3: memref<1x128xf32, #tpu.memory_space<vmem>>, %arg4: memref<32x64xf32, #tpu.memory_space<vmem>>, %arg5: memref<1x64xf32, #tpu.memory_space<vmem>>, %arg6: memref<16x32xf32, #tpu.memory_space<vmem>>, %arg7: memref<1x32xf32, #tpu.memory_space<vmem>>, %arg8: memref<32x64xf32, #tpu.memory_space<vmem>>, %arg9: memref<1x64xf32, #tpu.memory_space<vmem>>, %arg10: memref<64x256xf32, #tpu.memory_space<vmem>>, %arg11: memref<1x256xf32, #tpu.memory_space<vmem>>, %arg12: memref<64x256xf32, #tpu.memory_space<vmem>>, %arg13: memref<64x256xf32, #tpu.memory_space<vmem>>, %arg14: memref<64x256xf32, #tpu.memory_space<vmem>>, %arg15: memref<1x256xf32, #tpu.memory_space<vmem>>, %arg16: memref<64x2xf32, #tpu.memory_space<vmem>>, %arg17: memref<1x2xf32, #tpu.memory_space<vmem>>, %arg18: memref<2x2xf32, #tpu.memory_space<vmem>>) attributes {dimension_semantics = [#tpu.dimension_semantics<arbitrary>], iteration_bounds = array<i64: 1>, scalar_prefetch = 0 : i64, scratch_operands = 0 : i64, tpu.core_type = #tpu.core_type<tc>, window_params = [{pipeline_mode = #tpu.pipeline_mode<synchronous>, transform_indices = @transform_0, window_bounds = array<i64: 16, 48>}, {pipeline_mode = #tpu.pipeline_mode<synchronous>, transform_indices = @transform_1, window_bounds = array<i64: 48, 128>}, {pipeline_mode = #tpu.pipeline_mode<synchronous>, transform_indices = @transform_2, window_bounds = array<i64: 1, 128>}, {pipeline_mode = #tpu.pipeline_mode<synchronous>, transform_indices = @transform_3, window_bounds = array<i64: 32, 64>}, {pipeline_mode = #tpu.pipeline_mode<synchronous>, transform_indices = @transform_4, window_bounds = array<i64: 1, 64>}, {pipeline_mode = #tpu.pipeline_mode<synchronous>, transform_indices = @transform_5, window_bounds = array<i64: 16, 32>}, {pipeline_mode = #tpu.pipeline_mode<synchronous>, transform_indices = @transform_6, window_bounds = array<i64: 1, 32>}, {pipeline_mode = #tpu.pipeline_mode<synchronous>, transform_indices = @transform_7, window_bounds = array<i64: 32, 64>}, {pipeline_mode = #tpu.pipeline_mode<synchronous>, transform_indices = @transform_8, window_bounds = array<i64: 1, 64>}, {pipeline_mode = #tpu.pipeline_mode<synchronous>, transform_indices = @transform_9, window_bounds = array<i64: 64, 256>}, {pipeline_mode = #tpu.pipeline_mode<synchronous>, transform_indices = @transform_10, window_bounds = array<i64: 1, 256>}, {pipeline_mode = #tpu.pipeline_mode<synchronous>, transform_indices = @transform_11, window_bounds = array<i64: 64, 256>}, {pipeline_mode = #tpu.pipeline_mode<synchronous>, transform_indices = @transform_12, window_bounds = array<i64: 64, 256>}, {pipeline_mode = #tpu.pipeline_mode<synchronous>, transform_indices = @transform_13, window_bounds = array<i64: 64, 256>}, {pipeline_mode = #tpu.pipeline_mode<synchronous>, transform_indices = @transform_14, window_bounds = array<i64: 1, 256>}, {pipeline_mode = #tpu.pipeline_mode<synchronous>, transform_indices = @transform_15, window_bounds = array<i64: 64, 2>}, {pipeline_mode = #tpu.pipeline_mode<synchronous>, transform_indices = @transform_16, window_bounds = array<i64: 1, 2>}, {pipeline_mode = #tpu.pipeline_mode<synchronous>, transform_indices = @transform_17, window_bounds = array<i64: 2, 2>}]} {
    %c0 = arith.constant 0 : index
    %c0_0 = arith.constant 0 : index
    %0 = vector.load %arg1[%c0, %c0_0] : memref<16x48xf32, #tpu.memory_space<vmem>>, vector<16x48xf32>
    %c0_1 = arith.constant 0 : index
    %c0_2 = arith.constant 0 : index
    %1 = vector.load %arg2[%c0_1, %c0_2] : memref<48x128xf32, #tpu.memory_space<vmem>>, vector<48x128xf32>
    %cst = arith.constant dense<0.000000e+00> : vector<16x128xf32>
    %2 = tpu.matmul %0, %1, %cst {dimension_numbers = #tpu.dot_dimension_numbers<[1], [0], [0], [1], [0, 0, 1, 1], [], []>} : vector<16x48xf32>, vector<48x128xf32>, vector<16x128xf32> -> vector<16x128xf32>
    %c0_3 = arith.constant 0 : index
    %c0_4 = arith.constant 0 : index
    %3 = vector.load %arg3[%c0_3, %c0_4] : memref<1x128xf32, #tpu.memory_space<vmem>>, vector<1x128xf32>
    %4 = vector.broadcast %3 : vector<1x128xf32> to vector<16x128xf32>
    %5 = arith.addf %2, %4 : vector<16x128xf32>
    %cst_5 = arith.constant 0.000000e+00 : f32
    %6 = vector.broadcast %cst_5 : f32 to vector<16x128xf32>
    %7 = arith.maximumf %5, %6 : vector<16x128xf32>
    %8 = vector.extract_strided_slice %7 {offsets = [0, 0], sizes = [16, 32], strides = [1, 1]} : vector<16x128xf32> to vector<16x32xf32>
    %9 = vector.extract_strided_slice %7 {offsets = [0, 32], sizes = [16, 32], strides = [1, 1]} : vector<16x128xf32> to vector<16x32xf32>
    %10 = arith.maximumf %8, %9 : vector<16x32xf32>
    %11 = vector.extract_strided_slice %7 {offsets = [0, 64], sizes = [16, 32], strides = [1, 1]} : vector<16x128xf32> to vector<16x32xf32>
    %12 = vector.extract_strided_slice %7 {offsets = [0, 96], sizes = [16, 32], strides = [1, 1]} : vector<16x128xf32> to vector<16x32xf32>
    %13 = arith.maximumf %11, %12 : vector<16x32xf32>
    %14 = arith.maximumf %10, %13 : vector<16x32xf32>
    %c0_6 = arith.constant 0 : index
    %c0_7 = arith.constant 0 : index
    %15 = vector.load %arg4[%c0_6, %c0_7] : memref<32x64xf32, #tpu.memory_space<vmem>>, vector<32x64xf32>
    %cst_8 = arith.constant dense<0.000000e+00> : vector<16x64xf32>
    %16 = tpu.matmul %14, %15, %cst_8 {dimension_numbers = #tpu.dot_dimension_numbers<[1], [0], [0], [1], [0, 0, 1, 1], [], []>} : vector<16x32xf32>, vector<32x64xf32>, vector<16x64xf32> -> vector<16x64xf32>
    %c0_9 = arith.constant 0 : index
    %c0_10 = arith.constant 0 : index
    %17 = vector.load %arg5[%c0_9, %c0_10] : memref<1x64xf32, #tpu.memory_space<vmem>>, vector<1x64xf32>
    %18 = vector.broadcast %17 : vector<1x64xf32> to vector<16x64xf32>
    %19 = arith.addf %16, %18 : vector<16x64xf32>
    %cst_11 = arith.constant 0.000000e+00 : f32
    %20 = vector.broadcast %cst_11 : f32 to vector<16x64xf32>
    %21 = arith.maximumf %19, %20 : vector<16x64xf32>
    %22 = vector.extract_strided_slice %21 {offsets = [0, 0], sizes = [16, 16], strides = [1, 1]} : vector<16x64xf32> to vector<16x16xf32>
    %23 = vector.extract_strided_slice %21 {offsets = [0, 16], sizes = [16, 16], strides = [1, 1]} : vector<16x64xf32> to vector<16x16xf32>
    %24 = arith.maximumf %22, %23 : vector<16x16xf32>
    %25 = vector.extract_strided_slice %21 {offsets = [0, 32], sizes = [16, 16], strides = [1, 1]} : vector<16x64xf32> to vector<16x16xf32>
    %26 = vector.extract_strided_slice %21 {offsets = [0, 48], sizes = [16, 16], strides = [1, 1]} : vector<16x64xf32> to vector<16x16xf32>
    %27 = arith.maximumf %25, %26 : vector<16x16xf32>
    %28 = arith.maximumf %24, %27 : vector<16x16xf32>
    %c0_12 = arith.constant 0 : index
    %c0_13 = arith.constant 0 : index
    %29 = vector.load %arg6[%c0_12, %c0_13] : memref<16x32xf32, #tpu.memory_space<vmem>>, vector<16x32xf32>
    %cst_14 = arith.constant dense<0.000000e+00> : vector<16x32xf32>
    %30 = tpu.matmul %28, %29, %cst_14 {dimension_numbers = #tpu.dot_dimension_numbers<[1], [0], [0], [1], [0, 0, 1, 1], [], []>} : vector<16x16xf32>, vector<16x32xf32>, vector<16x32xf32> -> vector<16x32xf32>
    %c0_15 = arith.constant 0 : index
    %c0_16 = arith.constant 0 : index
    %31 = vector.load %arg7[%c0_15, %c0_16] : memref<1x32xf32, #tpu.memory_space<vmem>>, vector<1x32xf32>
    %32 = vector.broadcast %31 : vector<1x32xf32> to vector<16x32xf32>
    %33 = arith.addf %30, %32 : vector<16x32xf32>
    %cst_17 = arith.constant 0.000000e+00 : f32
    %34 = vector.broadcast %cst_17 : f32 to vector<16x32xf32>
    %35 = arith.maximumf %33, %34 : vector<16x32xf32>
    %c0_18 = arith.constant 0 : index
    %c0_19 = arith.constant 0 : index
    %36 = vector.load %arg8[%c0_18, %c0_19] : memref<32x64xf32, #tpu.memory_space<vmem>>, vector<32x64xf32>
    %cst_20 = arith.constant dense<0.000000e+00> : vector<16x64xf32>
    %37 = tpu.matmul %35, %36, %cst_20 {dimension_numbers = #tpu.dot_dimension_numbers<[1], [0], [0], [1], [0, 0, 1, 1], [], []>} : vector<16x32xf32>, vector<32x64xf32>, vector<16x64xf32> -> vector<16x64xf32>
    %c0_21 = arith.constant 0 : index
    %c0_22 = arith.constant 0 : index
    %38 = vector.load %arg9[%c0_21, %c0_22] : memref<1x64xf32, #tpu.memory_space<vmem>>, vector<1x64xf32>
    %39 = vector.broadcast %38 : vector<1x64xf32> to vector<16x64xf32>
    %40 = arith.addf %37, %39 : vector<16x64xf32>
    %cst_23 = arith.constant 0.000000e+00 : f32
    %41 = vector.broadcast %cst_23 : f32 to vector<16x64xf32>
    %42 = arith.maximumf %40, %41 : vector<16x64xf32>
    %c0_24 = arith.constant 0 : index
    %c0_25 = arith.constant 0 : index
    %43 = vector.load %arg10[%c0_24, %c0_25] : memref<64x256xf32, #tpu.memory_space<vmem>>, vector<64x256xf32>
    %cst_26 = arith.constant dense<0.000000e+00> : vector<16x256xf32>
    %44 = tpu.matmul %42, %43, %cst_26 {dimension_numbers = #tpu.dot_dimension_numbers<[1], [0], [0], [1], [0, 0, 1, 1], [], []>} : vector<16x64xf32>, vector<64x256xf32>, vector<16x256xf32> -> vector<16x256xf32>
    %c0_27 = arith.constant 0 : index
    %c0_28 = arith.constant 0 : index
    %45 = vector.load %arg11[%c0_27, %c0_28] : memref<1x256xf32, #tpu.memory_space<vmem>>, vector<1x256xf32>
    %46 = vector.broadcast %45 : vector<1x256xf32> to vector<16x256xf32>
    %47 = arith.addf %44, %46 : vector<16x256xf32>
    %48 = vector.shape_cast %47 : vector<16x256xf32> to vector<2x8x256xf32>
    %c0_29 = arith.constant 0 : index
    %c0_30 = arith.constant 0 : index
    %49 = vector.load %arg12[%c0_29, %c0_30] : memref<64x256xf32, #tpu.memory_space<vmem>>, vector<64x256xf32>
    %c0_31 = arith.constant 0 : index
    %c0_32 = arith.constant 0 : index
    %50 = vector.load %arg13[%c0_31, %c0_32] : memref<64x256xf32, #tpu.memory_space<vmem>>, vector<64x256xf32>
    %c0_33 = arith.constant 0 : index
    %c0_34 = arith.constant 0 : index
    %51 = vector.load %arg14[%c0_33, %c0_34] : memref<64x256xf32, #tpu.memory_space<vmem>>, vector<64x256xf32>
    %c0_35 = arith.constant 0 : index
    %c0_36 = arith.constant 0 : index
    %52 = vector.load %arg15[%c0_35, %c0_36] : memref<1x256xf32, #tpu.memory_space<vmem>>, vector<1x256xf32>
    %53 = vector.shape_cast %52 : vector<1x256xf32> to vector<1x256xf32>
    %54 = vector.broadcast %53 : vector<1x256xf32> to vector<2x256xf32>
    %cst_37 = arith.constant 0.000000e+00 : f32
    %55 = vector.broadcast %cst_37 : f32 to vector<2x64xf32>
    %cst_38 = arith.constant 0.000000e+00 : f32
    %56 = vector.broadcast %cst_38 : f32 to vector<2x64xf32>
    %cst_39 = arith.constant 0.000000e+00 : f32
    %57 = vector.broadcast %cst_39 : f32 to vector<2x64xf32>
    %cst_40 = arith.constant 0.000000e+00 : f32
    %58 = vector.broadcast %cst_40 : f32 to vector<2x64xf32>
    %59 = vector.extract_strided_slice %48 {offsets = [0, 0, 0], sizes = [2, 1, 256], strides = [1, 1, 1]} : vector<2x8x256xf32> to vector<2x1x256xf32>
    %60 = vector.shape_cast %59 : vector<2x1x256xf32> to vector<2x256xf32>
    %cst_41 = arith.constant dense<0.000000e+00> : vector<2x256xf32>
    %61 = tpu.matmul %55, %49, %cst_41 {dimension_numbers = #tpu.dot_dimension_numbers<[1], [0], [0], [1], [0, 0, 1, 1], [], []>} : vector<2x64xf32>, vector<64x256xf32>, vector<2x256xf32> -> vector<2x256xf32>
    %62 = arith.addf %60, %61 : vector<2x256xf32>
    %63 = vector.extract_strided_slice %62 {offsets = [0, 0], sizes = [2, 64], strides = [1, 1]} : vector<2x256xf32> to vector<2x64xf32>
    %cst_42 = arith.constant 5.000000e-01 : f32
    %64 = vector.broadcast %cst_42 : f32 to vector<2x64xf32>
    %65 = arith.mulf %64, %63 : vector<2x64xf32>
    %66 = math.tanh %65 : vector<2x64xf32>
    %cst_43 = arith.constant 5.000000e-01 : f32
    %67 = vector.broadcast %cst_43 : f32 to vector<2x64xf32>
    %68 = arith.mulf %67, %66 : vector<2x64xf32>
    %cst_44 = arith.constant 5.000000e-01 : f32
    %69 = vector.broadcast %cst_44 : f32 to vector<2x64xf32>
    %70 = arith.addf %68, %69 : vector<2x64xf32>
    %71 = vector.extract_strided_slice %62 {offsets = [0, 64], sizes = [2, 64], strides = [1, 1]} : vector<2x256xf32> to vector<2x64xf32>
    %cst_45 = arith.constant 5.000000e-01 : f32
    %72 = vector.broadcast %cst_45 : f32 to vector<2x64xf32>
    %73 = arith.mulf %72, %71 : vector<2x64xf32>
    %74 = math.tanh %73 : vector<2x64xf32>
    %cst_46 = arith.constant 5.000000e-01 : f32
    %75 = vector.broadcast %cst_46 : f32 to vector<2x64xf32>
    %76 = arith.mulf %75, %74 : vector<2x64xf32>
    %cst_47 = arith.constant 5.000000e-01 : f32
    %77 = vector.broadcast %cst_47 : f32 to vector<2x64xf32>
    %78 = arith.addf %76, %77 : vector<2x64xf32>
    %79 = vector.extract_strided_slice %62 {offsets = [0, 128], sizes = [2, 64], strides = [1, 1]} : vector<2x256xf32> to vector<2x64xf32>
    %80 = math.tanh %79 : vector<2x64xf32>
    %81 = vector.extract_strided_slice %62 {offsets = [0, 192], sizes = [2, 64], strides = [1, 1]} : vector<2x256xf32> to vector<2x64xf32>
    %cst_48 = arith.constant 5.000000e-01 : f32
    %82 = vector.broadcast %cst_48 : f32 to vector<2x64xf32>
    %83 = arith.mulf %82, %81 : vector<2x64xf32>
    %84 = math.tanh %83 : vector<2x64xf32>
    %cst_49 = arith.constant 5.000000e-01 : f32
    %85 = vector.broadcast %cst_49 : f32 to vector<2x64xf32>
    %86 = arith.mulf %85, %84 : vector<2x64xf32>
    %cst_50 = arith.constant 5.000000e-01 : f32
    %87 = vector.broadcast %cst_50 : f32 to vector<2x64xf32>
    %88 = arith.addf %86, %87 : vector<2x64xf32>
    %89 = arith.mulf %78, %56 : vector<2x64xf32>
    %90 = arith.mulf %70, %80 : vector<2x64xf32>
    %91 = arith.addf %89, %90 : vector<2x64xf32>
    %92 = math.tanh %91 : vector<2x64xf32>
    %93 = arith.mulf %88, %92 : vector<2x64xf32>
    %cst_51 = arith.constant dense<0.000000e+00> : vector<2x256xf32>
    %94 = tpu.matmul %93, %50, %cst_51 {dimension_numbers = #tpu.dot_dimension_numbers<[1], [0], [0], [1], [0, 0, 1, 1], [], []>} : vector<2x64xf32>, vector<64x256xf32>, vector<2x256xf32> -> vector<2x256xf32>
    %cst_52 = arith.constant dense<0.000000e+00> : vector<2x256xf32>
    %95 = tpu.matmul %57, %51, %cst_52 {dimension_numbers = #tpu.dot_dimension_numbers<[1], [0], [0], [1], [0, 0, 1, 1], [], []>} : vector<2x64xf32>, vector<64x256xf32>, vector<2x256xf32> -> vector<2x256xf32>
    %96 = arith.addf %94, %95 : vector<2x256xf32>
    %97 = arith.addf %96, %54 : vector<2x256xf32>
    %98 = vector.extract_strided_slice %97 {offsets = [0, 0], sizes = [2, 64], strides = [1, 1]} : vector<2x256xf32> to vector<2x64xf32>
    %cst_53 = arith.constant 5.000000e-01 : f32
    %99 = vector.broadcast %cst_53 : f32 to vector<2x64xf32>
    %100 = arith.mulf %99, %98 : vector<2x64xf32>
    %101 = math.tanh %100 : vector<2x64xf32>
    %cst_54 = arith.constant 5.000000e-01 : f32
    %102 = vector.broadcast %cst_54 : f32 to vector<2x64xf32>
    %103 = arith.mulf %102, %101 : vector<2x64xf32>
    %cst_55 = arith.constant 5.000000e-01 : f32
    %104 = vector.broadcast %cst_55 : f32 to vector<2x64xf32>
    %105 = arith.addf %103, %104 : vector<2x64xf32>
    %106 = vector.extract_strided_slice %97 {offsets = [0, 64], sizes = [2, 64], strides = [1, 1]} : vector<2x256xf32> to vector<2x64xf32>
    %cst_56 = arith.constant 5.000000e-01 : f32
    %107 = vector.broadcast %cst_56 : f32 to vector<2x64xf32>
    %108 = arith.mulf %107, %106 : vector<2x64xf32>
    %109 = math.tanh %108 : vector<2x64xf32>
    %cst_57 = arith.constant 5.000000e-01 : f32
    %110 = vector.broadcast %cst_57 : f32 to vector<2x64xf32>
    %111 = arith.mulf %110, %109 : vector<2x64xf32>
    %cst_58 = arith.constant 5.000000e-01 : f32
    %112 = vector.broadcast %cst_58 : f32 to vector<2x64xf32>
    %113 = arith.addf %111, %112 : vector<2x64xf32>
    %114 = vector.extract_strided_slice %97 {offsets = [0, 128], sizes = [2, 64], strides = [1, 1]} : vector<2x256xf32> to vector<2x64xf32>
    %115 = math.tanh %114 : vector<2x64xf32>
    %116 = vector.extract_strided_slice %97 {offsets = [0, 192], sizes = [2, 64], strides = [1, 1]} : vector<2x256xf32> to vector<2x64xf32>
    %cst_59 = arith.constant 5.000000e-01 : f32
    %117 = vector.broadcast %cst_59 : f32 to vector<2x64xf32>
    %118 = arith.mulf %117, %116 : vector<2x64xf32>
    %119 = math.tanh %118 : vector<2x64xf32>
    %cst_60 = arith.constant 5.000000e-01 : f32
    %120 = vector.broadcast %cst_60 : f32 to vector<2x64xf32>
    %121 = arith.mulf %120, %119 : vector<2x64xf32>
    %cst_61 = arith.constant 5.000000e-01 : f32
    %122 = vector.broadcast %cst_61 : f32 to vector<2x64xf32>
    %123 = arith.addf %121, %122 : vector<2x64xf32>
    %124 = arith.mulf %113, %58 : vector<2x64xf32>
    %125 = arith.mulf %105, %115 : vector<2x64xf32>
    %126 = arith.addf %124, %125 : vector<2x64xf32>
    %127 = math.tanh %126 : vector<2x64xf32>
    %128 = arith.mulf %123, %127 : vector<2x64xf32>
    %129 = vector.extract_strided_slice %48 {offsets = [0, 1, 0], sizes = [2, 1, 256], strides = [1, 1, 1]} : vector<2x8x256xf32> to vector<2x1x256xf32>
    %130 = vector.shape_cast %129 : vector<2x1x256xf32> to vector<2x256xf32>
    %cst_62 = arith.constant dense<0.000000e+00> : vector<2x256xf32>
    %131 = tpu.matmul %93, %49, %cst_62 {dimension_numbers = #tpu.dot_dimension_numbers<[1], [0], [0], [1], [0, 0, 1, 1], [], []>} : vector<2x64xf32>, vector<64x256xf32>, vector<2x256xf32> -> vector<2x256xf32>
    %132 = arith.addf %130, %131 : vector<2x256xf32>
    %133 = vector.extract_strided_slice %132 {offsets = [0, 0], sizes = [2, 64], strides = [1, 1]} : vector<2x256xf32> to vector<2x64xf32>
    %cst_63 = arith.constant 5.000000e-01 : f32
    %134 = vector.broadcast %cst_63 : f32 to vector<2x64xf32>
    %135 = arith.mulf %134, %133 : vector<2x64xf32>
    %136 = math.tanh %135 : vector<2x64xf32>
    %cst_64 = arith.constant 5.000000e-01 : f32
    %137 = vector.broadcast %cst_64 : f32 to vector<2x64xf32>
    %138 = arith.mulf %137, %136 : vector<2x64xf32>
    %cst_65 = arith.constant 5.000000e-01 : f32
    %139 = vector.broadcast %cst_65 : f32 to vector<2x64xf32>
    %140 = arith.addf %138, %139 : vector<2x64xf32>
    %141 = vector.extract_strided_slice %132 {offsets = [0, 64], sizes = [2, 64], strides = [1, 1]} : vector<2x256xf32> to vector<2x64xf32>
    %cst_66 = arith.constant 5.000000e-01 : f32
    %142 = vector.broadcast %cst_66 : f32 to vector<2x64xf32>
    %143 = arith.mulf %142, %141 : vector<2x64xf32>
    %144 = math.tanh %143 : vector<2x64xf32>
    %cst_67 = arith.constant 5.000000e-01 : f32
    %145 = vector.broadcast %cst_67 : f32 to vector<2x64xf32>
    %146 = arith.mulf %145, %144 : vector<2x64xf32>
    %cst_68 = arith.constant 5.000000e-01 : f32
    %147 = vector.broadcast %cst_68 : f32 to vector<2x64xf32>
    %148 = arith.addf %146, %147 : vector<2x64xf32>
    %149 = vector.extract_strided_slice %132 {offsets = [0, 128], sizes = [2, 64], strides = [1, 1]} : vector<2x256xf32> to vector<2x64xf32>
    %150 = math.tanh %149 : vector<2x64xf32>
    %151 = vector.extract_strided_slice %132 {offsets = [0, 192], sizes = [2, 64], strides = [1, 1]} : vector<2x256xf32> to vector<2x64xf32>
    %cst_69 = arith.constant 5.000000e-01 : f32
    %152 = vector.broadcast %cst_69 : f32 to vector<2x64xf32>
    %153 = arith.mulf %152, %151 : vector<2x64xf32>
    %154 = math.tanh %153 : vector<2x64xf32>
    %cst_70 = arith.constant 5.000000e-01 : f32
    %155 = vector.broadcast %cst_70 : f32 to vector<2x64xf32>
    %156 = arith.mulf %155, %154 : vector<2x64xf32>
    %cst_71 = arith.constant 5.000000e-01 : f32
    %157 = vector.broadcast %cst_71 : f32 to vector<2x64xf32>
    %158 = arith.addf %156, %157 : vector<2x64xf32>
    %159 = arith.mulf %148, %91 : vector<2x64xf32>
    %160 = arith.mulf %140, %150 : vector<2x64xf32>
    %161 = arith.addf %159, %160 : vector<2x64xf32>
    %162 = math.tanh %161 : vector<2x64xf32>
    %163 = arith.mulf %158, %162 : vector<2x64xf32>
    %cst_72 = arith.constant dense<0.000000e+00> : vector<2x256xf32>
    %164 = tpu.matmul %163, %50, %cst_72 {dimension_numbers = #tpu.dot_dimension_numbers<[1], [0], [0], [1], [0, 0, 1, 1], [], []>} : vector<2x64xf32>, vector<64x256xf32>, vector<2x256xf32> -> vector<2x256xf32>
    %cst_73 = arith.constant dense<0.000000e+00> : vector<2x256xf32>
    %165 = tpu.matmul %128, %51, %cst_73 {dimension_numbers = #tpu.dot_dimension_numbers<[1], [0], [0], [1], [0, 0, 1, 1], [], []>} : vector<2x64xf32>, vector<64x256xf32>, vector<2x256xf32> -> vector<2x256xf32>
    %166 = arith.addf %164, %165 : vector<2x256xf32>
    %167 = arith.addf %166, %54 : vector<2x256xf32>
    %168 = vector.extract_strided_slice %167 {offsets = [0, 0], sizes = [2, 64], strides = [1, 1]} : vector<2x256xf32> to vector<2x64xf32>
    %cst_74 = arith.constant 5.000000e-01 : f32
    %169 = vector.broadcast %cst_74 : f32 to vector<2x64xf32>
    %170 = arith.mulf %169, %168 : vector<2x64xf32>
    %171 = math.tanh %170 : vector<2x64xf32>
    %cst_75 = arith.constant 5.000000e-01 : f32
    %172 = vector.broadcast %cst_75 : f32 to vector<2x64xf32>
    %173 = arith.mulf %172, %171 : vector<2x64xf32>
    %cst_76 = arith.constant 5.000000e-01 : f32
    %174 = vector.broadcast %cst_76 : f32 to vector<2x64xf32>
    %175 = arith.addf %173, %174 : vector<2x64xf32>
    %176 = vector.extract_strided_slice %167 {offsets = [0, 64], sizes = [2, 64], strides = [1, 1]} : vector<2x256xf32> to vector<2x64xf32>
    %cst_77 = arith.constant 5.000000e-01 : f32
    %177 = vector.broadcast %cst_77 : f32 to vector<2x64xf32>
    %178 = arith.mulf %177, %176 : vector<2x64xf32>
    %179 = math.tanh %178 : vector<2x64xf32>
    %cst_78 = arith.constant 5.000000e-01 : f32
    %180 = vector.broadcast %cst_78 : f32 to vector<2x64xf32>
    %181 = arith.mulf %180, %179 : vector<2x64xf32>
    %cst_79 = arith.constant 5.000000e-01 : f32
    %182 = vector.broadcast %cst_79 : f32 to vector<2x64xf32>
    %183 = arith.addf %181, %182 : vector<2x64xf32>
    %184 = vector.extract_strided_slice %167 {offsets = [0, 128], sizes = [2, 64], strides = [1, 1]} : vector<2x256xf32> to vector<2x64xf32>
    %185 = math.tanh %184 : vector<2x64xf32>
    %186 = vector.extract_strided_slice %167 {offsets = [0, 192], sizes = [2, 64], strides = [1, 1]} : vector<2x256xf32> to vector<2x64xf32>
    %cst_80 = arith.constant 5.000000e-01 : f32
    %187 = vector.broadcast %cst_80 : f32 to vector<2x64xf32>
    %188 = arith.mulf %187, %186 : vector<2x64xf32>
    %189 = math.tanh %188 : vector<2x64xf32>
    %cst_81 = arith.constant 5.000000e-01 : f32
    %190 = vector.broadcast %cst_81 : f32 to vector<2x64xf32>
    %191 = arith.mulf %190, %189 : vector<2x64xf32>
    %cst_82 = arith.constant 5.000000e-01 : f32
    %192 = vector.broadcast %cst_82 : f32 to vector<2x64xf32>
    %193 = arith.addf %191, %192 : vector<2x64xf32>
    %194 = arith.mulf %183, %126 : vector<2x64xf32>
    %195 = arith.mulf %175, %185 : vector<2x64xf32>
    %196 = arith.addf %194, %195 : vector<2x64xf32>
    %197 = math.tanh %196 : vector<2x64xf32>
    %198 = arith.mulf %193, %197 : vector<2x64xf32>
    %199 = vector.extract_strided_slice %48 {offsets = [0, 2, 0], sizes = [2, 1, 256], strides = [1, 1, 1]} : vector<2x8x256xf32> to vector<2x1x256xf32>
    %200 = vector.shape_cast %199 : vector<2x1x256xf32> to vector<2x256xf32>
    %cst_83 = arith.constant dense<0.000000e+00> : vector<2x256xf32>
    %201 = tpu.matmul %163, %49, %cst_83 {dimension_numbers = #tpu.dot_dimension_numbers<[1], [0], [0], [1], [0, 0, 1, 1], [], []>} : vector<2x64xf32>, vector<64x256xf32>, vector<2x256xf32> -> vector<2x256xf32>
    %202 = arith.addf %200, %201 : vector<2x256xf32>
    %203 = vector.extract_strided_slice %202 {offsets = [0, 0], sizes = [2, 64], strides = [1, 1]} : vector<2x256xf32> to vector<2x64xf32>
    %cst_84 = arith.constant 5.000000e-01 : f32
    %204 = vector.broadcast %cst_84 : f32 to vector<2x64xf32>
    %205 = arith.mulf %204, %203 : vector<2x64xf32>
    %206 = math.tanh %205 : vector<2x64xf32>
    %cst_85 = arith.constant 5.000000e-01 : f32
    %207 = vector.broadcast %cst_85 : f32 to vector<2x64xf32>
    %208 = arith.mulf %207, %206 : vector<2x64xf32>
    %cst_86 = arith.constant 5.000000e-01 : f32
    %209 = vector.broadcast %cst_86 : f32 to vector<2x64xf32>
    %210 = arith.addf %208, %209 : vector<2x64xf32>
    %211 = vector.extract_strided_slice %202 {offsets = [0, 64], sizes = [2, 64], strides = [1, 1]} : vector<2x256xf32> to vector<2x64xf32>
    %cst_87 = arith.constant 5.000000e-01 : f32
    %212 = vector.broadcast %cst_87 : f32 to vector<2x64xf32>
    %213 = arith.mulf %212, %211 : vector<2x64xf32>
    %214 = math.tanh %213 : vector<2x64xf32>
    %cst_88 = arith.constant 5.000000e-01 : f32
    %215 = vector.broadcast %cst_88 : f32 to vector<2x64xf32>
    %216 = arith.mulf %215, %214 : vector<2x64xf32>
    %cst_89 = arith.constant 5.000000e-01 : f32
    %217 = vector.broadcast %cst_89 : f32 to vector<2x64xf32>
    %218 = arith.addf %216, %217 : vector<2x64xf32>
    %219 = vector.extract_strided_slice %202 {offsets = [0, 128], sizes = [2, 64], strides = [1, 1]} : vector<2x256xf32> to vector<2x64xf32>
    %220 = math.tanh %219 : vector<2x64xf32>
    %221 = vector.extract_strided_slice %202 {offsets = [0, 192], sizes = [2, 64], strides = [1, 1]} : vector<2x256xf32> to vector<2x64xf32>
    %cst_90 = arith.constant 5.000000e-01 : f32
    %222 = vector.broadcast %cst_90 : f32 to vector<2x64xf32>
    %223 = arith.mulf %222, %221 : vector<2x64xf32>
    %224 = math.tanh %223 : vector<2x64xf32>
    %cst_91 = arith.constant 5.000000e-01 : f32
    %225 = vector.broadcast %cst_91 : f32 to vector<2x64xf32>
    %226 = arith.mulf %225, %224 : vector<2x64xf32>
    %cst_92 = arith.constant 5.000000e-01 : f32
    %227 = vector.broadcast %cst_92 : f32 to vector<2x64xf32>
    %228 = arith.addf %226, %227 : vector<2x64xf32>
    %229 = arith.mulf %218, %161 : vector<2x64xf32>
    %230 = arith.mulf %210, %220 : vector<2x64xf32>
    %231 = arith.addf %229, %230 : vector<2x64xf32>
    %232 = math.tanh %231 : vector<2x64xf32>
    %233 = arith.mulf %228, %232 : vector<2x64xf32>
    %cst_93 = arith.constant dense<0.000000e+00> : vector<2x256xf32>
    %234 = tpu.matmul %233, %50, %cst_93 {dimension_numbers = #tpu.dot_dimension_numbers<[1], [0], [0], [1], [0, 0, 1, 1], [], []>} : vector<2x64xf32>, vector<64x256xf32>, vector<2x256xf32> -> vector<2x256xf32>
    %cst_94 = arith.constant dense<0.000000e+00> : vector<2x256xf32>
    %235 = tpu.matmul %198, %51, %cst_94 {dimension_numbers = #tpu.dot_dimension_numbers<[1], [0], [0], [1], [0, 0, 1, 1], [], []>} : vector<2x64xf32>, vector<64x256xf32>, vector<2x256xf32> -> vector<2x256xf32>
    %236 = arith.addf %234, %235 : vector<2x256xf32>
    %237 = arith.addf %236, %54 : vector<2x256xf32>
    %238 = vector.extract_strided_slice %237 {offsets = [0, 0], sizes = [2, 64], strides = [1, 1]} : vector<2x256xf32> to vector<2x64xf32>
    %cst_95 = arith.constant 5.000000e-01 : f32
    %239 = vector.broadcast %cst_95 : f32 to vector<2x64xf32>
    %240 = arith.mulf %239, %238 : vector<2x64xf32>
    %241 = math.tanh %240 : vector<2x64xf32>
    %cst_96 = arith.constant 5.000000e-01 : f32
    %242 = vector.broadcast %cst_96 : f32 to vector<2x64xf32>
    %243 = arith.mulf %242, %241 : vector<2x64xf32>
    %cst_97 = arith.constant 5.000000e-01 : f32
    %244 = vector.broadcast %cst_97 : f32 to vector<2x64xf32>
    %245 = arith.addf %243, %244 : vector<2x64xf32>
    %246 = vector.extract_strided_slice %237 {offsets = [0, 64], sizes = [2, 64], strides = [1, 1]} : vector<2x256xf32> to vector<2x64xf32>
    %cst_98 = arith.constant 5.000000e-01 : f32
    %247 = vector.broadcast %cst_98 : f32 to vector<2x64xf32>
    %248 = arith.mulf %247, %246 : vector<2x64xf32>
    %249 = math.tanh %248 : vector<2x64xf32>
    %cst_99 = arith.constant 5.000000e-01 : f32
    %250 = vector.broadcast %cst_99 : f32 to vector<2x64xf32>
    %251 = arith.mulf %250, %249 : vector<2x64xf32>
    %cst_100 = arith.constant 5.000000e-01 : f32
    %252 = vector.broadcast %cst_100 : f32 to vector<2x64xf32>
    %253 = arith.addf %251, %252 : vector<2x64xf32>
    %254 = vector.extract_strided_slice %237 {offsets = [0, 128], sizes = [2, 64], strides = [1, 1]} : vector<2x256xf32> to vector<2x64xf32>
    %255 = math.tanh %254 : vector<2x64xf32>
    %256 = vector.extract_strided_slice %237 {offsets = [0, 192], sizes = [2, 64], strides = [1, 1]} : vector<2x256xf32> to vector<2x64xf32>
    %cst_101 = arith.constant 5.000000e-01 : f32
    %257 = vector.broadcast %cst_101 : f32 to vector<2x64xf32>
    %258 = arith.mulf %257, %256 : vector<2x64xf32>
    %259 = math.tanh %258 : vector<2x64xf32>
    %cst_102 = arith.constant 5.000000e-01 : f32
    %260 = vector.broadcast %cst_102 : f32 to vector<2x64xf32>
    %261 = arith.mulf %260, %259 : vector<2x64xf32>
    %cst_103 = arith.constant 5.000000e-01 : f32
    %262 = vector.broadcast %cst_103 : f32 to vector<2x64xf32>
    %263 = arith.addf %261, %262 : vector<2x64xf32>
    %264 = arith.mulf %253, %196 : vector<2x64xf32>
    %265 = arith.mulf %245, %255 : vector<2x64xf32>
    %266 = arith.addf %264, %265 : vector<2x64xf32>
    %267 = math.tanh %266 : vector<2x64xf32>
    %268 = arith.mulf %263, %267 : vector<2x64xf32>
    %269 = vector.extract_strided_slice %48 {offsets = [0, 3, 0], sizes = [2, 1, 256], strides = [1, 1, 1]} : vector<2x8x256xf32> to vector<2x1x256xf32>
    %270 = vector.shape_cast %269 : vector<2x1x256xf32> to vector<2x256xf32>
    %cst_104 = arith.constant dense<0.000000e+00> : vector<2x256xf32>
    %271 = tpu.matmul %233, %49, %cst_104 {dimension_numbers = #tpu.dot_dimension_numbers<[1], [0], [0], [1], [0, 0, 1, 1], [], []>} : vector<2x64xf32>, vector<64x256xf32>, vector<2x256xf32> -> vector<2x256xf32>
    %272 = arith.addf %270, %271 : vector<2x256xf32>
    %273 = vector.extract_strided_slice %272 {offsets = [0, 0], sizes = [2, 64], strides = [1, 1]} : vector<2x256xf32> to vector<2x64xf32>
    %cst_105 = arith.constant 5.000000e-01 : f32
    %274 = vector.broadcast %cst_105 : f32 to vector<2x64xf32>
    %275 = arith.mulf %274, %273 : vector<2x64xf32>
    %276 = math.tanh %275 : vector<2x64xf32>
    %cst_106 = arith.constant 5.000000e-01 : f32
    %277 = vector.broadcast %cst_106 : f32 to vector<2x64xf32>
    %278 = arith.mulf %277, %276 : vector<2x64xf32>
    %cst_107 = arith.constant 5.000000e-01 : f32
    %279 = vector.broadcast %cst_107 : f32 to vector<2x64xf32>
    %280 = arith.addf %278, %279 : vector<2x64xf32>
    %281 = vector.extract_strided_slice %272 {offsets = [0, 64], sizes = [2, 64], strides = [1, 1]} : vector<2x256xf32> to vector<2x64xf32>
    %cst_108 = arith.constant 5.000000e-01 : f32
    %282 = vector.broadcast %cst_108 : f32 to vector<2x64xf32>
    %283 = arith.mulf %282, %281 : vector<2x64xf32>
    %284 = math.tanh %283 : vector<2x64xf32>
    %cst_109 = arith.constant 5.000000e-01 : f32
    %285 = vector.broadcast %cst_109 : f32 to vector<2x64xf32>
    %286 = arith.mulf %285, %284 : vector<2x64xf32>
    %cst_110 = arith.constant 5.000000e-01 : f32
    %287 = vector.broadcast %cst_110 : f32 to vector<2x64xf32>
    %288 = arith.addf %286, %287 : vector<2x64xf32>
    %289 = vector.extract_strided_slice %272 {offsets = [0, 128], sizes = [2, 64], strides = [1, 1]} : vector<2x256xf32> to vector<2x64xf32>
    %290 = math.tanh %289 : vector<2x64xf32>
    %291 = vector.extract_strided_slice %272 {offsets = [0, 192], sizes = [2, 64], strides = [1, 1]} : vector<2x256xf32> to vector<2x64xf32>
    %cst_111 = arith.constant 5.000000e-01 : f32
    %292 = vector.broadcast %cst_111 : f32 to vector<2x64xf32>
    %293 = arith.mulf %292, %291 : vector<2x64xf32>
    %294 = math.tanh %293 : vector<2x64xf32>
    %cst_112 = arith.constant 5.000000e-01 : f32
    %295 = vector.broadcast %cst_112 : f32 to vector<2x64xf32>
    %296 = arith.mulf %295, %294 : vector<2x64xf32>
    %cst_113 = arith.constant 5.000000e-01 : f32
    %297 = vector.broadcast %cst_113 : f32 to vector<2x64xf32>
    %298 = arith.addf %296, %297 : vector<2x64xf32>
    %299 = arith.mulf %288, %231 : vector<2x64xf32>
    %300 = arith.mulf %280, %290 : vector<2x64xf32>
    %301 = arith.addf %299, %300 : vector<2x64xf32>
    %302 = math.tanh %301 : vector<2x64xf32>
    %303 = arith.mulf %298, %302 : vector<2x64xf32>
    %cst_114 = arith.constant dense<0.000000e+00> : vector<2x256xf32>
    %304 = tpu.matmul %303, %50, %cst_114 {dimension_numbers = #tpu.dot_dimension_numbers<[1], [0], [0], [1], [0, 0, 1, 1], [], []>} : vector<2x64xf32>, vector<64x256xf32>, vector<2x256xf32> -> vector<2x256xf32>
    %cst_115 = arith.constant dense<0.000000e+00> : vector<2x256xf32>
    %305 = tpu.matmul %268, %51, %cst_115 {dimension_numbers = #tpu.dot_dimension_numbers<[1], [0], [0], [1], [0, 0, 1, 1], [], []>} : vector<2x64xf32>, vector<64x256xf32>, vector<2x256xf32> -> vector<2x256xf32>
    %306 = arith.addf %304, %305 : vector<2x256xf32>
    %307 = arith.addf %306, %54 : vector<2x256xf32>
    %308 = vector.extract_strided_slice %307 {offsets = [0, 0], sizes = [2, 64], strides = [1, 1]} : vector<2x256xf32> to vector<2x64xf32>
    %cst_116 = arith.constant 5.000000e-01 : f32
    %309 = vector.broadcast %cst_116 : f32 to vector<2x64xf32>
    %310 = arith.mulf %309, %308 : vector<2x64xf32>
    %311 = math.tanh %310 : vector<2x64xf32>
    %cst_117 = arith.constant 5.000000e-01 : f32
    %312 = vector.broadcast %cst_117 : f32 to vector<2x64xf32>
    %313 = arith.mulf %312, %311 : vector<2x64xf32>
    %cst_118 = arith.constant 5.000000e-01 : f32
    %314 = vector.broadcast %cst_118 : f32 to vector<2x64xf32>
    %315 = arith.addf %313, %314 : vector<2x64xf32>
    %316 = vector.extract_strided_slice %307 {offsets = [0, 64], sizes = [2, 64], strides = [1, 1]} : vector<2x256xf32> to vector<2x64xf32>
    %cst_119 = arith.constant 5.000000e-01 : f32
    %317 = vector.broadcast %cst_119 : f32 to vector<2x64xf32>
    %318 = arith.mulf %317, %316 : vector<2x64xf32>
    %319 = math.tanh %318 : vector<2x64xf32>
    %cst_120 = arith.constant 5.000000e-01 : f32
    %320 = vector.broadcast %cst_120 : f32 to vector<2x64xf32>
    %321 = arith.mulf %320, %319 : vector<2x64xf32>
    %cst_121 = arith.constant 5.000000e-01 : f32
    %322 = vector.broadcast %cst_121 : f32 to vector<2x64xf32>
    %323 = arith.addf %321, %322 : vector<2x64xf32>
    %324 = vector.extract_strided_slice %307 {offsets = [0, 128], sizes = [2, 64], strides = [1, 1]} : vector<2x256xf32> to vector<2x64xf32>
    %325 = math.tanh %324 : vector<2x64xf32>
    %326 = vector.extract_strided_slice %307 {offsets = [0, 192], sizes = [2, 64], strides = [1, 1]} : vector<2x256xf32> to vector<2x64xf32>
    %cst_122 = arith.constant 5.000000e-01 : f32
    %327 = vector.broadcast %cst_122 : f32 to vector<2x64xf32>
    %328 = arith.mulf %327, %326 : vector<2x64xf32>
    %329 = math.tanh %328 : vector<2x64xf32>
    %cst_123 = arith.constant 5.000000e-01 : f32
    %330 = vector.broadcast %cst_123 : f32 to vector<2x64xf32>
    %331 = arith.mulf %330, %329 : vector<2x64xf32>
    %cst_124 = arith.constant 5.000000e-01 : f32
    %332 = vector.broadcast %cst_124 : f32 to vector<2x64xf32>
    %333 = arith.addf %331, %332 : vector<2x64xf32>
    %334 = arith.mulf %323, %266 : vector<2x64xf32>
    %335 = arith.mulf %315, %325 : vector<2x64xf32>
    %336 = arith.addf %334, %335 : vector<2x64xf32>
    %337 = math.tanh %336 : vector<2x64xf32>
    %338 = arith.mulf %333, %337 : vector<2x64xf32>
    %339 = vector.extract_strided_slice %48 {offsets = [0, 4, 0], sizes = [2, 1, 256], strides = [1, 1, 1]} : vector<2x8x256xf32> to vector<2x1x256xf32>
    %340 = vector.shape_cast %339 : vector<2x1x256xf32> to vector<2x256xf32>
    %cst_125 = arith.constant dense<0.000000e+00> : vector<2x256xf32>
    %341 = tpu.matmul %303, %49, %cst_125 {dimension_numbers = #tpu.dot_dimension_numbers<[1], [0], [0], [1], [0, 0, 1, 1], [], []>} : vector<2x64xf32>, vector<64x256xf32>, vector<2x256xf32> -> vector<2x256xf32>
    %342 = arith.addf %340, %341 : vector<2x256xf32>
    %343 = vector.extract_strided_slice %342 {offsets = [0, 0], sizes = [2, 64], strides = [1, 1]} : vector<2x256xf32> to vector<2x64xf32>
    %cst_126 = arith.constant 5.000000e-01 : f32
    %344 = vector.broadcast %cst_126 : f32 to vector<2x64xf32>
    %345 = arith.mulf %344, %343 : vector<2x64xf32>
    %346 = math.tanh %345 : vector<2x64xf32>
    %cst_127 = arith.constant 5.000000e-01 : f32
    %347 = vector.broadcast %cst_127 : f32 to vector<2x64xf32>
    %348 = arith.mulf %347, %346 : vector<2x64xf32>
    %cst_128 = arith.constant 5.000000e-01 : f32
    %349 = vector.broadcast %cst_128 : f32 to vector<2x64xf32>
    %350 = arith.addf %348, %349 : vector<2x64xf32>
    %351 = vector.extract_strided_slice %342 {offsets = [0, 64], sizes = [2, 64], strides = [1, 1]} : vector<2x256xf32> to vector<2x64xf32>
    %cst_129 = arith.constant 5.000000e-01 : f32
    %352 = vector.broadcast %cst_129 : f32 to vector<2x64xf32>
    %353 = arith.mulf %352, %351 : vector<2x64xf32>
    %354 = math.tanh %353 : vector<2x64xf32>
    %cst_130 = arith.constant 5.000000e-01 : f32
    %355 = vector.broadcast %cst_130 : f32 to vector<2x64xf32>
    %356 = arith.mulf %355, %354 : vector<2x64xf32>
    %cst_131 = arith.constant 5.000000e-01 : f32
    %357 = vector.broadcast %cst_131 : f32 to vector<2x64xf32>
    %358 = arith.addf %356, %357 : vector<2x64xf32>
    %359 = vector.extract_strided_slice %342 {offsets = [0, 128], sizes = [2, 64], strides = [1, 1]} : vector<2x256xf32> to vector<2x64xf32>
    %360 = math.tanh %359 : vector<2x64xf32>
    %361 = vector.extract_strided_slice %342 {offsets = [0, 192], sizes = [2, 64], strides = [1, 1]} : vector<2x256xf32> to vector<2x64xf32>
    %cst_132 = arith.constant 5.000000e-01 : f32
    %362 = vector.broadcast %cst_132 : f32 to vector<2x64xf32>
    %363 = arith.mulf %362, %361 : vector<2x64xf32>
    %364 = math.tanh %363 : vector<2x64xf32>
    %cst_133 = arith.constant 5.000000e-01 : f32
    %365 = vector.broadcast %cst_133 : f32 to vector<2x64xf32>
    %366 = arith.mulf %365, %364 : vector<2x64xf32>
    %cst_134 = arith.constant 5.000000e-01 : f32
    %367 = vector.broadcast %cst_134 : f32 to vector<2x64xf32>
    %368 = arith.addf %366, %367 : vector<2x64xf32>
    %369 = arith.mulf %358, %301 : vector<2x64xf32>
    %370 = arith.mulf %350, %360 : vector<2x64xf32>
    %371 = arith.addf %369, %370 : vector<2x64xf32>
    %372 = math.tanh %371 : vector<2x64xf32>
    %373 = arith.mulf %368, %372 : vector<2x64xf32>
    %cst_135 = arith.constant dense<0.000000e+00> : vector<2x256xf32>
    %374 = tpu.matmul %373, %50, %cst_135 {dimension_numbers = #tpu.dot_dimension_numbers<[1], [0], [0], [1], [0, 0, 1, 1], [], []>} : vector<2x64xf32>, vector<64x256xf32>, vector<2x256xf32> -> vector<2x256xf32>
    %cst_136 = arith.constant dense<0.000000e+00> : vector<2x256xf32>
    %375 = tpu.matmul %338, %51, %cst_136 {dimension_numbers = #tpu.dot_dimension_numbers<[1], [0], [0], [1], [0, 0, 1, 1], [], []>} : vector<2x64xf32>, vector<64x256xf32>, vector<2x256xf32> -> vector<2x256xf32>
    %376 = arith.addf %374, %375 : vector<2x256xf32>
    %377 = arith.addf %376, %54 : vector<2x256xf32>
    %378 = vector.extract_strided_slice %377 {offsets = [0, 0], sizes = [2, 64], strides = [1, 1]} : vector<2x256xf32> to vector<2x64xf32>
    %cst_137 = arith.constant 5.000000e-01 : f32
    %379 = vector.broadcast %cst_137 : f32 to vector<2x64xf32>
    %380 = arith.mulf %379, %378 : vector<2x64xf32>
    %381 = math.tanh %380 : vector<2x64xf32>
    %cst_138 = arith.constant 5.000000e-01 : f32
    %382 = vector.broadcast %cst_138 : f32 to vector<2x64xf32>
    %383 = arith.mulf %382, %381 : vector<2x64xf32>
    %cst_139 = arith.constant 5.000000e-01 : f32
    %384 = vector.broadcast %cst_139 : f32 to vector<2x64xf32>
    %385 = arith.addf %383, %384 : vector<2x64xf32>
    %386 = vector.extract_strided_slice %377 {offsets = [0, 64], sizes = [2, 64], strides = [1, 1]} : vector<2x256xf32> to vector<2x64xf32>
    %cst_140 = arith.constant 5.000000e-01 : f32
    %387 = vector.broadcast %cst_140 : f32 to vector<2x64xf32>
    %388 = arith.mulf %387, %386 : vector<2x64xf32>
    %389 = math.tanh %388 : vector<2x64xf32>
    %cst_141 = arith.constant 5.000000e-01 : f32
    %390 = vector.broadcast %cst_141 : f32 to vector<2x64xf32>
    %391 = arith.mulf %390, %389 : vector<2x64xf32>
    %cst_142 = arith.constant 5.000000e-01 : f32
    %392 = vector.broadcast %cst_142 : f32 to vector<2x64xf32>
    %393 = arith.addf %391, %392 : vector<2x64xf32>
    %394 = vector.extract_strided_slice %377 {offsets = [0, 128], sizes = [2, 64], strides = [1, 1]} : vector<2x256xf32> to vector<2x64xf32>
    %395 = math.tanh %394 : vector<2x64xf32>
    %396 = vector.extract_strided_slice %377 {offsets = [0, 192], sizes = [2, 64], strides = [1, 1]} : vector<2x256xf32> to vector<2x64xf32>
    %cst_143 = arith.constant 5.000000e-01 : f32
    %397 = vector.broadcast %cst_143 : f32 to vector<2x64xf32>
    %398 = arith.mulf %397, %396 : vector<2x64xf32>
    %399 = math.tanh %398 : vector<2x64xf32>
    %cst_144 = arith.constant 5.000000e-01 : f32
    %400 = vector.broadcast %cst_144 : f32 to vector<2x64xf32>
    %401 = arith.mulf %400, %399 : vector<2x64xf32>
    %cst_145 = arith.constant 5.000000e-01 : f32
    %402 = vector.broadcast %cst_145 : f32 to vector<2x64xf32>
    %403 = arith.addf %401, %402 : vector<2x64xf32>
    %404 = arith.mulf %393, %336 : vector<2x64xf32>
    %405 = arith.mulf %385, %395 : vector<2x64xf32>
    %406 = arith.addf %404, %405 : vector<2x64xf32>
    %407 = math.tanh %406 : vector<2x64xf32>
    %408 = arith.mulf %403, %407 : vector<2x64xf32>
    %409 = vector.extract_strided_slice %48 {offsets = [0, 5, 0], sizes = [2, 1, 256], strides = [1, 1, 1]} : vector<2x8x256xf32> to vector<2x1x256xf32>
    %410 = vector.shape_cast %409 : vector<2x1x256xf32> to vector<2x256xf32>
    %cst_146 = arith.constant dense<0.000000e+00> : vector<2x256xf32>
    %411 = tpu.matmul %373, %49, %cst_146 {dimension_numbers = #tpu.dot_dimension_numbers<[1], [0], [0], [1], [0, 0, 1, 1], [], []>} : vector<2x64xf32>, vector<64x256xf32>, vector<2x256xf32> -> vector<2x256xf32>
    %412 = arith.addf %410, %411 : vector<2x256xf32>
    %413 = vector.extract_strided_slice %412 {offsets = [0, 0], sizes = [2, 64], strides = [1, 1]} : vector<2x256xf32> to vector<2x64xf32>
    %cst_147 = arith.constant 5.000000e-01 : f32
    %414 = vector.broadcast %cst_147 : f32 to vector<2x64xf32>
    %415 = arith.mulf %414, %413 : vector<2x64xf32>
    %416 = math.tanh %415 : vector<2x64xf32>
    %cst_148 = arith.constant 5.000000e-01 : f32
    %417 = vector.broadcast %cst_148 : f32 to vector<2x64xf32>
    %418 = arith.mulf %417, %416 : vector<2x64xf32>
    %cst_149 = arith.constant 5.000000e-01 : f32
    %419 = vector.broadcast %cst_149 : f32 to vector<2x64xf32>
    %420 = arith.addf %418, %419 : vector<2x64xf32>
    %421 = vector.extract_strided_slice %412 {offsets = [0, 64], sizes = [2, 64], strides = [1, 1]} : vector<2x256xf32> to vector<2x64xf32>
    %cst_150 = arith.constant 5.000000e-01 : f32
    %422 = vector.broadcast %cst_150 : f32 to vector<2x64xf32>
    %423 = arith.mulf %422, %421 : vector<2x64xf32>
    %424 = math.tanh %423 : vector<2x64xf32>
    %cst_151 = arith.constant 5.000000e-01 : f32
    %425 = vector.broadcast %cst_151 : f32 to vector<2x64xf32>
    %426 = arith.mulf %425, %424 : vector<2x64xf32>
    %cst_152 = arith.constant 5.000000e-01 : f32
    %427 = vector.broadcast %cst_152 : f32 to vector<2x64xf32>
    %428 = arith.addf %426, %427 : vector<2x64xf32>
    %429 = vector.extract_strided_slice %412 {offsets = [0, 128], sizes = [2, 64], strides = [1, 1]} : vector<2x256xf32> to vector<2x64xf32>
    %430 = math.tanh %429 : vector<2x64xf32>
    %431 = vector.extract_strided_slice %412 {offsets = [0, 192], sizes = [2, 64], strides = [1, 1]} : vector<2x256xf32> to vector<2x64xf32>
    %cst_153 = arith.constant 5.000000e-01 : f32
    %432 = vector.broadcast %cst_153 : f32 to vector<2x64xf32>
    %433 = arith.mulf %432, %431 : vector<2x64xf32>
    %434 = math.tanh %433 : vector<2x64xf32>
    %cst_154 = arith.constant 5.000000e-01 : f32
    %435 = vector.broadcast %cst_154 : f32 to vector<2x64xf32>
    %436 = arith.mulf %435, %434 : vector<2x64xf32>
    %cst_155 = arith.constant 5.000000e-01 : f32
    %437 = vector.broadcast %cst_155 : f32 to vector<2x64xf32>
    %438 = arith.addf %436, %437 : vector<2x64xf32>
    %439 = arith.mulf %428, %371 : vector<2x64xf32>
    %440 = arith.mulf %420, %430 : vector<2x64xf32>
    %441 = arith.addf %439, %440 : vector<2x64xf32>
    %442 = math.tanh %441 : vector<2x64xf32>
    %443 = arith.mulf %438, %442 : vector<2x64xf32>
    %cst_156 = arith.constant dense<0.000000e+00> : vector<2x256xf32>
    %444 = tpu.matmul %443, %50, %cst_156 {dimension_numbers = #tpu.dot_dimension_numbers<[1], [0], [0], [1], [0, 0, 1, 1], [], []>} : vector<2x64xf32>, vector<64x256xf32>, vector<2x256xf32> -> vector<2x256xf32>
    %cst_157 = arith.constant dense<0.000000e+00> : vector<2x256xf32>
    %445 = tpu.matmul %408, %51, %cst_157 {dimension_numbers = #tpu.dot_dimension_numbers<[1], [0], [0], [1], [0, 0, 1, 1], [], []>} : vector<2x64xf32>, vector<64x256xf32>, vector<2x256xf32> -> vector<2x256xf32>
    %446 = arith.addf %444, %445 : vector<2x256xf32>
    %447 = arith.addf %446, %54 : vector<2x256xf32>
    %448 = vector.extract_strided_slice %447 {offsets = [0, 0], sizes = [2, 64], strides = [1, 1]} : vector<2x256xf32> to vector<2x64xf32>
    %cst_158 = arith.constant 5.000000e-01 : f32
    %449 = vector.broadcast %cst_158 : f32 to vector<2x64xf32>
    %450 = arith.mulf %449, %448 : vector<2x64xf32>
    %451 = math.tanh %450 : vector<2x64xf32>
    %cst_159 = arith.constant 5.000000e-01 : f32
    %452 = vector.broadcast %cst_159 : f32 to vector<2x64xf32>
    %453 = arith.mulf %452, %451 : vector<2x64xf32>
    %cst_160 = arith.constant 5.000000e-01 : f32
    %454 = vector.broadcast %cst_160 : f32 to vector<2x64xf32>
    %455 = arith.addf %453, %454 : vector<2x64xf32>
    %456 = vector.extract_strided_slice %447 {offsets = [0, 64], sizes = [2, 64], strides = [1, 1]} : vector<2x256xf32> to vector<2x64xf32>
    %cst_161 = arith.constant 5.000000e-01 : f32
    %457 = vector.broadcast %cst_161 : f32 to vector<2x64xf32>
    %458 = arith.mulf %457, %456 : vector<2x64xf32>
    %459 = math.tanh %458 : vector<2x64xf32>
    %cst_162 = arith.constant 5.000000e-01 : f32
    %460 = vector.broadcast %cst_162 : f32 to vector<2x64xf32>
    %461 = arith.mulf %460, %459 : vector<2x64xf32>
    %cst_163 = arith.constant 5.000000e-01 : f32
    %462 = vector.broadcast %cst_163 : f32 to vector<2x64xf32>
    %463 = arith.addf %461, %462 : vector<2x64xf32>
    %464 = vector.extract_strided_slice %447 {offsets = [0, 128], sizes = [2, 64], strides = [1, 1]} : vector<2x256xf32> to vector<2x64xf32>
    %465 = math.tanh %464 : vector<2x64xf32>
    %466 = vector.extract_strided_slice %447 {offsets = [0, 192], sizes = [2, 64], strides = [1, 1]} : vector<2x256xf32> to vector<2x64xf32>
    %cst_164 = arith.constant 5.000000e-01 : f32
    %467 = vector.broadcast %cst_164 : f32 to vector<2x64xf32>
    %468 = arith.mulf %467, %466 : vector<2x64xf32>
    %469 = math.tanh %468 : vector<2x64xf32>
    %cst_165 = arith.constant 5.000000e-01 : f32
    %470 = vector.broadcast %cst_165 : f32 to vector<2x64xf32>
    %471 = arith.mulf %470, %469 : vector<2x64xf32>
    %cst_166 = arith.constant 5.000000e-01 : f32
    %472 = vector.broadcast %cst_166 : f32 to vector<2x64xf32>
    %473 = arith.addf %471, %472 : vector<2x64xf32>
    %474 = arith.mulf %463, %406 : vector<2x64xf32>
    %475 = arith.mulf %455, %465 : vector<2x64xf32>
    %476 = arith.addf %474, %475 : vector<2x64xf32>
    %477 = math.tanh %476 : vector<2x64xf32>
    %478 = arith.mulf %473, %477 : vector<2x64xf32>
    %479 = vector.extract_strided_slice %48 {offsets = [0, 6, 0], sizes = [2, 1, 256], strides = [1, 1, 1]} : vector<2x8x256xf32> to vector<2x1x256xf32>
    %480 = vector.shape_cast %479 : vector<2x1x256xf32> to vector<2x256xf32>
    %cst_167 = arith.constant dense<0.000000e+00> : vector<2x256xf32>
    %481 = tpu.matmul %443, %49, %cst_167 {dimension_numbers = #tpu.dot_dimension_numbers<[1], [0], [0], [1], [0, 0, 1, 1], [], []>} : vector<2x64xf32>, vector<64x256xf32>, vector<2x256xf32> -> vector<2x256xf32>
    %482 = arith.addf %480, %481 : vector<2x256xf32>
    %483 = vector.extract_strided_slice %482 {offsets = [0, 0], sizes = [2, 64], strides = [1, 1]} : vector<2x256xf32> to vector<2x64xf32>
    %cst_168 = arith.constant 5.000000e-01 : f32
    %484 = vector.broadcast %cst_168 : f32 to vector<2x64xf32>
    %485 = arith.mulf %484, %483 : vector<2x64xf32>
    %486 = math.tanh %485 : vector<2x64xf32>
    %cst_169 = arith.constant 5.000000e-01 : f32
    %487 = vector.broadcast %cst_169 : f32 to vector<2x64xf32>
    %488 = arith.mulf %487, %486 : vector<2x64xf32>
    %cst_170 = arith.constant 5.000000e-01 : f32
    %489 = vector.broadcast %cst_170 : f32 to vector<2x64xf32>
    %490 = arith.addf %488, %489 : vector<2x64xf32>
    %491 = vector.extract_strided_slice %482 {offsets = [0, 64], sizes = [2, 64], strides = [1, 1]} : vector<2x256xf32> to vector<2x64xf32>
    %cst_171 = arith.constant 5.000000e-01 : f32
    %492 = vector.broadcast %cst_171 : f32 to vector<2x64xf32>
    %493 = arith.mulf %492, %491 : vector<2x64xf32>
    %494 = math.tanh %493 : vector<2x64xf32>
    %cst_172 = arith.constant 5.000000e-01 : f32
    %495 = vector.broadcast %cst_172 : f32 to vector<2x64xf32>
    %496 = arith.mulf %495, %494 : vector<2x64xf32>
    %cst_173 = arith.constant 5.000000e-01 : f32
    %497 = vector.broadcast %cst_173 : f32 to vector<2x64xf32>
    %498 = arith.addf %496, %497 : vector<2x64xf32>
    %499 = vector.extract_strided_slice %482 {offsets = [0, 128], sizes = [2, 64], strides = [1, 1]} : vector<2x256xf32> to vector<2x64xf32>
    %500 = math.tanh %499 : vector<2x64xf32>
    %501 = vector.extract_strided_slice %482 {offsets = [0, 192], sizes = [2, 64], strides = [1, 1]} : vector<2x256xf32> to vector<2x64xf32>
    %cst_174 = arith.constant 5.000000e-01 : f32
    %502 = vector.broadcast %cst_174 : f32 to vector<2x64xf32>
    %503 = arith.mulf %502, %501 : vector<2x64xf32>
    %504 = math.tanh %503 : vector<2x64xf32>
    %cst_175 = arith.constant 5.000000e-01 : f32
    %505 = vector.broadcast %cst_175 : f32 to vector<2x64xf32>
    %506 = arith.mulf %505, %504 : vector<2x64xf32>
    %cst_176 = arith.constant 5.000000e-01 : f32
    %507 = vector.broadcast %cst_176 : f32 to vector<2x64xf32>
    %508 = arith.addf %506, %507 : vector<2x64xf32>
    %509 = arith.mulf %498, %441 : vector<2x64xf32>
    %510 = arith.mulf %490, %500 : vector<2x64xf32>
    %511 = arith.addf %509, %510 : vector<2x64xf32>
    %512 = math.tanh %511 : vector<2x64xf32>
    %513 = arith.mulf %508, %512 : vector<2x64xf32>
    %cst_177 = arith.constant dense<0.000000e+00> : vector<2x256xf32>
    %514 = tpu.matmul %513, %50, %cst_177 {dimension_numbers = #tpu.dot_dimension_numbers<[1], [0], [0], [1], [0, 0, 1, 1], [], []>} : vector<2x64xf32>, vector<64x256xf32>, vector<2x256xf32> -> vector<2x256xf32>
    %cst_178 = arith.constant dense<0.000000e+00> : vector<2x256xf32>
    %515 = tpu.matmul %478, %51, %cst_178 {dimension_numbers = #tpu.dot_dimension_numbers<[1], [0], [0], [1], [0, 0, 1, 1], [], []>} : vector<2x64xf32>, vector<64x256xf32>, vector<2x256xf32> -> vector<2x256xf32>
    %516 = arith.addf %514, %515 : vector<2x256xf32>
    %517 = arith.addf %516, %54 : vector<2x256xf32>
    %518 = vector.extract_strided_slice %517 {offsets = [0, 0], sizes = [2, 64], strides = [1, 1]} : vector<2x256xf32> to vector<2x64xf32>
    %cst_179 = arith.constant 5.000000e-01 : f32
    %519 = vector.broadcast %cst_179 : f32 to vector<2x64xf32>
    %520 = arith.mulf %519, %518 : vector<2x64xf32>
    %521 = math.tanh %520 : vector<2x64xf32>
    %cst_180 = arith.constant 5.000000e-01 : f32
    %522 = vector.broadcast %cst_180 : f32 to vector<2x64xf32>
    %523 = arith.mulf %522, %521 : vector<2x64xf32>
    %cst_181 = arith.constant 5.000000e-01 : f32
    %524 = vector.broadcast %cst_181 : f32 to vector<2x64xf32>
    %525 = arith.addf %523, %524 : vector<2x64xf32>
    %526 = vector.extract_strided_slice %517 {offsets = [0, 64], sizes = [2, 64], strides = [1, 1]} : vector<2x256xf32> to vector<2x64xf32>
    %cst_182 = arith.constant 5.000000e-01 : f32
    %527 = vector.broadcast %cst_182 : f32 to vector<2x64xf32>
    %528 = arith.mulf %527, %526 : vector<2x64xf32>
    %529 = math.tanh %528 : vector<2x64xf32>
    %cst_183 = arith.constant 5.000000e-01 : f32
    %530 = vector.broadcast %cst_183 : f32 to vector<2x64xf32>
    %531 = arith.mulf %530, %529 : vector<2x64xf32>
    %cst_184 = arith.constant 5.000000e-01 : f32
    %532 = vector.broadcast %cst_184 : f32 to vector<2x64xf32>
    %533 = arith.addf %531, %532 : vector<2x64xf32>
    %534 = vector.extract_strided_slice %517 {offsets = [0, 128], sizes = [2, 64], strides = [1, 1]} : vector<2x256xf32> to vector<2x64xf32>
    %535 = math.tanh %534 : vector<2x64xf32>
    %536 = vector.extract_strided_slice %517 {offsets = [0, 192], sizes = [2, 64], strides = [1, 1]} : vector<2x256xf32> to vector<2x64xf32>
    %cst_185 = arith.constant 5.000000e-01 : f32
    %537 = vector.broadcast %cst_185 : f32 to vector<2x64xf32>
    %538 = arith.mulf %537, %536 : vector<2x64xf32>
    %539 = math.tanh %538 : vector<2x64xf32>
    %cst_186 = arith.constant 5.000000e-01 : f32
    %540 = vector.broadcast %cst_186 : f32 to vector<2x64xf32>
    %541 = arith.mulf %540, %539 : vector<2x64xf32>
    %cst_187 = arith.constant 5.000000e-01 : f32
    %542 = vector.broadcast %cst_187 : f32 to vector<2x64xf32>
    %543 = arith.addf %541, %542 : vector<2x64xf32>
    %544 = arith.mulf %533, %476 : vector<2x64xf32>
    %545 = arith.mulf %525, %535 : vector<2x64xf32>
    %546 = arith.addf %544, %545 : vector<2x64xf32>
    %547 = math.tanh %546 : vector<2x64xf32>
    %548 = arith.mulf %543, %547 : vector<2x64xf32>
    %549 = vector.extract_strided_slice %48 {offsets = [0, 7, 0], sizes = [2, 1, 256], strides = [1, 1, 1]} : vector<2x8x256xf32> to vector<2x1x256xf32>
    %550 = vector.shape_cast %549 : vector<2x1x256xf32> to vector<2x256xf32>
    %cst_188 = arith.constant dense<0.000000e+00> : vector<2x256xf32>
    %551 = tpu.matmul %513, %49, %cst_188 {dimension_numbers = #tpu.dot_dimension_numbers<[1], [0], [0], [1], [0, 0, 1, 1], [], []>} : vector<2x64xf32>, vector<64x256xf32>, vector<2x256xf32> -> vector<2x256xf32>
    %552 = arith.addf %550, %551 : vector<2x256xf32>
    %553 = vector.extract_strided_slice %552 {offsets = [0, 0], sizes = [2, 64], strides = [1, 1]} : vector<2x256xf32> to vector<2x64xf32>
    %cst_189 = arith.constant 5.000000e-01 : f32
    %554 = vector.broadcast %cst_189 : f32 to vector<2x64xf32>
    %555 = arith.mulf %554, %553 : vector<2x64xf32>
    %556 = math.tanh %555 : vector<2x64xf32>
    %cst_190 = arith.constant 5.000000e-01 : f32
    %557 = vector.broadcast %cst_190 : f32 to vector<2x64xf32>
    %558 = arith.mulf %557, %556 : vector<2x64xf32>
    %cst_191 = arith.constant 5.000000e-01 : f32
    %559 = vector.broadcast %cst_191 : f32 to vector<2x64xf32>
    %560 = arith.addf %558, %559 : vector<2x64xf32>
    %561 = vector.extract_strided_slice %552 {offsets = [0, 64], sizes = [2, 64], strides = [1, 1]} : vector<2x256xf32> to vector<2x64xf32>
    %cst_192 = arith.constant 5.000000e-01 : f32
    %562 = vector.broadcast %cst_192 : f32 to vector<2x64xf32>
    %563 = arith.mulf %562, %561 : vector<2x64xf32>
    %564 = math.tanh %563 : vector<2x64xf32>
    %cst_193 = arith.constant 5.000000e-01 : f32
    %565 = vector.broadcast %cst_193 : f32 to vector<2x64xf32>
    %566 = arith.mulf %565, %564 : vector<2x64xf32>
    %cst_194 = arith.constant 5.000000e-01 : f32
    %567 = vector.broadcast %cst_194 : f32 to vector<2x64xf32>
    %568 = arith.addf %566, %567 : vector<2x64xf32>
    %569 = vector.extract_strided_slice %552 {offsets = [0, 128], sizes = [2, 64], strides = [1, 1]} : vector<2x256xf32> to vector<2x64xf32>
    %570 = math.tanh %569 : vector<2x64xf32>
    %571 = vector.extract_strided_slice %552 {offsets = [0, 192], sizes = [2, 64], strides = [1, 1]} : vector<2x256xf32> to vector<2x64xf32>
    %cst_195 = arith.constant 5.000000e-01 : f32
    %572 = vector.broadcast %cst_195 : f32 to vector<2x64xf32>
    %573 = arith.mulf %572, %571 : vector<2x64xf32>
    %574 = math.tanh %573 : vector<2x64xf32>
    %cst_196 = arith.constant 5.000000e-01 : f32
    %575 = vector.broadcast %cst_196 : f32 to vector<2x64xf32>
    %576 = arith.mulf %575, %574 : vector<2x64xf32>
    %cst_197 = arith.constant 5.000000e-01 : f32
    %577 = vector.broadcast %cst_197 : f32 to vector<2x64xf32>
    %578 = arith.addf %576, %577 : vector<2x64xf32>
    %579 = arith.mulf %568, %511 : vector<2x64xf32>
    %580 = arith.mulf %560, %570 : vector<2x64xf32>
    %581 = arith.addf %579, %580 : vector<2x64xf32>
    %582 = math.tanh %581 : vector<2x64xf32>
    %583 = arith.mulf %578, %582 : vector<2x64xf32>
    %cst_198 = arith.constant dense<0.000000e+00> : vector<2x256xf32>
    %584 = tpu.matmul %583, %50, %cst_198 {dimension_numbers = #tpu.dot_dimension_numbers<[1], [0], [0], [1], [0, 0, 1, 1], [], []>} : vector<2x64xf32>, vector<64x256xf32>, vector<2x256xf32> -> vector<2x256xf32>
    %cst_199 = arith.constant dense<0.000000e+00> : vector<2x256xf32>
    %585 = tpu.matmul %548, %51, %cst_199 {dimension_numbers = #tpu.dot_dimension_numbers<[1], [0], [0], [1], [0, 0, 1, 1], [], []>} : vector<2x64xf32>, vector<64x256xf32>, vector<2x256xf32> -> vector<2x256xf32>
    %586 = arith.addf %584, %585 : vector<2x256xf32>
    %587 = arith.addf %586, %54 : vector<2x256xf32>
    %588 = vector.extract_strided_slice %587 {offsets = [0, 0], sizes = [2, 64], strides = [1, 1]} : vector<2x256xf32> to vector<2x64xf32>
    %cst_200 = arith.constant 5.000000e-01 : f32
    %589 = vector.broadcast %cst_200 : f32 to vector<2x64xf32>
    %590 = arith.mulf %589, %588 : vector<2x64xf32>
    %591 = math.tanh %590 : vector<2x64xf32>
    %cst_201 = arith.constant 5.000000e-01 : f32
    %592 = vector.broadcast %cst_201 : f32 to vector<2x64xf32>
    %593 = arith.mulf %592, %591 : vector<2x64xf32>
    %cst_202 = arith.constant 5.000000e-01 : f32
    %594 = vector.broadcast %cst_202 : f32 to vector<2x64xf32>
    %595 = arith.addf %593, %594 : vector<2x64xf32>
    %596 = vector.extract_strided_slice %587 {offsets = [0, 64], sizes = [2, 64], strides = [1, 1]} : vector<2x256xf32> to vector<2x64xf32>
    %cst_203 = arith.constant 5.000000e-01 : f32
    %597 = vector.broadcast %cst_203 : f32 to vector<2x64xf32>
    %598 = arith.mulf %597, %596 : vector<2x64xf32>
    %599 = math.tanh %598 : vector<2x64xf32>
    %cst_204 = arith.constant 5.000000e-01 : f32
    %600 = vector.broadcast %cst_204 : f32 to vector<2x64xf32>
    %601 = arith.mulf %600, %599 : vector<2x64xf32>
    %cst_205 = arith.constant 5.000000e-01 : f32
    %602 = vector.broadcast %cst_205 : f32 to vector<2x64xf32>
    %603 = arith.addf %601, %602 : vector<2x64xf32>
    %604 = vector.extract_strided_slice %587 {offsets = [0, 128], sizes = [2, 64], strides = [1, 1]} : vector<2x256xf32> to vector<2x64xf32>
    %605 = math.tanh %604 : vector<2x64xf32>
    %606 = vector.extract_strided_slice %587 {offsets = [0, 192], sizes = [2, 64], strides = [1, 1]} : vector<2x256xf32> to vector<2x64xf32>
    %cst_206 = arith.constant 5.000000e-01 : f32
    %607 = vector.broadcast %cst_206 : f32 to vector<2x64xf32>
    %608 = arith.mulf %607, %606 : vector<2x64xf32>
    %609 = math.tanh %608 : vector<2x64xf32>
    %cst_207 = arith.constant 5.000000e-01 : f32
    %610 = vector.broadcast %cst_207 : f32 to vector<2x64xf32>
    %611 = arith.mulf %610, %609 : vector<2x64xf32>
    %cst_208 = arith.constant 5.000000e-01 : f32
    %612 = vector.broadcast %cst_208 : f32 to vector<2x64xf32>
    %613 = arith.addf %611, %612 : vector<2x64xf32>
    %614 = arith.mulf %603, %546 : vector<2x64xf32>
    %615 = arith.mulf %595, %605 : vector<2x64xf32>
    %616 = arith.addf %614, %615 : vector<2x64xf32>
    %617 = math.tanh %616 : vector<2x64xf32>
    %618 = arith.mulf %613, %617 : vector<2x64xf32>
    %cst_209 = arith.constant 0.000000e+00 : f32
    %619 = vector.broadcast %cst_209 : f32 to vector<2x64xf32>
    %620 = arith.maximumf %618, %619 : vector<2x64xf32>
    %c0_210 = arith.constant 0 : index
    %c0_211 = arith.constant 0 : index
    %621 = vector.load %arg16[%c0_210, %c0_211] : memref<64x2xf32, #tpu.memory_space<vmem>>, vector<64x2xf32>
    %cst_212 = arith.constant dense<0.000000e+00> : vector<2x2xf32>
    %622 = tpu.matmul %620, %621, %cst_212 {dimension_numbers = #tpu.dot_dimension_numbers<[1], [0], [0], [1], [0, 0, 1, 1], [], []>} : vector<2x64xf32>, vector<64x2xf32>, vector<2x2xf32> -> vector<2x2xf32>
    %c0_213 = arith.constant 0 : index
    %c0_214 = arith.constant 0 : index
    %623 = vector.load %arg17[%c0_213, %c0_214] : memref<1x2xf32, #tpu.memory_space<vmem>>, vector<1x2xf32>
    %624 = vector.broadcast %623 : vector<1x2xf32> to vector<2x2xf32>
    %625 = arith.addf %622, %624 : vector<2x2xf32>
    %c0_215 = arith.constant 0 : index
    %c0_216 = arith.constant 0 : index
    %626 = vector.load %arg18[%c0_215, %c0_216] : memref<2x2xf32, #tpu.memory_space<vmem>>, vector<2x2xf32>
    tpu.vector_store %arg18[%c0_215, %c0_216], %625 {strides = array<i32>} : memref<2x2xf32, #tpu.memory_space<vmem>>, vector<2x2xf32>,
    return
  }
  func.func @transform_0(%arg0: i32) -> (i32, i32) {
    %c0_i32 = arith.constant 0 : i32
    %c0_i32_0 = arith.constant 0 : i32
    %c0_i32_1 = arith.constant 0 : i32
    return %c0_i32, %c0_i32_0 : i32, i32
  }
  func.func @transform_1(%arg0: i32) -> (i32, i32) {
    %c0_i32 = arith.constant 0 : i32
    %c0_i32_0 = arith.constant 0 : i32
    %c0_i32_1 = arith.constant 0 : i32
    return %c0_i32, %c0_i32_0 : i32, i32
  }
  func.func @transform_2(%arg0: i32) -> (i32, i32) {
    %c0_i32 = arith.constant 0 : i32
    %c0_i32_0 = arith.constant 0 : i32
    %c0_i32_1 = arith.constant 0 : i32
    return %c0_i32, %c0_i32_0 : i32, i32
  }
  func.func @transform_3(%arg0: i32) -> (i32, i32) {
    %c0_i32 = arith.constant 0 : i32
    %c0_i32_0 = arith.constant 0 : i32
    %c0_i32_1 = arith.constant 0 : i32
    return %c0_i32, %c0_i32_0 : i32, i32
  }
  func.func @transform_4(%arg0: i32) -> (i32, i32) {
    %c0_i32 = arith.constant 0 : i32
    %c0_i32_0 = arith.constant 0 : i32
    %c0_i32_1 = arith.constant 0 : i32
    return %c0_i32, %c0_i32_0 : i32, i32
  }
  func.func @transform_5(%arg0: i32) -> (i32, i32) {
    %c0_i32 = arith.constant 0 : i32
    %c0_i32_0 = arith.constant 0 : i32
    %c0_i32_1 = arith.constant 0 : i32
    return %c0_i32, %c0_i32_0 : i32, i32
  }
  func.func @transform_6(%arg0: i32) -> (i32, i32) {
    %c0_i32 = arith.constant 0 : i32
    %c0_i32_0 = arith.constant 0 : i32
    %c0_i32_1 = arith.constant 0 : i32
    return %c0_i32, %c0_i32_0 : i32, i32
  }
  func.func @transform_7(%arg0: i32) -> (i32, i32) {
    %c0_i32 = arith.constant 0 : i32
    %c0_i32_0 = arith.constant 0 : i32
    %c0_i32_1 = arith.constant 0 : i32
    return %c0_i32, %c0_i32_0 : i32, i32
  }
  func.func @transform_8(%arg0: i32) -> (i32, i32) {
    %c0_i32 = arith.constant 0 : i32
    %c0_i32_0 = arith.constant 0 : i32
    %c0_i32_1 = arith.constant 0 : i32
    return %c0_i32, %c0_i32_0 : i32, i32
  }
  func.func @transform_9(%arg0: i32) -> (i32, i32) {
    %c0_i32 = arith.constant 0 : i32
    %c0_i32_0 = arith.constant 0 : i32
    %c0_i32_1 = arith.constant 0 : i32
    return %c0_i32, %c0_i32_0 : i32, i32
  }
  func.func @transform_10(%arg0: i32) -> (i32, i32) {
    %c0_i32 = arith.constant 0 : i32
    %c0_i32_0 = arith.constant 0 : i32
    %c0_i32_1 = arith.constant 0 : i32
    return %c0_i32, %c0_i32_0 : i32, i32
  }
  func.func @transform_11(%arg0: i32) -> (i32, i32) {
    %c0_i32 = arith.constant 0 : i32
    %c0_i32_0 = arith.constant 0 : i32
    %c0_i32_1 = arith.constant 0 : i32
    return %c0_i32, %c0_i32_0 : i32, i32
  }
  func.func @transform_12(%arg0: i32) -> (i32, i32) {
    %c0_i32 = arith.constant 0 : i32
    %c0_i32_0 = arith.constant 0 : i32
    %c0_i32_1 = arith.constant 0 : i32
    return %c0_i32, %c0_i32_0 : i32, i32
  }
  func.func @transform_13(%arg0: i32) -> (i32, i32) {
    %c0_i32 = arith.constant 0 : i32
    %c0_i32_0 = arith.constant 0 : i32
    %c0_i32_1 = arith.constant 0 : i32
    return %c0_i32, %c0_i32_0 : i32, i32
  }
  func.func @transform_14(%arg0: i32) -> (i32, i32) {
    %c0_i32 = arith.constant 0 : i32
    %c0_i32_0 = arith.constant 0 : i32
    %c0_i32_1 = arith.constant 0 : i32
    return %c0_i32, %c0_i32_0 : i32, i32
  }
  func.func @transform_15(%arg0: i32) -> (i32, i32) {
    %c0_i32 = arith.constant 0 : i32
    %c0_i32_0 = arith.constant 0 : i32
    %c0_i32_1 = arith.constant 0 : i32
    return %c0_i32, %c0_i32_0 : i32, i32
  }
  func.func @transform_16(%arg0: i32) -> (i32, i32) {
    %c0_i32 = arith.constant 0 : i32
    %c0_i32_0 = arith.constant 0 : i32
    %c0_i32_1 = arith.constant 0 : i32
    return %c0_i32, %c0_i32_0 : i32, i32
  }
  func.func @transform_17(%arg0: i32) -> (i32, i32) {
    %c0_i32 = arith.constant 0 : i32
    %c0_i32_0 = arith.constant 0 : i32
    %c0_i32_1 = arith.constant 0 : i32
    return %c0_i32, %c0_i32_0 : i32, i32
  }
}

</mosaic_0001>

<bundles_post_ra>
// kernel: pallas_forward.1
= control target key start
LH: loop header
LB: loop body
LE: loop exit
PB: predicated region body
PF: predicated region fallthrough
CT: control target
= control target key end

     0   :  { %s4965_s0 = inlined_call_operand.vmem [shape: f32[16,48], index: 0, kind: input, shape index: {}]   ;;  %s4966_s1 = inlined_call_operand.vmem [shape: f32[48,128], index: 1, kind: input, shape index: {}]   ;;  %s4967_s2 = inlined_call_operand.vmem [shape: f32[1,128], index: 2, kind: input, shape index: {}]   ;;  %s4968_s3 = inlined_call_operand.vmem [shape: f32[32,64], index: 3, kind: input, shape index: {}]   ;;  %s4969_s4 = inlined_call_operand.vmem [shape: f32[1,64], index: 4, kind: input, shape index: {}]   ;;  %s4970_s5 = inlined_call_operand.vmem [shape: f32[16,32], index: 5, kind: input, shape index: {}]   ;;  %s4971_s6 = inlined_call_operand.vmem [shape: f32[1,32], index: 6, kind: input, shape index: {}]   ;;  %s4972_s7 = inlined_call_operand.hbm [shape: f32[32,64], index: 7, kind: input, shape index: {}]   ;;  %s4973_s8 = inlined_call_operand.vmem [shape: f32[1,64], index: 8, kind: input, shape index: {}]   ;;  %s4974_s9 = inlined_call_operand.vmem [shape: f32[64,256], index: 9, kind: input, shape index: {}]   ;;  %s4975_s10 = inlined_call_operand.vmem [shape: f32[1,256], index: 10, kind: input, shape index: {}]   ;;  %s4976_s11 = inlined_call_operand.vmem [shape: f32[64,256], index: 11, kind: input, shape index: {}]   ;;  %s4977_s12 = inlined_call_operand.vmem [shape: f32[64,256], index: 12, kind: input, shape index: {}]   ;;  %s4978_s13 = inlined_call_operand.hbm [shape: f32[64,256], index: 13, kind: input, shape index: {}]   ;;  %s4979_s14 = inlined_call_operand.vmem [shape: f32[1,256], index: 14, kind: input, shape index: {}]   ;;  %s4980_s15 = inlined_call_operand.vmem [shape: f32[64,2], index: 15, kind: input, shape index: {}]   ;;  %s4981_s16 = inlined_call_operand.vmem [shape: f32[1,2], index: 16, kind: input, shape index: {}]   ;;  %s4982_s17 = inlined_call_operand.hbm [shape: f32[2,2], index: 17, kind: output, shape index: {}]  }
   0x1   :  { %4985 = sst [smem:[#allocation11_spill]] %s4965_s0 }
   0x2   :  { %4986 = sst [smem:[#allocation12_spill]] %s4966_s1 }
   0x3   :  { %22 = vsyncpa [#allocation3], 0 }
   0x4   :  { %23 = vsyncpa [#allocation6], 0 }
   0x5   :  { %24 = vsyncpa [#allocation4], 0  ;;  %s4069_s24 = smov [#allocation2]   ;;  %s3997_s28 = scalar_lea.hbm %s4972_s7, 512 }
   0x6   :  { %s44_s25 = sshll.u32 %s4069_s24, 4  ;;  %p3998_p0 = scmp.ne.s32.totalorder %s4972_s7, %s3997_s28  ;;  %s45_s25 = int_to_ptr.vmem [resolvable:$true] %s44_s25 }
   0x7   :  { %p4001_p1 = scmp.lt.u32.totalorder %s3997_s28, %s4972_s7 }
   0x9   :  { %p4003_p2 = pnand %p4001_p1, %p3998_p0 }
   0xb   :  { %4006 = shalt.err (!%p4003_p2)
}
   0xc   :  { %s4007_s19 = scalar_lea.vmem %s45_s25, 512  ;;  %p4012_p4 = scmp.lt.s32.totalorder %s45_s25, %s45_s25 }
   0xd   :  { %p4008_p3 = scmp.ne.s32.totalorder %s45_s25, %s4007_s19  ;;  %p4013_p5 = scmp.lt.s32.totalorder %s4007_s19, %s4007_s19 }
   0xf   :  { %p4014_p6 = por %p4013_p5, %p4012_p4 }
  0x11   :  { %p4015_p7 = pnand %p4014_p6, %p4008_p3 }
  0x13   :  { %4018 = shalt.err (!%p4015_p7)
}
  0x14   :  { %s4070_s1 = smov 128   ;;  %s4071_s20 = smov 8  }
  0x15   :  { %50 = dma.hbm_to_vmem [thread:$0]  %s4972_s7, 512, %s45_s25, [#allocation3], %s4070_s1, %s4070_s1, %s4071_s20  }
  0x16   :  { %s4072_s23 = smov [#allocation5]   ;;  %s4019_s28 = scalar_lea.hbm %s4978_s13, 2048 }
  0x17   :  { %s66_s24 = sshll.u32 %s4072_s23, 4  ;;  %p4020_p8 = scmp.ne.s32.totalorder %s4978_s13, %s4019_s28  ;;  %s67_s24 = int_to_ptr.vmem [resolvable:$true] %s66_s24 }
  0x18   :  { %p4023_p9 = scmp.lt.u32.totalorder %s4019_s28, %s4978_s13 }
  0x1a   :  { %p4025_p10 = pnand %p4023_p9, %p4020_p8 }
  0x1c   :  { %4028 = shalt.err (!%p4025_p10)
}
  0x1d   :  { %s4029_s19 = scalar_lea.vmem %s67_s24, 2048  ;;  %p4034_p12 = scmp.lt.s32.totalorder %s67_s24, %s67_s24 }
  0x1e   :  { %p4030_p11 = scmp.ne.s32.totalorder %s67_s24, %s4029_s19  ;;  %p4035_p13 = scmp.lt.s32.totalorder %s4029_s19, %s4029_s19 }
  0x20   :  { %p4036_p0 = por %p4035_p13, %p4034_p12 }
  0x22   :  { %p4037_p1 = pnand %p4036_p0, %p4030_p11 }
  0x24   :  { %4040 = shalt.err (!%p4037_p1)
}
  0x25   :  { %s4073_s7 = smov 256   ;;  %s4074_s25 = smov 16  }
  0x26   :  { %72 = dma.hbm_to_vmem [thread:$0]  %s4978_s13, 2048, %s67_s24, [#allocation6], %s4073_s7, %s4073_s7, %s4074_s25  }
  0x27   :  { %4063 = dma.done.wait [#allocation3], 512  }
  0x28   :  { %4064 = vsyncadd [#allocation3], 4294966784 }
  0x29   :  { %4065 = dma.done.wait [#allocation6], 2048  }
  0x2a   :  { %4066 = vsyncadd [#allocation6], 4294965248  ;;  %s4987_s23 = sld [smem:[#allocation12_spill]]  ;;  %vm100_vm0 = vcmask 392192   ;;  %s4988_s1 = sld [smem:[#allocation11_spill]]  ;;  %v204_v12 = vld [vmem:[%s4968_s3] sm:$0xff] }
  0x2b   :  { %v3198_v11 = vld [vmem:[%s4967_s2] ss:$0 sm:$0xff]  ;;  %v205_v13 = vld [vmem:[%s4968_s3 + $0x8] sm:$0xff]  ;;  %s4075_s0 = smov 96   ;;  %v206_v21 = vld [vmem:[%s4968_s3 + $0x10] sm:$0xff]  ;;  %s4076_s18 = smov 64  }
  0x2c   :  { %v3344_v15 = vpack.c.bf16 %v205_v13, %v204_v12  ;;  %v207_v22 = vld [vmem:[%s4968_s3 + $0x18] sm:$0xff]  ;;  %vm215_vm1 = vcmask 261120   ;;  %v319_v32 = vld [vmem:[%s4970_s5] sm:$0xff]  ;;  %v320_v33 = vld [vmem:[%s4970_s5 + $0x8] sm:$0xff]  ;;  %s4077_s21 = smov 112   ;;  %vm328_vm2 = vcmask 130048  }
  0x2d   :  { %v3348_v23 = vpack.c.bf16 %v207_v22, %v206_v21  ;;  %v3352_v34 = vpack.c.bf16 %v320_v33, %v319_v32  ;;  %v3201_v35 = vld [vmem:[%s4969_s4] ss:$0 sm:$0xff]  ;;  %v413_v43 = vld [vmem:[#allocation2 + $0x8] sm:$0xff]  ;;  %v414_v53 = vld [vmem:[#allocation2 + $0x10] sm:$0xff]  ;;  %vm534_vm3 = vcmask 523264   ;;  %vm874_vm4 = vcmask 1041409  }
  0x2e   :  { %3345 = vmatprep.subr.bf16.mxu1 %v3344_v15  ;;  %v412_v42 = vld [vmem:[#allocation2] sm:$0xff]  ;;  %v415_v54 = vld [vmem:[#allocation2 + $0x18] sm:$0xff]  ;;  %v507_v56 = vld [vmem:[%s4974_s9 + $0x8] sm:$0xff]  ;;  %vm4080_vm5 = vmmov 0   ;;  %s4081_s26 = smov [#allocation7]   ;;  %vm3180_vm6 = vcmask 9216  }
  0x2f   :  { %3347 = vmatpush3.bf16.msra.mxu1 %v3344_v15  ;;  %v3356_v44 = vpack.c.bf16 %v413_v43, %v412_v42  ;;  %v3360_v55 = vpack.c.bf16 %v415_v54, %v414_v53  ;;  %v509_v57 = vld [vmem:[%s4974_s9 + $0x18] sm:$0xff]  ;;  %v506_v58 = vld [vmem:[%s4974_s9] sm:$0xff]  ;;  %v508_v60 = vld [vmem:[%s4974_s9 + $0x10] sm:$0xff] }
  0x30   :  { %v87_v0 = vld [vmem:[%s4987_s23] sm:$0xff]  ;;  %v88_v1 = vld [vmem:[%s4987_s23 + $0x8] sm:$0xff]  ;;  %v89_v2 = vld [vmem:[%s4987_s23 + $0x10] sm:$0xff]  ;;  %3349 = vmatprep.subr.bf16.mxu1 %v3348_v23  ;;  %v3364_v59 = vpack.c.bf16 %v509_v57, %v507_v56  ;;  %v3366_v63 = vpack.c.bf16 %v508_v60, %v506_v58  ;;  %v524_v57 = vlaneseq }
  0x31   :  { %v3332_v3 = vpack.c.bf16 %v88_v1, %v87_v0  ;;  %v90_v4 = vld [vmem:[%s4987_s23 + $0x18] sm:$0xff]  ;;  %v91_v6 = vld [vmem:[%s4987_s23 + $0x20] sm:$0xff]  ;;  %v92_v7 = vld [vmem:[%s4987_s23 + $0x28] sm:$0xff] }
  0x32   :  { %v3336_v5 = vpack.c.bf16 %v90_v4, %v89_v2  ;;  %v85_v8 = vld [vmem:[%s4988_s1] sm:$0xff]  ;;  %v3340_v9 = vpack.c.bf16 %v92_v7, %v91_v6  ;;  %v86_v10 = vld [vmem:[%s4988_s1 + $0x8] sm:$0xff]  ;;  %v621_v62 = vld [vmem:[%s4976_s11 + $0x18] sm:$0xff]  ;;  %v4398_v58 = vshrl.u32 %v524_v57, 7 }
  0x33   :  { %3333 = vmatprep.subr.bf16.mxu0 %v3332_v3  ;;  %3281 = vmatprep.mubr.msk.f32.mxu0 %vm100_vm0, %v85_v8  ;;  %v619_v61 = vld [vmem:[%s4976_s11 + $0x8] sm:$0xff]  ;;  %v513_v2 = vld [vmem:[%s4974_s9 + $0x38] sm:$0xff]  ;;  %v512_v4 = vld [vmem:[%s4974_s9 + $0x30] sm:$0xff] }
  0x34   :  { %3335 = vmatpush3.bf16.msra.mxu0 %v3332_v3  ;;  %3351 = vmatpush3.bf16.msra.mxu1 %v3348_v23  ;;  %v4272_v0 = vpack.c.bf16 %v621_v62, %v619_v61  ;;  %v511_v1 = vld [vmem:[%s4974_s9 + $0x28] sm:$0xff]  ;;  %v510_v3 = vld [vmem:[%s4974_s9 + $0x20] sm:$0xff]  ;;  %v517_v8 = vld [vmem:[%s4974_s9 + $0x58] sm:$0xff]  ;;  %v530_v61 = vsub.s32 1, %v4398_v58 }
  0x35   :  { %3337 = vmatprep.subr.bf16.mxu0 %v3336_v5  ;;  %3353 = vmatprep.subr.bf16.mxu1 %v3352_v34  ;;  %v3370_v6 = vpack.c.bf16 %v512_v4, %v510_v3  ;;  %v515_v7 = vld [vmem:[%s4974_s9 + $0x48] sm:$0xff]  ;;  %v3204_v13 = vld [vmem:[%s4971_s6] ss:$0 sm:$0xff]  ;;  %v625_v21 = vld [vmem:[%s4976_s11 + $0x38] sm:$0xff] }
  0x36   :  { %v626_v32 = vld [vmem:[%s4976_s11 + $0x40] sm:$0xff]  ;;  %v628_v33 = vld [vmem:[%s4976_s11 + $0x50] sm:$0xff]  ;;  %v633_v42 = vld [vmem:[%s4976_s11 + $0x78] sm:$0xff] }
  0x37   :  { %v522_v60 = vld [vmem:[%s4975_s10] sm:$0x3]  ;;  %v664_v57 = vld [vmem:[#allocation5 + $0x70] sm:$0xff]  ;;  %s3188_s10 = sshll.u32 %s4081_s26, 4  ;;  %s3189_s10 = int_to_ptr.vmem [resolvable:$true] %s3188_s10 }
  0x38   :  { %3339 = vmatpush3.bf16.msra.mxu0 %v3336_v5  ;;  %v3368_v5 = vpack.c.bf16 %v513_v2, %v511_v1  ;;  %s4041_s27 = scalar_lea.vmem %s3189_s10, 32  ;;  %p4046_p3 = scmp.lt.s32.totalorder %s3189_s10, %s3189_s10 }
  0x39   :  { %3341 = vmatprep.subr.bf16.mxu0 %v3340_v9  ;;  %p4042_p2 = scmp.ne.s32.totalorder %s3189_s10, %s4041_s27  ;;  %p4047_p4 = scmp.lt.s32.totalorder %s4041_s27, %s4041_s27 }
  0x3b   :  { %p4048_p5 = por %p4047_p4, %p4046_p3 }
  0x3c   :  { %3343 = vmatpush3.bf16.msra.mxu0 %v3340_v9  ;;  %v3372_v9 = vpack.c.bf16 %v517_v8, %v515_v7 }
  0x3d   :  { %3357 = vmatprep.subr.bf16.mxu0 %v3356_v44  ;;  %p4049_p6 = pnand %p4048_p5, %p4042_p2 }
  0x3f   :  { %3282 = vmatmul.mubr.msk.f32.vlgmr.msra.gmra.mrb[0].mxu0 %vm100_vm0, %v86_v10  ;;  %v514_v10 = vld [vmem:[%s4974_s9 + $0x40] sm:$0xff] }
  0x40   :  { %3359 = vmatpush3.bf16.msra.mxu0 %v3356_v44  ;;  %v630_v44 = vld [vmem:[%s4976_s11 + $0x60] sm:$0xff] }
  0x41   :  { %3361 = vmatprep.subr.bf16.mxu0 %v3360_v55 }
  0x44   :  { %3363 = vmatpush3.bf16.msra.mxu0 %v3360_v55 }
  0x45   :  { %3381 = vmatprep.subr.bf16.mxu0 %v4272_v0 }
 0x112   :  { %v3283_v14 = vpop.f32.mrb[0].mxu0 }
 0x113   :  { %v173_v16 = vpop.f32.mrb[1].mxu0  ;;  %v179_v18 = vadd.f32 %v3283_v14, %v3198_v11 }
 0x114   :  { %v174_v17 = vadd.f32 %v3198_v11, %v173_v16  ;;  %v516_v11 = vld [vmem:[%s4974_s9 + $0x50] sm:$0xff] }
 0x115   :  { %v183_v20 = vmax.f32 %v179_v18, 0.0  ;;  %v3374_v12 = vpack.c.bf16 %v516_v11, %v514_v10  ;;  %v620_v18 = vld [vmem:[%s4976_s11 + $0x10] sm:$0xff] }
 0x116   :  { %v182_v19 = vmax.f32 %v174_v17, 0.0  ;;  %v618_v17 = vld [vmem:[%s4976_s11] sm:$0xff] }
 0x117   :  { %v4314_v23 = vpack.c.bf16 %v620_v18, %v618_v17 }
 0x118   :  { %186 = vrot.lane.b32.xlu0 %v182_v19, %s4075_s0 }
 0x11c   :  { %188 = vrot.lane.b32.xlu0 %v183_v20, %s4075_s0 }
 0x18a   :  { %v187_v24 = vpop.permute.xlu0 %186 }
 0x18b   :  { %v192_v25 = vmax.f32 %v182_v19, %v187_v24 }
 0x18d   :  { %196 = vrot.lane.b32.xlu1 %v192_v25, %s4076_s18 }
 0x18e   :  { %v189_v26 = vpop.permute.xlu0 %188 }
 0x18f   :  { %v193_v27 = vmax.f32 %v183_v20, %v189_v26  ;;  %v623_v20 = vld [vmem:[%s4976_s11 + $0x28] sm:$0xff]  ;;  %v622_v26 = vld [vmem:[%s4976_s11 + $0x20] sm:$0xff] }
 0x191   :  { %198 = vrot.lane.b32.xlu1 %v193_v27, %s4076_s18 }
 0x1ff   :  { %v197_v28 = vpop.permute.xlu1 %196 }
 0x200   :  { %v202_v29 = vmax.f32 %v192_v25, %v197_v28  ;;  %v4316_v25 = vpack.c.bf16 %v625_v21, %v623_v20 }
 0x202   :  { %3292 = vmatprep.mubr.msk.f32.mxu1 %vm215_vm1, %v202_v29  ;;  %v627_v29 = vld [vmem:[%s4976_s11 + $0x48] sm:$0xff] }
 0x203   :  { %v199_v30 = vpop.permute.xlu1 %198 }
 0x204   :  { %v203_v31 = vmax.f32 %v193_v27, %v199_v30  ;;  %v624_v27 = vld [vmem:[%s4976_s11 + $0x30] sm:$0xff]  ;;  %v629_v30 = vld [vmem:[%s4976_s11 + $0x58] sm:$0xff] }
 0x205   :  { %v4327_v28 = vpack.c.bf16 %v624_v27, %v622_v26 }
 0x206   :  { %3293 = vmatmul.mubr.msk.f32.vlgmr.msra.gmra.mrb[0].mxu1 %vm215_vm1, %v203_v31  ;;  %v4337_v31 = vpack.c.bf16 %v629_v30, %v627_v29  ;;  %v651_v30 = vld [vmem:[#allocation5 + $0x8] sm:$0xff] }
 0x207   :  { %3355 = vmatpush3.bf16.msra.mxu1 %v3352_v34  ;;  %v4345_v34 = vpack.c.bf16 %v628_v33, %v626_v32  ;;  %v653_v32 = vld [vmem:[#allocation5 + $0x18] sm:$0xff]  ;;  %v650_v33 = vld [vmem:[#allocation5] sm:$0xff] }
 0x208   :  { %3365 = vmatprep.subr.bf16.mxu1 %v3364_v59  ;;  %v526_v59 = vsub.s32 0, %v4398_v58 }
 0x20a   :  { %v527_v62 = vrot.slane %v522_v60, %v526_v59 }
 0x2d9   :  { %v3294_v36 = vpop.f32.mrb[0].mxu1 }
 0x2da   :  { %v294_v37 = vadd.f32 %v3294_v36, %v3201_v35  ;;  %v288_v38 = vpop.f32.mrb[1].mxu1  ;;  %v521_v36 = vld [vmem:[%s4974_s9 + $0x78] sm:$0xff] }
 0x2db   :  { %v289_v39 = vadd.f32 %v3201_v35, %v288_v38  ;;  %v519_v35 = vld [vmem:[%s4974_s9 + $0x68] sm:$0xff]  ;;  %v518_v38 = vld [vmem:[%s4974_s9 + $0x60] sm:$0xff] }
 0x2dc   :  { %v298_v40 = vmax.f32 %v294_v37, 0.0  ;;  %v3376_v37 = vpack.c.bf16 %v521_v36, %v519_v35  ;;  %v4435_v35 = vpack.c.bf16 %v653_v32, %v651_v30  ;;  %v652_v36 = vld [vmem:[#allocation5 + $0x10] sm:$0xff]  ;;  %v646_v32 = vld [vmem:[%s4977_s12 + $0x60] sm:$0xff] }
 0x2dd   :  { %v297_v41 = vmax.f32 %v289_v39, 0.0  ;;  %v520_v39 = vld [vmem:[%s4974_s9 + $0x70] sm:$0xff] }
 0x2de   :  { %303 = vrot.lane.b32.xlu1 %v298_v40, %s4077_s21 }
 0x2df   :  { %301 = vrot.lane.b32.xlu0 %v297_v41, %s4077_s21 }
 0x350   :  { %v304_v45 = vpop.permute.xlu1 %303 }
 0x351   :  { %v308_v46 = vmax.f32 %v298_v40, %v304_v45  ;;  %v302_v47 = vpop.permute.xlu0 %301  ;;  %v3378_v40 = vpack.c.bf16 %v520_v39, %v518_v38  ;;  %v632_v45 = vld [vmem:[%s4976_s11 + $0x70] sm:$0xff]  ;;  %v657_v38 = vld [vmem:[#allocation5 + $0x38] sm:$0xff]  ;;  %v4437_v39 = vpack.c.bf16 %v652_v36, %v650_v33 }
 0x352   :  { %v307_v48 = vmax.f32 %v297_v41, %v302_v47  ;;  %v631_v41 = vld [vmem:[%s4976_s11 + $0x68] sm:$0xff]  ;;  %v4078_v47 = vmov 0.0   ;;  %v648_v33 = vld [vmem:[%s4977_s12 + $0x70] sm:$0xff] }
 0x353   :  { %313 = vrot.lane.b32.xlu1 %v308_v46, %s4075_s0  ;;  %v4367_v43 = vpack.c.bf16 %v633_v42, %v631_v41  ;;  %v654_v41 = vld [vmem:[#allocation5 + $0x20] sm:$0xff]  ;;  %v656_v42 = vld [vmem:[#allocation5 + $0x30] sm:$0xff]  ;;  %v4530_v36 = vpack.c.bf16 %v648_v33, %v646_v32 }
 0x354   :  { %311 = vrot.lane.b32.xlu0 %v307_v48, %s4075_s0 }
 0x3c5   :  { %v314_v49 = vpop.permute.xlu1 %313 }
 0x3c6   :  { %v312_v50 = vpop.permute.xlu0 %311  ;;  %v318_v52 = vmax.f32 %v308_v46, %v314_v49  ;;  %v4375_v46 = vpack.c.bf16 %v632_v45, %v630_v44  ;;  %v659_v44 = vld [vmem:[#allocation5 + $0x48] sm:$0xff]  ;;  %v661_v45 = vld [vmem:[#allocation5 + $0x58] sm:$0xff] }
 0x3c7   :  { %v317_v51 = vmax.f32 %v307_v48, %v312_v50  ;;  %v3207_v48 = vld [vmem:[%s4973_s8] ss:$0 sm:$0xff] }
 0x3c9   :  { %3299 = vmatprep.mubr.msk.f32.mxu1 %vm328_vm2, %v317_v51 }
 0x3ca   :  { %3300 = vmatmul.mubr.msk.f32.vlgmr.msra.gmra.mrb[2].mxu1 %vm328_vm2, %v318_v52 }
 0x3cb   :  { %3367 = vmatpush1.bf16.msra.mxu1 %v3366_v63  ;;  %605 = vmatprep.mubr.f32.mxu1 %v4078_v47  ;;  %v531_v63 = vrot.slane %v522_v60, %v530_v61  ;;  %v635_v60 = vld [vmem:[%s4977_s12 + $0x8] sm:$0xff] }
 0x3cc   :  { %3369 = vmatprep.subr.bf16.mxu1 %v3368_v5 }
 0x3cf   :  { %3371 = vmatpush1.bf16.msra.mxu1 %v3370_v6 }
 0x3d0   :  { %3373 = vmatprep.subr.bf16.mxu1 %v3372_v9 }
 0x3d3   :  { %3375 = vmatpush1.bf16.msra.mxu1 %v3374_v12 }
 0x3d4   :  { %3377 = vmatprep.subr.bf16.mxu1 %v3376_v37  ;;  %v655_v37 = vld [vmem:[#allocation5 + $0x28] sm:$0xff] }
 0x3d7   :  { %3379 = vmatpush1.bf16.msra.mxu1 %v3378_v40  ;;  %v4439_v40 = vpack.c.bf16 %v657_v38, %v655_v37 }
 0x3d8   :  { %3397 = vmatprep.subr.bf16.mxu1 %v4435_v35 }
 0x49d   :  { %v3301_v14 = vpop.f32.mrb[2].mxu1 }
 0x49e   :  { %v407_v15 = vadd.f32 %v3301_v14, %v3204_v13  ;;  %v401_v16 = vpop.f32.mrb[3].mxu1 }
 0x49f   :  { %v402_v19 = vadd.f32 %v3204_v13, %v401_v16 }
 0x4a0   :  { %v411_v24 = vmax.f32 %v407_v15, 0.0 }
 0x4a1   :  { %v410_v22 = vmax.f32 %v402_v19, 0.0 }
 0x4a3   :  { %3310 = vmatprep.mubr.msk.f32.mxu0 %vm215_vm1, %v410_v22 }
 0x4a4   :  { %3311 = vmatmul.mubr.msk.f32.vlgmr.msra.gmra.mrb[2].mxu0 %vm215_vm1, %v411_v24 }
 0x4a5   :  { %3383 = vmatpush1.bf16.msra.mxu0 %v4314_v23  ;;  %745 = vmatprep.mubr.f32.mxu0 %v4078_v47 }
 0x4a6   :  { %3385 = vmatprep.subr.bf16.mxu0 %v4316_v25 }
 0x4a9   :  { %3387 = vmatpush1.bf16.msra.mxu0 %v4327_v28 }
 0x4aa   :  { %3389 = vmatprep.subr.bf16.mxu0 %v4337_v31 }
 0x4ad   :  { %3391 = vmatpush1.bf16.msra.mxu0 %v4345_v34 }
 0x4ae   :  { %3393 = vmatprep.subr.bf16.mxu0 %v4367_v43 }
 0x4b1   :  { %3395 = vmatpush1.bf16.msra.mxu0 %v4375_v46 }
 0x4b2   :  { %3429 = vmatprep.subr.bf16.mxu0 %v4272_v0 }
 0x4b4   :  { %746 = vmatmul.mubr.f32.vlgmr.msra.gmra.mrb[4].mxu0 %v4078_v47 }
 0x4b5   :  { %3431 = vmatpush1.bf16.msra.mxu0 %v4314_v23  ;;  %1035 = vmatprep.mubr.f32.mxu0 %v4078_v47 }
 0x4b6   :  { %3433 = vmatprep.subr.bf16.mxu0 %v4316_v25 }
 0x4b9   :  { %3435 = vmatpush1.bf16.msra.mxu0 %v4327_v28 }
 0x4ba   :  { %3437 = vmatprep.subr.bf16.mxu0 %v4337_v31 }
 0x4bd   :  { %3439 = vmatpush1.bf16.msra.mxu0 %v4345_v34 }
 0x4be   :  { %3441 = vmatprep.subr.bf16.mxu0 %v4367_v43 }
 0x4c1   :  { %3443 = vmatpush1.bf16.msra.mxu0 %v4375_v46 }
 0x4c2   :  { %3445 = vmatprep.subr.bf16.mxu0 %v4435_v35 }
 0x577   :  { %v3312_v49 = vpop.f32.mrb[2].mxu0 }
 0x578   :  { %v495_v50 = vpop.f32.mrb[3].mxu0  ;;  %v501_v52 = vadd.f32 %v3312_v49, %v3207_v48  ;;  %v4447_v49 = vpack.c.bf16 %v661_v45, %v659_v44 }
 0x579   :  { %v496_v51 = vadd.f32 %v3207_v48, %v495_v50  ;;  %v4444_v48 = vpack.c.bf16 %v656_v42, %v654_v41  ;;  %v658_v50 = vld [vmem:[#allocation5 + $0x40] sm:$0xff] }
 0x57a   :  { %v505_v54 = vmax.f32 %v501_v52, 0.0  ;;  %v663_v52 = vld [vmem:[#allocation5 + $0x68] sm:$0xff] }
 0x57b   :  { %v504_v53 = vmax.f32 %v496_v51, 0.0  ;;  %v660_v51 = vld [vmem:[#allocation5 + $0x50] sm:$0xff] }
 0x57d   :  { %3210 = vmatmul.mubr.msk.f32.vlgmr.msra.gmra.mrb[4].mxu1 %vm534_vm3, %v504_v53  ;;  %v665_v53 = vld [vmem:[#allocation5 + $0x78] sm:$0xff] }
 0x57e   :  { %611 = vmatprep.mubr.f32.mxu1 %v4078_v47  ;;  %3399 = vmatpush1.bf16.msra.mxu1 %v4437_v39 }
 0x57f   :  { %3401 = vmatprep.subr.bf16.mxu1 %v4439_v40 }
 0x581   :  { %3211 = vmatmul.mubr.msk.f32.gmra.mrb[6].mxu1 %vm534_vm3, %v505_v54  ;;  %v4450_v54 = vpack.c.bf16 %v660_v51, %v658_v50 }
 0x582   :  { %864 = vmatprep.mubr.f32.mxu1 %v4078_v47  ;;  %3403 = vmatpush1.bf16.msra.mxu1 %v4444_v48 }
 0x583   :  { %3405 = vmatprep.subr.bf16.mxu1 %v4447_v49 }
 0x586   :  { %3407 = vmatpush1.bf16.msra.mxu1 %v4450_v54 }
 0x587   :  { %v747_v55 = vpop.f32.mrb[4].mxu0 }
 0x588   :  { %v749_v56 = vpop.f32.mrb[5].mxu0  ;;  %v754_v5 = vrot.slane %v747_v55, 1 }
 0x589   :  { %v755_v12 = vrot.slane %v749_v56, 1 }
 0x650   :  { %v607_v1 = vpop.f32.mrb[4].mxu1 }
 0x651   :  { %v4409_v2 = vadd.f32 %v607_v1, %v527_v62  ;;  %v609_v3 = vpop.f32.mrb[5].mxu1 }
 0x652   :  { %v4411_v4 = vadd.f32 %v609_v3, %v531_v63  ;;  %v634_v3 = vld [vmem:[%s4977_s12] sm:$0xff] }
 0x653   :  { %v760_v6 = vadd.f32 %v747_v55, %v4409_v2  ;;  %v4453_v55 = vpack.c.bf16 %v665_v53, %v663_v52 }
 0x654   :  { %v613_v7 = vpop.f32.mrb[6].mxu1  ;;  %v4417_v11 = vadd.f32 %v749_v56, %v4411_v4  ;;  %v662_v56 = vld [vmem:[#allocation5 + $0x60] sm:$0xff] }
 0x655   :  { %v764_v8 = vmul.f32 0.5, %v760_v6  ;;  %v4414_v9 = vadd.f32 %v613_v7, %v527_v62  ;;  %v615_v10 = vpop.f32.mrb[7].mxu1  ;;  %v637_v62 = vld [vmem:[%s4977_s12 + $0x18] sm:$0xff]  ;;  %3409 = vmatprep.subr.bf16.mxu1 %v4453_v55  ;;  %v639_v6 = vld [vmem:[%s4977_s12 + $0x28] sm:$0xff] }
 0x656   :  { %v4419_v13 = vadd.f32 %v615_v10, %v531_v63  ;;  %v4462_v63 = vpack.c.bf16 %v664_v57, %v662_v56  ;;  %v4465_v1 = vpack.c.bf16 %v637_v62, %v635_v60  ;;  %v641_v7 = vld [vmem:[%s4977_s12 + $0x38] sm:$0xff]  ;;  %v774_v37 = vmul.f32 0.5, %v4417_v11 }
 0x657   :  { %3805 = vtanh.f32 %v764_v8  ;;  %v762_v14 = vadd.f32 %v754_v5, %v4414_v9  ;;  %v636_v5 = vld [vmem:[%s4977_s12 + $0x10] sm:$0xff]  ;;  %v4483_v10 = vpack.c.bf16 %v641_v7, %v639_v6  ;;  %v666_v7 = vld [vmem:[%s4979_s14] sm:$0x3] }
 0x658   :  { %3807 = vtanh.f32 %v4417_v11  ;;  %v4424_v16 = vadd.f32 %v755_v12, %v4419_v13  ;;  %3411 = vmatpush1.bf16.msra.mxu1 %v4462_v63  ;;  %v4480_v8 = vpack.c.bf16 %v636_v5, %v634_v3  ;;  %v638_v12 = vld [vmem:[%s4977_s12 + $0x20] sm:$0xff] }
 0x659   :  { %v765_v15 = vmul.f32 0.5, %v762_v14  ;;  %3413 = vmatprep.subr.bf16.mxu1 %v4465_v1  ;;  %v640_v14 = vld [vmem:[%s4977_s12 + $0x30] sm:$0xff] }
 0x65a   :  { %v775_v38 = vmul.f32 0.5, %v4424_v16 }
 0x65b   :  { %3809 = vtanh.f32 %v765_v15  ;;  %v643_v15 = vld [vmem:[%s4977_s12 + $0x48] sm:$0xff]  ;;  %865 = vmatmul.mubr.f32.vlgmr.msra.gmra.mrb[8].mxu1 %v4078_v47 }
 0x65c   :  { %3811 = vtanh.f32 %v4424_v16  ;;  %3415 = vmatpush1.bf16.msra.mxu1 %v4480_v8  ;;  %944 = vmatprep.mubr.f32.mxu1 %v4078_v47 }
 0x65d   :  { %3417 = vmatprep.subr.bf16.mxu1 %v4483_v10  ;;  %3813 = vtanh.f32 %v774_v37 }
 0x65e   :  { %3815 = vtanh.f32 %v775_v38 }
 0x661   :  { %v3806_v17 = vpop.eup %3805 }
 0x662   :  { %v768_v18 = vmul.f32 0.5, %v3806_v17  ;;  %v3808_v19 = vpop.eup %3807  ;;  %v645_v17 = vld [vmem:[%s4977_s12 + $0x58] sm:$0xff] }
 0x664   :  { %v4427_v20 = vadd.f32 0.5, %v768_v18  ;;  %v4499_v18 = vpack.c.bf16 %v640_v14, %v638_v12  ;;  %v4572_v12 = vrot.slane %v666_v7, %v526_v59 }
 0x665   :  { %v3810_v21 = vpop.eup %3809 }
 0x666   :  { %v784_v22 = vmul.f32 %v3808_v19, %v4427_v20  ;;  %v769_v24 = vmul.f32 0.5, %v3810_v21  ;;  %v3812_v27 = vpop.eup %3811  ;;  %v4503_v19 = vpack.c.bf16 %v645_v17, %v643_v15  ;;  %v642_v21 = vld [vmem:[%s4977_s12 + $0x40] sm:$0xff]  ;;  %3419 = vmatpush1.bf16.msra.mxu1 %v4499_v18  ;;  %v782_v41 = vmul.f32 0.0, %v4427_v20 }
 0x667   :  { %v3814_v51 = vpop.eup %3813  ;;  %v4576_v17 = vrot.slane %v666_v7, %v530_v61 }
 0x668   :  { %788 = vrot.lane.b32.xlu1 %v784_v22, %s4076_s18  ;;  %v4431_v26 = vadd.f32 0.5, %v769_v24  ;;  %v644_v22 = vld [vmem:[%s4977_s12 + $0x50] sm:$0xff]  ;;  %v647_v24 = vld [vmem:[%s4977_s12 + $0x68] sm:$0xff]  ;;  %3421 = vmatprep.subr.bf16.mxu1 %v4503_v19  ;;  %v778_v11 = vmul.f32 0.5, %v3814_v51  ;;  %v3816_v53 = vpop.eup %3815 }
 0x669   :  { %v779_v16 = vmul.f32 0.5, %v3816_v53 }
 0x66a   :  { %v785_v29 = vmul.f32 %v3812_v27, %v4431_v26  ;;  %v649_v27 = vld [vmem:[%s4977_s12 + $0x78] sm:$0xff]  ;;  %v783_v45 = vmul.f32 0.0, %v4431_v26  ;;  %v780_v56 = vadd.f32 0.5, %v778_v11 }
 0x66b   :  { %v4521_v30 = vpack.c.bf16 %v649_v27, %v647_v24  ;;  %v781_v60 = vadd.f32 0.5, %v779_v16 }
 0x66c   :  { %790 = vrot.lane.b32.xlu0 %v785_v29, %s4076_s18  ;;  %v4518_v29 = vpack.c.bf16 %v644_v22, %v642_v21 }
 0x66e   :  { %3423 = vmatpush1.bf16.msra.mxu1 %v4518_v29 }
 0x66f   :  { %3425 = vmatprep.subr.bf16.mxu1 %v4521_v30 }
 0x672   :  { %3427 = vmatpush1.bf16.msra.mxu1 %v4530_v36 }
 0x673   :  { %3477 = vmatprep.subr.bf16.mxu1 %v4272_v0 }
 0x6da   :  { %v789_v42 = vpop.permute.xlu1 %788 }
 0x6db   :  { %v4538_v44 = vadd.f32 %v789_v42, %v782_v41 }
 0x6dd   :  { %3817 = vtanh.f32 %v4538_v44 }
 0x6de   :  { %v791_v50 = vpop.permute.xlu0 %790 }
 0x6df   :  { %v4542_v52 = vadd.f32 %v791_v50, %v783_v45 }
 0x6e1   :  { %3819 = vtanh.f32 %v4542_v52 }
 0x6e7   :  { %v3818_v57 = vpop.eup %3817 }
 0x6e8   :  { %v798_v20 = vmul.f32 %v3818_v57, %v780_v56 }
 0x6eb   :  { %v3820_v62 = vpop.eup %3819 }
 0x6ec   :  { %v799_v3 = vmul.f32 %v3820_v62, %v781_v60 }
 0x6ee   :  { %v873_v5 = vrot.slane %v799_v3, 7  ;;  %v1074_v3 = vrot.slane %v4538_v44, 7 }
 0x6f0   :  { %v875_v6 = vsel %vm874_vm4, %v873_v5, %v798_v20  ;;  %v1075_v20 = vrot.slane %v4542_v52, 7 }
 0x6f1   :  { %876 = vrot.lane.b32.xlu0 %v875_v6, %s4076_s18 }
 0x763   :  { %v877_v26 = vpop.permute.xlu0 %876 }
 0x764   :  { %3212 = vmatmul.mubr.msk.f32.vlgmr.msra.gmra.mrb[8].mxu1 %vm534_vm3, %v877_v26  ;;  %3213 = vmatmul.mubr.msk.f32.vlgmr.msra.gmra.mrb[6].mxu0 %vm534_vm3, %v877_v26 }
 0x765   :  { %3447 = vmatpush1.bf16.msra.mxu0 %v4437_v39  ;;  %3479 = vmatpush1.bf16.msra.mxu1 %v4314_v23 }
 0x766   :  { %3449 = vmatprep.subr.bf16.mxu0 %v4439_v40  ;;  %3481 = vmatprep.subr.bf16.mxu1 %v4316_v25 }
 0x767   :  { %1165 = vmatprep.mubr.f32.mxu0 %v4078_v47  ;;  %1335 = vmatprep.mubr.f32.mxu1 %v4078_v47 }
 0x769   :  { %3451 = vmatpush1.bf16.msra.mxu0 %v4444_v48  ;;  %3483 = vmatpush1.bf16.msra.mxu1 %v4327_v28 }
 0x76a   :  { %3453 = vmatprep.subr.bf16.mxu0 %v4447_v49  ;;  %3485 = vmatprep.subr.bf16.mxu1 %v4337_v31 }
 0x76d   :  { %3455 = vmatpush1.bf16.msra.mxu0 %v4450_v54  ;;  %3487 = vmatpush1.bf16.msra.mxu1 %v4345_v34 }
 0x76e   :  { %3457 = vmatprep.subr.bf16.mxu0 %v4453_v55  ;;  %3489 = vmatprep.subr.bf16.mxu1 %v4367_v43 }
 0x771   :  { %3459 = vmatpush1.bf16.msra.mxu0 %v4462_v63  ;;  %3491 = vmatpush1.bf16.msra.mxu1 %v4375_v46 }
 0x772   :  { %3461 = vmatprep.subr.bf16.mxu0 %v4465_v1  ;;  %3493 = vmatprep.subr.bf16.mxu1 %v4435_v35 }
 0x837   :  { %v946_v14 = vpop.f32.mrb[8].mxu1  ;;  %v1037_v15 = vpop.f32.mrb[6].mxu0 }
 0x838   :  { %v951_v21 = vadd.f32 %v946_v14, %v4572_v12  ;;  %v1044_v22 = vrot.slane %v1037_v15, 7  ;;  %v1052_v24 = vadd.f32 %v1037_v15, %v4414_v9  ;;  %v948_v27 = vpop.f32.mrb[9].mxu1  ;;  %v1039_v32 = vpop.f32.mrb[7].mxu0 }
 0x839   :  { %v1045_v41 = vrot.slane %v1039_v32, 7  ;;  %v952_v42 = vadd.f32 %v948_v27, %v4576_v17  ;;  %v1053_v58 = vadd.f32 %v1039_v32, %v4419_v13 }
 0x83a   :  { %v953_v33 = vmul.f32 0.5, %v951_v21  ;;  %v1050_v37 = vadd.f32 %v1044_v22, %v4409_v2  ;;  %v1055_v38 = vmul.f32 0.5, %v1052_v24 }
 0x83b   :  { %v1051_v61 = vadd.f32 %v1045_v41, %v4411_v4  ;;  %v958_v22 = vmul.f32 0.5, %v952_v42  ;;  %v1065_v52 = vmul.f32 0.5, %v1053_v58 }
 0x83c   :  { %3821 = vtanh.f32 %v953_v33  ;;  %v1054_v59 = vmul.f32 0.5, %v1050_v37 }
 0x83d   :  { %3823 = vtanh.f32 %v1055_v38  ;;  %v1064_v24 = vmul.f32 0.5, %v1051_v61 }
 0x83e   :  { %3825 = vtanh.f32 %v1054_v59 }
 0x83f   :  { %3827 = vtanh.f32 %v952_v42 }
 0x840   :  { %3829 = vtanh.f32 %v1053_v58 }
 0x841   :  { %3831 = vtanh.f32 %v1051_v61 }
 0x842   :  { %3833 = vtanh.f32 %v958_v22 }
 0x843   :  { %3835 = vtanh.f32 %v1064_v24 }
 0x844   :  { %3837 = vtanh.f32 %v1065_v52 }
 0x846   :  { %v3822_v45 = vpop.eup %3821 }
 0x847   :  { %v3824_v50 = vpop.eup %3823  ;;  %v955_v51 = vmul.f32 0.5, %v3822_v45 }
 0x848   :  { %v3826_v11 = vpop.eup %3825  ;;  %v1059_v53 = vmul.f32 0.5, %v3824_v50 }
 0x849   :  { %v956_v56 = vadd.f32 0.5, %v955_v51  ;;  %v1058_v16 = vmul.f32 0.5, %v3826_v11  ;;  %v3828_v57 = vpop.eup %3827 }
 0x84a   :  { %v1061_v60 = vadd.f32 0.5, %v1059_v53  ;;  %v3830_v62 = vpop.eup %3829 }
 0x84b   :  { %v963_v5 = vmul.f32 %v3828_v57, %v956_v56  ;;  %v1060_v6 = vadd.f32 0.5, %v1058_v16  ;;  %v3832_v26 = vpop.eup %3831  ;;  %v962_v44 = vmul.f32 0.0, %v956_v56 }
 0x84c   :  { %v1081_v7 = vmul.f32 %v3830_v62, %v1061_v60  ;;  %v1079_v14 = vmul.f32 %v1075_v20, %v1061_v60  ;;  %v3834_v41 = vpop.eup %3833 }
 0x84d   :  { %965 = vrot.lane.b32.xlu1 %v963_v5, %s4076_s18  ;;  %v1080_v15 = vmul.f32 %v3832_v26, %v1060_v6  ;;  %v1078_v21 = vmul.f32 %v1074_v3, %v1060_v6  ;;  %v3836_v42 = vpop.eup %3835  ;;  %v960_v58 = vmul.f32 0.5, %v3834_v41 }
 0x84e   :  { %v3838_v61 = vpop.eup %3837  ;;  %v1068_v45 = vmul.f32 0.5, %v3836_v42 }
 0x84f   :  { %1084 = vrot.lane.b32.xlu0 %v1080_v15, %s4076_s18  ;;  %v1069_v50 = vmul.f32 0.5, %v3838_v61  ;;  %v961_v51 = vadd.f32 0.5, %v960_v58 }
 0x850   :  { %v1070_v56 = vadd.f32 0.5, %v1068_v45 }
 0x851   :  { %1086 = vrot.lane.b32.xlu1 %v1081_v7, %s4076_s18  ;;  %v1071_v57 = vadd.f32 0.5, %v1069_v50 }
 0x8bf   :  { %v966_v27 = vpop.permute.xlu1 %965 }
 0x8c0   :  { %v4589_v32 = vadd.f32 %v966_v27, %v962_v44 }
 0x8c1   :  { %v1085_v33 = vpop.permute.xlu0 %1084 }
 0x8c2   :  { %3839 = vtanh.f32 %v4589_v32  ;;  %v4592_v37 = vadd.f32 %v1085_v33, %v1078_v21 }
 0x8c3   :  { %v1087_v38 = vpop.permute.xlu1 %1086 }
 0x8c4   :  { %3841 = vtanh.f32 %v4592_v37  ;;  %v4595_v59 = vadd.f32 %v1087_v38, %v1079_v14 }
 0x8c6   :  { %3843 = vtanh.f32 %v4595_v59 }
 0x8cc   :  { %v3840_v11 = vpop.eup %3839 }
 0x8cd   :  { %v970_v53 = vmul.f32 %v3840_v11, %v961_v51 }
 0x8ce   :  { %v3842_v16 = vpop.eup %3841 }
 0x8cf   :  { %1097 = vrot.lane.b32.xlu0 %v970_v53, %s4076_s18  ;;  %v1094_v20 = vmul.f32 %v3842_v16, %v1070_v56  ;;  %v1376_v16 = vrot.slane %v4592_v37, 7 }
 0x8d0   :  { %v3844_v60 = vpop.eup %3843 }
 0x8d1   :  { %v1095_v62 = vmul.f32 %v3844_v60, %v1071_v57  ;;  %v1174_v3 = vrot.slane %v1094_v20, 1  ;;  %v1377_v60 = vrot.slane %v4595_v59, 7 }
 0x8d3   :  { %v1175_v5 = vsel %vm874_vm4, %v1095_v62, %v1174_v3 }
 0x8d4   :  { %1176 = vrot.lane.b32.xlu1 %v1175_v5, %s4076_s18 }
 0x941   :  { %v1098_v6 = vpop.permute.xlu0 %1097 }
 0x942   :  { %3214 = vmatmul.mubr.msk.f32.vlgmr.msra.gmra.mrb[8].mxu0 %vm534_vm3, %v1098_v6 }
 0x943   :  { %3463 = vmatpush1.bf16.msra.mxu0 %v4480_v8  ;;  %1244 = vmatprep.mubr.f32.mxu0 %v4078_v47 }
 0x944   :  { %3465 = vmatprep.subr.bf16.mxu0 %v4483_v10 }
 0x946   :  { %v1177_v26 = vpop.permute.xlu1 %1176 }
 0x947   :  { %3467 = vmatpush1.bf16.msra.mxu0 %v4499_v18  ;;  %3216 = vmatmul.mubr.msk.f32.vlgmr.msra.gmra.mrb[10].mxu1 %vm534_vm3, %v1177_v26 }
 0x948   :  { %3469 = vmatprep.subr.bf16.mxu0 %v4503_v19  ;;  %3495 = vmatpush1.bf16.msra.mxu1 %v4437_v39 }
 0x949   :  { %3497 = vmatprep.subr.bf16.mxu1 %v4439_v40  ;;  %1467 = vmatprep.mubr.f32.mxu1 %v4078_v47 }
 0x94b   :  { %3471 = vmatpush1.bf16.msra.mxu0 %v4518_v29 }
 0x94c   :  { %3473 = vmatprep.subr.bf16.mxu0 %v4521_v30  ;;  %3499 = vmatpush1.bf16.msra.mxu1 %v4444_v48 }
 0x94d   :  { %3501 = vmatprep.subr.bf16.mxu1 %v4447_v49 }
 0x94f   :  { %3475 = vmatpush1.bf16.msra.mxu0 %v4530_v36 }
 0x950   :  { %3525 = vmatprep.subr.bf16.mxu0 %v4272_v0  ;;  %3503 = vmatpush1.bf16.msra.mxu1 %v4450_v54 }
 0x951   :  { %3505 = vmatprep.subr.bf16.mxu1 %v4453_v55 }
 0x952   :  { %3215 = vmatmul.mubr.msk.f32.vlgmr.msra.gmra.mrb[8].mxu0 %vm534_vm3, %v1177_v26 }
 0x953   :  { %3527 = vmatpush1.bf16.msra.mxu0 %v4314_v23  ;;  %1638 = vmatprep.mubr.f32.mxu0 %v4078_v47 }
 0x954   :  { %3529 = vmatprep.subr.bf16.mxu0 %v4316_v25  ;;  %3507 = vmatpush1.bf16.msra.mxu1 %v4462_v63 }
 0x955   :  { %3509 = vmatprep.subr.bf16.mxu1 %v4465_v1 }
 0x957   :  { %3531 = vmatpush1.bf16.msra.mxu0 %v4327_v28 }
 0x958   :  { %3533 = vmatprep.subr.bf16.mxu0 %v4337_v31 }
 0x95b   :  { %3535 = vmatpush1.bf16.msra.mxu0 %v4345_v34 }
 0x95c   :  { %3537 = vmatprep.subr.bf16.mxu0 %v4367_v43 }
 0x95f   :  { %3539 = vmatpush1.bf16.msra.mxu0 %v4375_v46 }
 0x960   :  { %3541 = vmatprep.subr.bf16.mxu0 %v4435_v35 }
 0xa1a   :  { %v1337_v7 = vpop.f32.mrb[10].mxu1 }
 0xa1b   :  { %v1344_v14 = vrot.slane %v1337_v7, 6  ;;  %v1346_v15 = vrot.slane %v1337_v7, 7  ;;  %v1339_v21 = vpop.f32.mrb[11].mxu1 }
 0xa1c   :  { %v1345_v52 = vrot.slane %v1339_v21, 6  ;;  %v1347_v44 = vrot.slane %v1339_v21, 7 }
 0xa1d   :  { %v1352_v22 = vadd.f32 %v1344_v14, %v4409_v2  ;;  %v1354_v24 = vadd.f32 %v1346_v15, %v4414_v9 }
 0xa1e   :  { %v1353_v38 = vadd.f32 %v1345_v52, %v4411_v4  ;;  %v1355_v41 = vadd.f32 %v1347_v44, %v4419_v13 }
 0xa1f   :  { %v1356_v27 = vmul.f32 0.5, %v1352_v22  ;;  %v1357_v33 = vmul.f32 0.5, %v1354_v24 }
 0xa20   :  { %v1366_v37 = vmul.f32 0.5, %v1353_v38 }
 0xa21   :  { %3845 = vtanh.f32 %v1356_v27  ;;  %v1367_v27 = vmul.f32 0.5, %v1355_v41 }
 0xa22   :  { %3847 = vtanh.f32 %v1357_v33 }
 0xa23   :  { %3849 = vtanh.f32 %v1353_v38 }
 0xa24   :  { %3851 = vtanh.f32 %v1355_v41 }
 0xa25   :  { %v1246_v42 = vpop.f32.mrb[8].mxu0 }
 0xa26   :  { %v1251_v58 = vadd.f32 %v1246_v42, %v4572_v12  ;;  %v1248_v61 = vpop.f32.mrb[9].mxu0 }
 0xa27   :  { %v1252_v50 = vadd.f32 %v1248_v61, %v4576_v17 }
 0xa28   :  { %v1253_v45 = vmul.f32 0.5, %v1251_v58 }
 0xa29   :  { %v1258_v59 = vmul.f32 0.5, %v1252_v50 }
 0xa2a   :  { %3853 = vtanh.f32 %v1253_v45 }
 0xa2b   :  { %v3846_v51 = vpop.eup %3845  ;;  %3855 = vtanh.f32 %v1252_v50 }
 0xa2c   :  { %v3848_v11 = vpop.eup %3847  ;;  %v1360_v53 = vmul.f32 0.5, %v3846_v51  ;;  %3857 = vtanh.f32 %v1366_v37 }
 0xa2d   :  { %v1361_v56 = vmul.f32 0.5, %v3848_v11  ;;  %v3850_v20 = vpop.eup %3849 }
 0xa2e   :  { %v1362_v57 = vadd.f32 0.5, %v1360_v53  ;;  %v3852_v3 = vpop.eup %3851 }
 0xa2f   :  { %v1363_v62 = vadd.f32 0.5, %v1361_v56 }
 0xa30   :  { %v1382_v5 = vmul.f32 %v3850_v20, %v1362_v57  ;;  %v1380_v6 = vmul.f32 %v1376_v16, %v1362_v57 }
 0xa31   :  { %v1383_v26 = vmul.f32 %v3852_v3, %v1363_v62  ;;  %v1381_v7 = vmul.f32 %v1377_v60, %v1363_v62 }
 0xa32   :  { %1386 = vrot.lane.b32.xlu1 %v1382_v5, %s4076_s18 }
 0xa34   :  { %v3854_v14 = vpop.eup %3853 }
 0xa35   :  { %v1255_v15 = vmul.f32 0.5, %v3854_v14  ;;  %v3856_v22 = vpop.eup %3855 }
 0xa36   :  { %v3858_v33 = vpop.eup %3857 }
 0xa37   :  { %v1256_v21 = vadd.f32 0.5, %v1255_v15  ;;  %v1370_v42 = vmul.f32 0.5, %v3858_v33 }
 0xa39   :  { %v1263_v24 = vmul.f32 %v3856_v22, %v1256_v21  ;;  %v1262_v58 = vmul.f32 %v1256_v21, %v4589_v32  ;;  %v1372_v38 = vadd.f32 0.5, %v1370_v42 }
 0xa3b   :  { %1265 = vrot.lane.b32.xlu0 %v1263_v24, %s4076_s18 }
 0xa3f   :  { %1388 = vrot.lane.b32.xlu0 %v1383_v26, %s4076_s18 }
 0xaa4   :  { %v1387_v52 = vpop.permute.xlu1 %1386 }
 0xaa5   :  { %v4642_v44 = vadd.f32 %v1387_v52, %v1380_v6 }
 0xaa7   :  { %3859 = vtanh.f32 %v4642_v44 }
 0xaa8   :  { %3861 = vtanh.f32 %v1258_v59 }
 0xaa9   :  { %3863 = vtanh.f32 %v1367_v27 }
 0xaad   :  { %v1266_v61 = vpop.permute.xlu0 %1265 }
 0xaae   :  { %v4646_v45 = vadd.f32 %v1266_v61, %v1262_v58 }
 0xab0   :  { %3865 = vtanh.f32 %v4646_v45 }
 0xab1   :  { %v3860_v51 = vpop.eup %3859  ;;  %v1389_v50 = vpop.permute.xlu0 %1388 }
 0xab2   :  { %v3862_v11 = vpop.eup %3861  ;;  %v4649_v53 = vadd.f32 %v1389_v50, %v1381_v7  ;;  %v1396_v56 = vmul.f32 %v3860_v51, %v1372_v38 }
 0xab3   :  { %v1260_v41 = vmul.f32 0.5, %v3862_v11  ;;  %v3864_v16 = vpop.eup %3863 }
 0xab4   :  { %3867 = vtanh.f32 %v4649_v53  ;;  %v1371_v57 = vmul.f32 0.5, %v3864_v16  ;;  %v1476_v6 = vrot.slane %v1396_v56, 2 }
 0xab5   :  { %v1261_v20 = vadd.f32 0.5, %v1260_v41 }
 0xab6   :  { %v1373_v62 = vadd.f32 0.5, %v1371_v57 }
 0xaba   :  { %v3866_v60 = vpop.eup %3865 }
 0xabb   :  { %v1270_v32 = vmul.f32 %v3866_v60, %v1261_v20 }
 0xabd   :  { %1399 = vrot.lane.b32.xlu1 %v1270_v32, %s4076_s18  ;;  %v1679_v32 = vrot.slane %v4642_v44, 7 }
 0xabe   :  { %v3868_v3 = vpop.eup %3867 }
 0xabf   :  { %v1397_v5 = vmul.f32 %v3868_v3, %v1373_v62 }
 0xac1   :  { %v1477_v26 = vrot.slane %v1397_v5, 1  ;;  %v1680_v5 = vrot.slane %v4649_v53, 7 }
 0xac3   :  { %v1478_v14 = vsel %vm874_vm4, %v1477_v26, %v1476_v6 }
 0xac4   :  { %1479 = vrot.lane.b32.xlu0 %v1478_v14, %s4076_s18 }
 0xb2f   :  { %v1400_v7 = vpop.permute.xlu1 %1399 }
 0xb30   :  { %3217 = vmatmul.mubr.msk.f32.vlgmr.msra.gmra.mrb[12].mxu1 %vm534_vm3, %v1400_v7 }
 0xb31   :  { %3511 = vmatpush1.bf16.msra.mxu1 %v4480_v8  ;;  %1547 = vmatprep.mubr.f32.mxu1 %v4078_v47 }
 0xb32   :  { %3513 = vmatprep.subr.bf16.mxu1 %v4483_v10 }
 0xb35   :  { %3515 = vmatpush1.bf16.msra.mxu1 %v4499_v18 }
 0xb36   :  { %v1480_v15 = vpop.permute.xlu0 %1479  ;;  %3517 = vmatprep.subr.bf16.mxu1 %v4503_v19 }
 0xb37   :  { %3219 = vmatmul.mubr.msk.f32.vlgmr.msra.gmra.mrb[10].mxu0 %vm534_vm3, %v1480_v15 }
 0xb38   :  { %3543 = vmatpush1.bf16.msra.mxu0 %v4437_v39  ;;  %1770 = vmatprep.mubr.f32.mxu0 %v4078_v47 }
 0xb39   :  { %3519 = vmatpush1.bf16.msra.mxu1 %v4518_v29  ;;  %3545 = vmatprep.subr.bf16.mxu0 %v4439_v40 }
 0xb3a   :  { %3521 = vmatprep.subr.bf16.mxu1 %v4521_v30 }
 0xb3c   :  { %3547 = vmatpush1.bf16.msra.mxu0 %v4444_v48 }
 0xb3d   :  { %3523 = vmatpush1.bf16.msra.mxu1 %v4530_v36  ;;  %3549 = vmatprep.subr.bf16.mxu0 %v4447_v49 }
 0xb3e   :  { %3573 = vmatprep.subr.bf16.mxu1 %v4272_v0 }
 0xb40   :  { %3218 = vmatmul.mubr.msk.f32.vlgmr.msra.gmra.mrb[12].mxu1 %vm534_vm3, %v1480_v15  ;;  %3551 = vmatpush1.bf16.msra.mxu0 %v4450_v54 }
 0xb41   :  { %3575 = vmatpush1.bf16.msra.mxu1 %v4314_v23  ;;  %3553 = vmatprep.subr.bf16.mxu0 %v4453_v55 }
 0xb42   :  { %3577 = vmatprep.subr.bf16.mxu1 %v4316_v25  ;;  %1941 = vmatprep.mubr.f32.mxu1 %v4078_v47 }
 0xb44   :  { %3555 = vmatpush1.bf16.msra.mxu0 %v4462_v63 }
 0xb45   :  { %3579 = vmatpush1.bf16.msra.mxu1 %v4327_v28  ;;  %3557 = vmatprep.subr.bf16.mxu0 %v4465_v1 }
 0xb46   :  { %3581 = vmatprep.subr.bf16.mxu1 %v4337_v31 }
 0xb49   :  { %3583 = vmatpush1.bf16.msra.mxu1 %v4345_v34 }
 0xb4a   :  { %3585 = vmatprep.subr.bf16.mxu1 %v4367_v43 }
 0xb4d   :  { %3587 = vmatpush1.bf16.msra.mxu1 %v4375_v46 }
 0xb4e   :  { %3589 = vmatprep.subr.bf16.mxu1 %v4435_v35 }
 0xc0a   :  { %v1640_v21 = vpop.f32.mrb[10].mxu0 }
 0xc0b   :  { %v1647_v22 = vrot.slane %v1640_v21, 5  ;;  %v1649_v24 = vrot.slane %v1640_v21, 6  ;;  %v1642_v37 = vpop.f32.mrb[11].mxu0 }
 0xc0c   :  { %v1648_v27 = vrot.slane %v1642_v37, 5  ;;  %v1650_v33 = vrot.slane %v1642_v37, 6 }
 0xc0d   :  { %v1655_v59 = vadd.f32 %v1647_v22, %v4409_v2  ;;  %v1657_v52 = vadd.f32 %v1649_v24, %v4414_v9 }
 0xc0e   :  { %v1656_v61 = vadd.f32 %v1648_v27, %v4411_v4  ;;  %v1658_v38 = vadd.f32 %v1650_v33, %v4419_v13 }
 0xc0f   :  { %v1659_v42 = vmul.f32 0.5, %v1655_v59  ;;  %v1660_v58 = vmul.f32 0.5, %v1657_v52 }
 0xc10   :  { %v1669_v44 = vmul.f32 0.5, %v1656_v61 }
 0xc11   :  { %3869 = vtanh.f32 %v1659_v42  ;;  %v1670_v42 = vmul.f32 0.5, %v1658_v38 }
 0xc12   :  { %3871 = vtanh.f32 %v1660_v58 }
 0xc13   :  { %v1549_v51 = vpop.f32.mrb[12].mxu1  ;;  %3873 = vtanh.f32 %v1656_v61 }
 0xc14   :  { %v1554_v50 = vadd.f32 %v1549_v51, %v4572_v12  ;;  %v1551_v11 = vpop.f32.mrb[13].mxu1  ;;  %3875 = vtanh.f32 %v1658_v38 }
 0xc15   :  { %v1555_v41 = vadd.f32 %v1551_v11, %v4576_v17 }
 0xc16   :  { %v1556_v56 = vmul.f32 0.5, %v1554_v50 }
 0xc17   :  { %v1561_v53 = vmul.f32 0.5, %v1555_v41 }
 0xc18   :  { %3877 = vtanh.f32 %v1556_v56 }
 0xc19   :  { %3879 = vtanh.f32 %v1555_v41 }
 0xc1a   :  { %3881 = vtanh.f32 %v1669_v44 }
 0xc1b   :  { %v3870_v16 = vpop.eup %3869  ;;  %3883 = vtanh.f32 %v1561_v53 }
 0xc1c   :  { %v3872_v57 = vpop.eup %3871  ;;  %v1663_v20 = vmul.f32 0.5, %v3870_v16 }
 0xc1d   :  { %v1664_v60 = vmul.f32 0.5, %v3872_v57  ;;  %v3874_v3 = vpop.eup %3873 }
 0xc1e   :  { %v1665_v62 = vadd.f32 0.5, %v1663_v20  ;;  %v3876_v26 = vpop.eup %3875 }
 0xc1f   :  { %v1666_v6 = vadd.f32 0.5, %v1664_v60 }
 0xc20   :  { %v1685_v14 = vmul.f32 %v3874_v3, %v1665_v62  ;;  %v1683_v7 = vmul.f32 %v1679_v32, %v1665_v62 }
 0xc21   :  { %v1686_v15 = vmul.f32 %v3876_v26, %v1666_v6  ;;  %v1684_v21 = vmul.f32 %v1680_v5, %v1666_v6 }
 0xc22   :  { %v3878_v22 = vpop.eup %3877  ;;  %1689 = vrot.lane.b32.xlu0 %v1685_v14, %s4076_s18 }
 0xc23   :  { %v1558_v24 = vmul.f32 0.5, %v3878_v22  ;;  %v3880_v59 = vpop.eup %3879 }
 0xc24   :  { %v3882_v58 = vpop.eup %3881 }
 0xc25   :  { %v1559_v37 = vadd.f32 0.5, %v1558_v24  ;;  %v1673_v11 = vmul.f32 0.5, %v3882_v58  ;;  %v3884_v16 = vpop.eup %3883 }
 0xc26   :  { %v1563_v60 = vmul.f32 0.5, %v3884_v16 }
 0xc27   :  { %v1566_v52 = vmul.f32 %v3880_v59, %v1559_v37  ;;  %v1565_v51 = vmul.f32 %v1559_v37, %v4646_v45  ;;  %v1675_v57 = vadd.f32 0.5, %v1673_v11 }
 0xc28   :  { %v1564_v3 = vadd.f32 0.5, %v1563_v60 }
 0xc29   :  { %1568 = vrot.lane.b32.xlu1 %v1566_v52, %s4076_s18 }
 0xc2d   :  { %1691 = vrot.lane.b32.xlu1 %v1686_v15, %s4076_s18 }
 0xc94   :  { %v1690_v27 = vpop.permute.xlu0 %1689 }
 0xc95   :  { %v4696_v33 = vadd.f32 %v1690_v27, %v1683_v7 }
 0xc97   :  { %3885 = vtanh.f32 %v4696_v33 }
 0xc98   :  { %3887 = vtanh.f32 %v1670_v42 }
 0xc9b   :  { %v1569_v50 = vpop.permute.xlu1 %1568 }
 0xc9c   :  { %v4700_v56 = vadd.f32 %v1569_v50, %v1565_v51 }
 0xc9e   :  { %3889 = vtanh.f32 %v4700_v56 }
 0xc9f   :  { %v1692_v61 = vpop.permute.xlu1 %1691 }
 0xca0   :  { %v4703_v41 = vadd.f32 %v1692_v61, %v1684_v21 }
 0xca1   :  { %v3886_v20 = vpop.eup %3885 }
 0xca2   :  { %3891 = vtanh.f32 %v4703_v41  ;;  %v1699_v38 = vmul.f32 %v3886_v20, %v1675_v57  ;;  %v3888_v32 = vpop.eup %3887 }
 0xca3   :  { %v1674_v62 = vmul.f32 0.5, %v3888_v32 }
 0xca4   :  { %v1779_v7 = vrot.slane %v1699_v38, 3 }
 0xca5   :  { %v1676_v6 = vadd.f32 0.5, %v1674_v62 }
 0xca8   :  { %v3890_v45 = vpop.eup %3889 }
 0xca9   :  { %v1573_v5 = vmul.f32 %v3890_v45, %v1564_v3 }
 0xcab   :  { %1702 = vrot.lane.b32.xlu0 %v1573_v5, %s4076_s18  ;;  %v1982_v5 = vrot.slane %v4696_v33, 7 }
 0xcac   :  { %v3892_v26 = vpop.eup %3891 }
 0xcad   :  { %v1700_v14 = vmul.f32 %v3892_v26, %v1676_v6 }
 0xcaf   :  { %v1780_v15 = vrot.slane %v1700_v14, 2  ;;  %v1983_v14 = vrot.slane %v4703_v41, 7 }
 0xcb1   :  { %v1781_v21 = vsel %vm874_vm4, %v1780_v15, %v1779_v7 }
 0xcb2   :  { %1782 = vrot.lane.b32.xlu1 %v1781_v21, %s4076_s18 }
 0xd1d   :  { %v1703_v22 = vpop.permute.xlu0 %1702 }
 0xd1e   :  { %3220 = vmatmul.mubr.msk.f32.vlgmr.msra.gmra.mrb[12].mxu0 %vm534_vm3, %v1703_v22 }
 0xd1f   :  { %3559 = vmatpush1.bf16.msra.mxu0 %v4480_v8  ;;  %1850 = vmatprep.mubr.f32.mxu0 %v4078_v47 }
 0xd20   :  { %3561 = vmatprep.subr.bf16.mxu0 %v4483_v10 }
 0xd23   :  { %3563 = vmatpush1.bf16.msra.mxu0 %v4499_v18 }
 0xd24   :  { %v1783_v24 = vpop.permute.xlu1 %1782  ;;  %3565 = vmatprep.subr.bf16.mxu0 %v4503_v19 }
 0xd25   :  { %3222 = vmatmul.mubr.msk.f32.vlgmr.msra.gmra.mrb[14].mxu1 %vm534_vm3, %v1783_v24 }
 0xd26   :  { %3591 = vmatpush1.bf16.msra.mxu1 %v4437_v39  ;;  %2073 = vmatprep.mubr.f32.mxu1 %v4078_v47 }
 0xd27   :  { %3567 = vmatpush1.bf16.msra.mxu0 %v4518_v29  ;;  %3593 = vmatprep.subr.bf16.mxu1 %v4439_v40 }
 0xd28   :  { %3569 = vmatprep.subr.bf16.mxu0 %v4521_v30 }
 0xd2a   :  { %3595 = vmatpush1.bf16.msra.mxu1 %v4444_v48 }
 0xd2b   :  { %3571 = vmatpush1.bf16.msra.mxu0 %v4530_v36  ;;  %3597 = vmatprep.subr.bf16.mxu1 %v4447_v49 }
 0xd2c   :  { %3621 = vmatprep.subr.bf16.mxu0 %v4272_v0 }
 0xd2e   :  { %3221 = vmatmul.mubr.msk.f32.vlgmr.msra.gmra.mrb[12].mxu0 %vm534_vm3, %v1783_v24  ;;  %3599 = vmatpush1.bf16.msra.mxu1 %v4450_v54 }
 0xd2f   :  { %3623 = vmatpush1.bf16.msra.mxu0 %v4314_v23  ;;  %3601 = vmatprep.subr.bf16.mxu1 %v4453_v55 }
 0xd30   :  { %3625 = vmatprep.subr.bf16.mxu0 %v4316_v25  ;;  %2244 = vmatprep.mubr.f32.mxu0 %v4078_v47 }
 0xd32   :  { %3603 = vmatpush1.bf16.msra.mxu1 %v4462_v63 }
 0xd33   :  { %3627 = vmatpush1.bf16.msra.mxu0 %v4327_v28  ;;  %3605 = vmatprep.subr.bf16.mxu1 %v4465_v1 }
 0xd34   :  { %3629 = vmatprep.subr.bf16.mxu0 %v4337_v31 }
 0xd37   :  { %3631 = vmatpush1.bf16.msra.mxu0 %v4345_v34 }
 0xd38   :  { %3633 = vmatprep.subr.bf16.mxu0 %v4367_v43 }
 0xd3b   :  { %3635 = vmatpush1.bf16.msra.mxu0 %v4375_v46 }
 0xd3c   :  { %3637 = vmatprep.subr.bf16.mxu0 %v4435_v35 }
 0xdf8   :  { %v1943_v37 = vpop.f32.mrb[14].mxu1 }
 0xdf9   :  { %v1950_v59 = vrot.slane %v1943_v37, 4  ;;  %v1952_v52 = vrot.slane %v1943_v37, 5  ;;  %v1945_v44 = vpop.f32.mrb[15].mxu1 }
 0xdfa   :  { %v1951_v42 = vrot.slane %v1945_v44, 4  ;;  %v1953_v58 = vrot.slane %v1945_v44, 5 }
 0xdfb   :  { %v1958_v53 = vadd.f32 %v1950_v59, %v4409_v2  ;;  %v1960_v27 = vadd.f32 %v1952_v52, %v4414_v9 }
 0xdfc   :  { %v1959_v11 = vadd.f32 %v1951_v42, %v4411_v4  ;;  %v1961_v61 = vadd.f32 %v1953_v58, %v4419_v13 }
 0xdfd   :  { %v1962_v51 = vmul.f32 0.5, %v1958_v53  ;;  %v1963_v50 = vmul.f32 0.5, %v1960_v27 }
 0xdfe   :  { %v1972_v33 = vmul.f32 0.5, %v1959_v11 }
 0xdff   :  { %3893 = vtanh.f32 %v1962_v51  ;;  %v1973_v51 = vmul.f32 0.5, %v1961_v61 }
 0xe00   :  { %3895 = vtanh.f32 %v1963_v50 }
 0xe01   :  { %v1852_v16 = vpop.f32.mrb[12].mxu0  ;;  %3897 = vtanh.f32 %v1959_v11 }
 0xe02   :  { %v1857_v57 = vadd.f32 %v1852_v16, %v4572_v12  ;;  %v1854_v20 = vpop.f32.mrb[13].mxu0  ;;  %3899 = vtanh.f32 %v1961_v61 }
 0xe03   :  { %v1858_v60 = vadd.f32 %v1854_v20, %v4576_v17 }
 0xe04   :  { %v1859_v38 = vmul.f32 0.5, %v1857_v57 }
 0xe05   :  { %v1864_v41 = vmul.f32 0.5, %v1858_v60 }
 0xe06   :  { %3901 = vtanh.f32 %v1859_v38 }
 0xe07   :  { %3903 = vtanh.f32 %v1858_v60 }
 0xe08   :  { %3905 = vtanh.f32 %v1972_v33 }
 0xe09   :  { %v3894_v32 = vpop.eup %3893  ;;  %3907 = vtanh.f32 %v1864_v41 }
 0xe0a   :  { %v3896_v62 = vpop.eup %3895  ;;  %v1966_v3 = vmul.f32 0.5, %v3894_v32 }
 0xe0b   :  { %v1967_v45 = vmul.f32 0.5, %v3896_v62  ;;  %v3898_v26 = vpop.eup %3897 }
 0xe0c   :  { %v1968_v6 = vadd.f32 0.5, %v1966_v3  ;;  %v3900_v15 = vpop.eup %3899 }
 0xe0d   :  { %v1969_v7 = vadd.f32 0.5, %v1967_v45 }
 0xe0e   :  { %v1988_v21 = vmul.f32 %v3898_v26, %v1968_v6  ;;  %v1986_v22 = vmul.f32 %v1982_v5, %v1968_v6 }
 0xe0f   :  { %v1989_v24 = vmul.f32 %v3900_v15, %v1969_v7  ;;  %v1987_v37 = vmul.f32 %v1983_v14, %v1969_v7 }
 0xe10   :  { %v3902_v59 = vpop.eup %3901  ;;  %1992 = vrot.lane.b32.xlu1 %v1988_v21, %s4076_s18 }
 0xe11   :  { %v1861_v52 = vmul.f32 0.5, %v3902_v59  ;;  %v3904_v53 = vpop.eup %3903 }
 0xe12   :  { %v3906_v50 = vpop.eup %3905 }
 0xe13   :  { %v1862_v44 = vadd.f32 0.5, %v1861_v52  ;;  %v1976_v20 = vmul.f32 0.5, %v3906_v50  ;;  %v3908_v32 = vpop.eup %3907 }
 0xe14   :  { %v1866_v45 = vmul.f32 0.5, %v3908_v32 }
 0xe15   :  { %v1869_v27 = vmul.f32 %v3904_v53, %v1862_v44  ;;  %v1868_v16 = vmul.f32 %v1862_v44, %v4700_v56  ;;  %v1978_v62 = vadd.f32 0.5, %v1976_v20 }
 0xe16   :  { %v1867_v26 = vadd.f32 0.5, %v1866_v45 }
 0xe17   :  { %1871 = vrot.lane.b32.xlu0 %v1869_v27, %s4076_s18 }
 0xe1b   :  { %1994 = vrot.lane.b32.xlu0 %v1989_v24, %s4076_s18 }
 0xe82   :  { %v1993_v42 = vpop.permute.xlu1 %1992 }
 0xe83   :  { %v4750_v58 = vadd.f32 %v1993_v42, %v1986_v22 }
 0xe85   :  { %3909 = vtanh.f32 %v4750_v58 }
 0xe86   :  { %3911 = vtanh.f32 %v1973_v51 }
 0xe89   :  { %v1872_v57 = vpop.permute.xlu0 %1871 }
 0xe8a   :  { %v4754_v38 = vadd.f32 %v1872_v57, %v1868_v16 }
 0xe8c   :  { %3913 = vtanh.f32 %v4754_v38 }
 0xe8d   :  { %v1995_v11 = vpop.permute.xlu0 %1994 }
 0xe8e   :  { %v4757_v60 = vadd.f32 %v1995_v11, %v1987_v37 }
 0xe8f   :  { %v3910_v3 = vpop.eup %3909 }
 0xe90   :  { %3915 = vtanh.f32 %v4757_v60  ;;  %v2002_v61 = vmul.f32 %v3910_v3, %v1978_v62  ;;  %v3912_v5 = vpop.eup %3911 }
 0xe91   :  { %v1977_v6 = vmul.f32 0.5, %v3912_v5 }
 0xe92   :  { %v2082_v22 = vrot.slane %v2002_v61, 4 }
 0xe93   :  { %v1979_v7 = vadd.f32 0.5, %v1977_v6 }
 0xe96   :  { %v3914_v56 = vpop.eup %3913 }
 0xe97   :  { %v1876_v14 = vmul.f32 %v3914_v56, %v1867_v26 }
 0xe99   :  { %2005 = vrot.lane.b32.xlu1 %v1876_v14, %s4076_s18  ;;  %v2285_v14 = vrot.slane %v4750_v58, 7 }
 0xe9a   :  { %v3916_v15 = vpop.eup %3915 }
 0xe9b   :  { %v2003_v21 = vmul.f32 %v3916_v15, %v1979_v7 }
 0xe9d   :  { %v2083_v24 = vrot.slane %v2003_v21, 3  ;;  %v2286_v21 = vrot.slane %v4757_v60, 7 }
 0xe9f   :  { %v2084_v37 = vsel %vm874_vm4, %v2083_v24, %v2082_v22 }
 0xea0   :  { %2085 = vrot.lane.b32.xlu0 %v2084_v37, %s4076_s18 }
 0xf0b   :  { %v2006_v59 = vpop.permute.xlu1 %2005 }
 0xf0c   :  { %3223 = vmatmul.mubr.msk.f32.vlgmr.msra.gmra.mrb[16].mxu1 %vm534_vm3, %v2006_v59 }
 0xf0d   :  { %3607 = vmatpush1.bf16.msra.mxu1 %v4480_v8  ;;  %2153 = vmatprep.mubr.f32.mxu1 %v4078_v47 }
 0xf0e   :  { %3609 = vmatprep.subr.bf16.mxu1 %v4483_v10 }
 0xf11   :  { %3611 = vmatpush1.bf16.msra.mxu1 %v4499_v18 }
 0xf12   :  { %v2086_v52 = vpop.permute.xlu0 %2085  ;;  %3613 = vmatprep.subr.bf16.mxu1 %v4503_v19 }
 0xf13   :  { %3225 = vmatmul.mubr.msk.f32.vlgmr.msra.gmra.mrb[14].mxu0 %vm534_vm3, %v2086_v52 }
 0xf14   :  { %3639 = vmatpush1.bf16.msra.mxu0 %v4437_v39  ;;  %2376 = vmatprep.mubr.f32.mxu0 %v4078_v47 }
 0xf15   :  { %3615 = vmatpush1.bf16.msra.mxu1 %v4518_v29  ;;  %3641 = vmatprep.subr.bf16.mxu0 %v4439_v40 }
 0xf16   :  { %3617 = vmatprep.subr.bf16.mxu1 %v4521_v30 }
 0xf18   :  { %3643 = vmatpush1.bf16.msra.mxu0 %v4444_v48 }
 0xf19   :  { %3619 = vmatpush1.bf16.msra.mxu1 %v4530_v36  ;;  %3645 = vmatprep.subr.bf16.mxu0 %v4447_v49 }
 0xf1a   :  { %3669 = vmatprep.subr.bf16.mxu1 %v4272_v0 }
 0xf1c   :  { %3224 = vmatmul.mubr.msk.f32.vlgmr.msra.gmra.mrb[16].mxu1 %vm534_vm3, %v2086_v52  ;;  %3647 = vmatpush1.bf16.msra.mxu0 %v4450_v54 }
 0xf1d   :  { %3671 = vmatpush1.bf16.msra.mxu1 %v4314_v23  ;;  %3649 = vmatprep.subr.bf16.mxu0 %v4453_v55 }
 0xf1e   :  { %3673 = vmatprep.subr.bf16.mxu1 %v4316_v25  ;;  %2547 = vmatprep.mubr.f32.mxu1 %v4078_v47 }
 0xf20   :  { %3651 = vmatpush1.bf16.msra.mxu0 %v4462_v63 }
 0xf21   :  { %3675 = vmatpush1.bf16.msra.mxu1 %v4327_v28  ;;  %3653 = vmatprep.subr.bf16.mxu0 %v4465_v1 }
 0xf22   :  { %3677 = vmatprep.subr.bf16.mxu1 %v4337_v31 }
 0xf25   :  { %3679 = vmatpush1.bf16.msra.mxu1 %v4345_v34 }
 0xf26   :  { %3681 = vmatprep.subr.bf16.mxu1 %v4367_v43 }
 0xf29   :  { %3683 = vmatpush1.bf16.msra.mxu1 %v4375_v46 }
 0xf2a   :  { %3685 = vmatprep.subr.bf16.mxu1 %v4435_v35 }
 0xfe6   :  { %v2246_v44 = vpop.f32.mrb[14].mxu0 }
 0xfe7   :  { %v2253_v53 = vrot.slane %v2246_v44, 3  ;;  %v2255_v27 = vrot.slane %v2246_v44, 4  ;;  %v2248_v33 = vpop.f32.mrb[15].mxu0 }
 0xfe8   :  { %v2254_v51 = vrot.slane %v2248_v33, 3  ;;  %v2256_v50 = vrot.slane %v2248_v33, 4 }
 0xfe9   :  { %v2261_v41 = vadd.f32 %v2253_v53, %v4409_v2  ;;  %v2263_v42 = vadd.f32 %v2255_v27, %v4414_v9 }
 0xfea   :  { %v2262_v20 = vadd.f32 %v2254_v51, %v4411_v4  ;;  %v2264_v11 = vadd.f32 %v2256_v50, %v4419_v13 }
 0xfeb   :  { %v2265_v16 = vmul.f32 0.5, %v2261_v41  ;;  %v2266_v57 = vmul.f32 0.5, %v2263_v42 }
 0xfec   :  { %v2275_v58 = vmul.f32 0.5, %v2262_v20 }
 0xfed   :  { %3917 = vtanh.f32 %v2265_v16  ;;  %v2276_v16 = vmul.f32 0.5, %v2264_v11 }
 0xfee   :  { %3919 = vtanh.f32 %v2266_v57 }
 0xfef   :  { %v2155_v32 = vpop.f32.mrb[16].mxu1  ;;  %3921 = vtanh.f32 %v2262_v20 }
 0xff0   :  { %v2160_v62 = vadd.f32 %v2155_v32, %v4572_v12  ;;  %v2157_v3 = vpop.f32.mrb[17].mxu1  ;;  %3923 = vtanh.f32 %v2264_v11 }
 0xff1   :  { %v2161_v45 = vadd.f32 %v2157_v3, %v4576_v17 }
 0xff2   :  { %v2162_v61 = vmul.f32 0.5, %v2160_v62 }
 0xff3   :  { %v2167_v60 = vmul.f32 0.5, %v2161_v45 }
 0xff4   :  { %3925 = vtanh.f32 %v2162_v61 }
 0xff5   :  { %3927 = vtanh.f32 %v2161_v45 }
 0xff6   :  { %3929 = vtanh.f32 %v2275_v58 }
 0xff7   :  { %v3918_v5 = vpop.eup %3917  ;;  %3931 = vtanh.f32 %v2167_v60 }
 0xff8   :  { %v3920_v6 = vpop.eup %3919  ;;  %v2269_v26 = vmul.f32 0.5, %v3918_v5 }
 0xff9   :  { %v2270_v56 = vmul.f32 0.5, %v3920_v6  ;;  %v3922_v15 = vpop.eup %3921 }
 0xffa   :  { %v2271_v7 = vadd.f32 0.5, %v2269_v26  ;;  %v3924_v24 = vpop.eup %3923 }
 0xffb   :  { %v2272_v22 = vadd.f32 0.5, %v2270_v56 }
 0xffc   :  { %v2291_v37 = vmul.f32 %v3922_v15, %v2271_v7  ;;  %v2289_v59 = vmul.f32 %v2285_v14, %v2271_v7 }
 0xffd   :  { %v2292_v52 = vmul.f32 %v3924_v24, %v2272_v22  ;;  %v2290_v44 = vmul.f32 %v2286_v21, %v2272_v22 }
 0xffe   :  { %v3926_v53 = vpop.eup %3925  ;;  %2295 = vrot.lane.b32.xlu0 %v2291_v37, %s4076_s18 }
 0xfff   :  { %v2164_v27 = vmul.f32 0.5, %v3926_v53  ;;  %v3928_v41 = vpop.eup %3927 }
0x1000   :  { %v3930_v57 = vpop.eup %3929 }
0x1001   :  { %v2165_v33 = vadd.f32 0.5, %v2164_v27  ;;  %v2279_v3 = vmul.f32 0.5, %v3930_v57  ;;  %v3932_v5 = vpop.eup %3931 }
0x1002   :  { %v2169_v56 = vmul.f32 0.5, %v3932_v5 }
0x1003   :  { %v2172_v42 = vmul.f32 %v3928_v41, %v2165_v33  ;;  %v2171_v32 = vmul.f32 %v2165_v33, %v4754_v38  ;;  %v2281_v6 = vadd.f32 0.5, %v2279_v3 }
0x1004   :  { %v2170_v15 = vadd.f32 0.5, %v2169_v56 }
0x1005   :  { %2174 = vrot.lane.b32.xlu1 %v2172_v42, %s4076_s18 }
0x1009   :  { %2297 = vrot.lane.b32.xlu1 %v2292_v52, %s4076_s18 }
0x1070   :  { %v2296_v51 = vpop.permute.xlu0 %2295 }
0x1071   :  { %v4804_v50 = vadd.f32 %v2296_v51, %v2289_v59 }
0x1073   :  { %3933 = vtanh.f32 %v4804_v50  ;;  %v2588_v5 = vrot.slane %v4804_v50, 7 }
0x1074   :  { %3935 = vtanh.f32 %v2276_v16 }
0x1077   :  { %v2175_v62 = vpop.permute.xlu1 %2174 }
0x1078   :  { %v4808_v61 = vadd.f32 %v2175_v62, %v2171_v32 }
0x107a   :  { %3937 = vtanh.f32 %v4808_v61 }
0x107b   :  { %v2298_v20 = vpop.permute.xlu1 %2297 }
0x107c   :  { %v4811_v45 = vadd.f32 %v2298_v20, %v2290_v44 }
0x107d   :  { %v3934_v26 = vpop.eup %3933 }
0x107e   :  { %3939 = vtanh.f32 %v4811_v45  ;;  %v2305_v11 = vmul.f32 %v3934_v26, %v2281_v6  ;;  %v3936_v14 = vpop.eup %3935 }
0x107f   :  { %v2280_v7 = vmul.f32 0.5, %v3936_v14 }
0x1080   :  { %v2385_v59 = vrot.slane %v2305_v11, 5  ;;  %v2589_v11 = vrot.slane %v4811_v45, 7 }
0x1081   :  { %v2282_v22 = vadd.f32 0.5, %v2280_v7 }
0x1084   :  { %v3938_v38 = vpop.eup %3937 }
0x1085   :  { %v2179_v21 = vmul.f32 %v3938_v38, %v2170_v15 }
0x1087   :  { %2308 = vrot.lane.b32.xlu0 %v2179_v21, %s4076_s18 }
0x1088   :  { %v3940_v24 = vpop.eup %3939 }
0x1089   :  { %v2306_v37 = vmul.f32 %v3940_v24, %v2282_v22 }
0x108b   :  { %v2386_v52 = vrot.slane %v2306_v37, 4 }
0x108d   :  { %v2387_v44 = vsel %vm874_vm4, %v2386_v52, %v2385_v59 }
0x108e   :  { %2388 = vrot.lane.b32.xlu1 %v2387_v44, %s4076_s18 }
0x10f9   :  { %v2309_v53 = vpop.permute.xlu0 %2308 }
0x10fa   :  { %3226 = vmatmul.mubr.msk.f32.vlgmr.msra.gmra.mrb[16].mxu0 %vm534_vm3, %v2309_v53 }
0x10fb   :  { %3655 = vmatpush1.bf16.msra.mxu0 %v4480_v8  ;;  %2456 = vmatprep.mubr.f32.mxu0 %v4078_v47 }
0x10fc   :  { %3657 = vmatprep.subr.bf16.mxu0 %v4483_v10 }
0x10ff   :  { %3659 = vmatpush1.bf16.msra.mxu0 %v4499_v18 }
0x1100   :  { %v2389_v27 = vpop.permute.xlu1 %2388  ;;  %3661 = vmatprep.subr.bf16.mxu0 %v4503_v19 }
0x1101   :  { %3228 = vmatmul.mubr.msk.f32.vlgmr.msra.gmra.mrb[18].mxu1 %vm534_vm3, %v2389_v27 }
0x1102   :  { %3687 = vmatpush1.bf16.msra.mxu1 %v4437_v39  ;;  %2679 = vmatprep.mubr.f32.mxu1 %v4078_v47 }
0x1103   :  { %3663 = vmatpush1.bf16.msra.mxu0 %v4518_v29  ;;  %3689 = vmatprep.subr.bf16.mxu1 %v4439_v40 }
0x1104   :  { %3665 = vmatprep.subr.bf16.mxu0 %v4521_v30 }
0x1106   :  { %3691 = vmatpush1.bf16.msra.mxu1 %v4444_v48 }
0x1107   :  { %3667 = vmatpush1.bf16.msra.mxu0 %v4530_v36  ;;  %3693 = vmatprep.subr.bf16.mxu1 %v4447_v49 }
0x1108   :  { %3717 = vmatprep.subr.bf16.mxu0 %v4272_v0 }
0x110a   :  { %3227 = vmatmul.mubr.msk.f32.vlgmr.msra.gmra.mrb[16].mxu0 %vm534_vm3, %v2389_v27  ;;  %3695 = vmatpush1.bf16.msra.mxu1 %v4450_v54 }
0x110b   :  { %3719 = vmatpush1.bf16.msra.mxu0 %v4314_v23  ;;  %3697 = vmatprep.subr.bf16.mxu1 %v4453_v55 }
0x110c   :  { %3721 = vmatprep.subr.bf16.mxu0 %v4316_v25  ;;  %2850 = vmatprep.mubr.f32.mxu0 %v4078_v47 }
0x110e   :  { %3699 = vmatpush1.bf16.msra.mxu1 %v4462_v63 }
0x110f   :  { %3723 = vmatpush1.bf16.msra.mxu0 %v4327_v28  ;;  %3701 = vmatprep.subr.bf16.mxu1 %v4465_v1 }
0x1110   :  { %3725 = vmatprep.subr.bf16.mxu0 %v4337_v31 }
0x1113   :  { %3727 = vmatpush1.bf16.msra.mxu0 %v4345_v34 }
0x1114   :  { %3729 = vmatprep.subr.bf16.mxu0 %v4367_v43 }
0x1117   :  { %3731 = vmatpush1.bf16.msra.mxu0 %v4375_v46 }
0x1118   :  { %3733 = vmatprep.subr.bf16.mxu0 %v4435_v35 }
0x11d4   :  { %v2549_v0 = vpop.f32.mrb[18].mxu1 }
0x11d5   :  { %v2556_v23 = vrot.slane %v2549_v0, 2  ;;  %v2558_v25 = vrot.slane %v2549_v0, 3  ;;  %v2551_v33 = vpop.f32.mrb[19].mxu1 }
0x11d6   :  { %v2557_v42 = vrot.slane %v2551_v33, 2  ;;  %v2559_v58 = vrot.slane %v2551_v33, 3 }
0x11d7   :  { %v2564_v41 = vadd.f32 %v2556_v23, %v4409_v2  ;;  %v2566_v28 = vadd.f32 %v2558_v25, %v4414_v9 }
0x11d8   :  { %v2565_v34 = vadd.f32 %v2557_v42, %v4411_v4  ;;  %v2567_v43 = vadd.f32 %v2559_v58, %v4419_v13 }
0x11d9   :  { %v2568_v60 = vmul.f32 0.5, %v2564_v41  ;;  %v2569_v31 = vmul.f32 0.5, %v2566_v28 }
0x11da   :  { %v2578_v50 = vmul.f32 0.5, %v2565_v34  ;;  %v2579_v27 = vmul.f32 0.5, %v2567_v43 }
0x11db   :  { %3941 = vtanh.f32 %v2568_v60 }
0x11dc   :  { %3943 = vtanh.f32 %v2569_v31 }
0x11dd   :  { %v2458_v46 = vpop.f32.mrb[16].mxu0  ;;  %3945 = vtanh.f32 %v2565_v34 }
0x11de   :  { %v2463_v35 = vadd.f32 %v2458_v46, %v4572_v12  ;;  %v2460_v51 = vpop.f32.mrb[17].mxu0  ;;  %3947 = vtanh.f32 %v2567_v43 }
0x11df   :  { %v2464_v57 = vadd.f32 %v2460_v51, %v4576_v17 }
0x11e0   :  { %v2465_v16 = vmul.f32 0.5, %v2463_v35 }
0x11e1   :  { %v2470_v45 = vmul.f32 0.5, %v2464_v57 }
0x11e2   :  { %3949 = vtanh.f32 %v2465_v16 }
0x11e3   :  { %3951 = vtanh.f32 %v2464_v57 }
0x11e4   :  { %3953 = vtanh.f32 %v2578_v50 }
0x11e5   :  { %v3942_v32 = vpop.eup %3941  ;;  %3955 = vtanh.f32 %v2470_v45 }
0x11e6   :  { %v3944_v62 = vpop.eup %3943  ;;  %v2572_v3 = vmul.f32 0.5, %v3942_v32 }
0x11e7   :  { %v2573_v20 = vmul.f32 0.5, %v3944_v62  ;;  %v3946_v26 = vpop.eup %3945 }
0x11e8   :  { %v2574_v6 = vadd.f32 0.5, %v2572_v3  ;;  %v3948_v14 = vpop.eup %3947 }
0x11e9   :  { %v2575_v56 = vadd.f32 0.5, %v2573_v20 }
0x11ea   :  { %v2594_v7 = vmul.f32 %v3946_v26, %v2574_v6  ;;  %v2592_v15 = vmul.f32 %v2588_v5, %v2574_v6 }
0x11eb   :  { %v2595_v38 = vmul.f32 %v3948_v14, %v2575_v56  ;;  %v2593_v21 = vmul.f32 %v2589_v11, %v2575_v56 }
0x11ec   :  { %v3950_v22 = vpop.eup %3949  ;;  %2598 = vrot.lane.b32.xlu1 %v2594_v7, %s4076_s18 }
0x11ed   :  { %v2467_v24 = vmul.f32 0.5, %v3950_v22  ;;  %v3952_v59 = vpop.eup %3951 }
0x11ee   :  { %v3954_v0 = vpop.eup %3953 }
0x11ef   :  { %v2468_v37 = vadd.f32 0.5, %v2467_v24  ;;  %v2582_v33 = vmul.f32 0.5, %v3954_v0  ;;  %v3956_v42 = vpop.eup %3955 }
0x11f0   :  { %v2472_v43 = vmul.f32 0.5, %v3956_v42 }
0x11f1   :  { %v2475_v52 = vmul.f32 %v3952_v59, %v2468_v37  ;;  %v2474_v23 = vmul.f32 %v2468_v37, %v4808_v61  ;;  %v2584_v60 = vadd.f32 0.5, %v2582_v33 }
0x11f2   :  { %v2473_v51 = vadd.f32 0.5, %v2472_v43 }
0x11f3   :  { %2477 = vrot.lane.b32.xlu0 %v2475_v52, %s4076_s18 }
0x11f7   :  { %2600 = vrot.lane.b32.xlu0 %v2595_v38, %s4076_s18 }
0x125e   :  { %v2599_v44 = vpop.permute.xlu1 %2598 }
0x125f   :  { %v4858_v53 = vadd.f32 %v2599_v44, %v2592_v15 }
0x1261   :  { %3957 = vtanh.f32 %v4858_v53 }
0x1262   :  { %3959 = vtanh.f32 %v2579_v27 }
0x1265   :  { %v2478_v25 = vpop.permute.xlu0 %2477 }
0x1266   :  { %v4862_v41 = vadd.f32 %v2478_v25, %v2474_v23 }
0x1268   :  { %3961 = vtanh.f32 %v4862_v41 }
0x1269   :  { %v2601_v28 = vpop.permute.xlu0 %2600 }
0x126a   :  { %v4865_v58 = vadd.f32 %v2601_v28, %v2593_v21 }
0x126b   :  { %v3958_v31 = vpop.eup %3957 }
0x126c   :  { %3963 = vtanh.f32 %v4865_v58  ;;  %v2608_v34 = vmul.f32 %v3958_v31, %v2584_v60  ;;  %v3960_v46 = vpop.eup %3959 }
0x126d   :  { %v2583_v35 = vmul.f32 0.5, %v3960_v46 }
0x126e   :  { %v2688_v3 = vrot.slane %v2608_v34, 6 }
0x126f   :  { %v2585_v57 = vadd.f32 0.5, %v2583_v35 }
0x1272   :  { %v3962_v61 = vpop.eup %3961 }
0x1273   :  { %v2482_v16 = vmul.f32 %v3962_v61, %v2473_v51 }
0x1275   :  { %2611 = vrot.lane.b32.xlu1 %v2482_v16, %s4076_s18 }
0x1276   :  { %v3964_v32 = vpop.eup %3963 }
0x1277   :  { %v2609_v62 = vmul.f32 %v3964_v32, %v2585_v57 }
0x1279   :  { %v2689_v20 = vrot.slane %v2609_v62, 5 }
0x127b   :  { %v2690_v5 = vsel %vm874_vm4, %v2689_v20, %v2688_v3 }
0x127c   :  { %2691 = vrot.lane.b32.xlu0 %v2690_v5, %s4076_s18 }
0x12e7   :  { %v2612_v6 = vpop.permute.xlu1 %2611 }
0x12e8   :  { %3229 = vmatmul.mubr.msk.f32.vlgmr.msra.gmra.mrb[20].mxu1 %vm534_vm3, %v2612_v6 }
0x12e9   :  { %3703 = vmatpush1.bf16.msra.mxu1 %v4480_v8  ;;  %2759 = vmatprep.mubr.f32.mxu1 %v4078_v47 }
0x12ea   :  { %3705 = vmatprep.subr.bf16.mxu1 %v4483_v10 }
0x12ed   :  { %3707 = vmatpush1.bf16.msra.mxu1 %v4499_v18 }
0x12ee   :  { %v2692_v26 = vpop.permute.xlu0 %2691  ;;  %3709 = vmatprep.subr.bf16.mxu1 %v4503_v19 }
0x12ef   :  { %3231 = vmatmul.mubr.msk.f32.vlgmr.msra.gmra.mrb[18].mxu0 %vm534_vm3, %v2692_v26 }
0x12f0   :  { %3735 = vmatpush1.bf16.msra.mxu0 %v4437_v39  ;;  %2982 = vmatprep.mubr.f32.mxu0 %v4078_v47 }
0x12f1   :  { %3711 = vmatpush1.bf16.msra.mxu1 %v4518_v29  ;;  %3737 = vmatprep.subr.bf16.mxu0 %v4439_v40 }
0x12f2   :  { %3713 = vmatprep.subr.bf16.mxu1 %v4521_v30 }
0x12f4   :  { %3739 = vmatpush1.bf16.msra.mxu0 %v4444_v48 }
0x12f5   :  { %3715 = vmatpush1.bf16.msra.mxu1 %v4530_v36  ;;  %3741 = vmatprep.subr.bf16.mxu0 %v4447_v49 }
0x12f8   :  { %3230 = vmatmul.mubr.msk.f32.vlgmr.msra.gmra.mrb[20].mxu1 %vm534_vm3, %v2692_v26  ;;  %3743 = vmatpush1.bf16.msra.mxu0 %v4450_v54 }
0x12f9   :  { %3745 = vmatprep.subr.bf16.mxu0 %v4453_v55  ;;  %3329 = vmatprep.mubr.msk.f32.mxu1 %vm4080_vm5, %v4078_v47 }
0x12fc   :  { %3747 = vmatpush1.bf16.msra.mxu0 %v4462_v63 }
0x12fd   :  { %3749 = vmatprep.subr.bf16.mxu0 %v4465_v1 }
0x13c2   :  { %v2852_v39 = vpop.f32.mrb[18].mxu0 }
0x13c3   :  { %v2859_v40 = vrot.slane %v2852_v39, 1  ;;  %v2861_v11 = vrot.slane %v2852_v39, 2  ;;  %v2854_v56 = vpop.f32.mrb[19].mxu0 }
0x13c4   :  { %v2860_v7 = vrot.slane %v2854_v56, 1  ;;  %v2862_v49 = vrot.slane %v2854_v56, 2 }
0x13c5   :  { %v2867_v48 = vadd.f32 %v2859_v40, %v4409_v2  ;;  %v2869_v14 = vadd.f32 %v2861_v11, %v4414_v9 }
0x13c6   :  { %v2868_v54 = vadd.f32 %v2860_v7, %v4411_v4  ;;  %v2870_v55 = vadd.f32 %v2862_v49, %v4419_v13  ;;  %v2891_v4 = vrot.slane %v4858_v53, 7  ;;  %v2892_v13 = vrot.slane %v4865_v58, 7 }
0x13c7   :  { %v2871_v15 = vmul.f32 0.5, %v2867_v48  ;;  %v2872_v38 = vmul.f32 0.5, %v2869_v14 }
0x13c8   :  { %v2881_v53 = vmul.f32 0.5, %v2868_v54  ;;  %v2882_v46 = vmul.f32 0.5, %v2870_v55 }
0x13c9   :  { %3965 = vtanh.f32 %v2871_v15 }
0x13ca   :  { %3967 = vtanh.f32 %v2872_v38 }
0x13cb   :  { %v2761_v63 = vpop.f32.mrb[20].mxu1  ;;  %3969 = vtanh.f32 %v2868_v54 }
0x13cc   :  { %v2766_v1 = vadd.f32 %v2761_v63, %v4572_v12  ;;  %v2763_v21 = vpop.f32.mrb[21].mxu1  ;;  %3971 = vtanh.f32 %v2870_v55 }
0x13cd   :  { %v2767_v2 = vadd.f32 %v2763_v21, %v4576_v17 }
0x13ce   :  { %v2768_v22 = vmul.f32 0.5, %v2766_v1 }
0x13cf   :  { %v2773_v58 = vmul.f32 0.5, %v2767_v2 }
0x13d0   :  { %3973 = vtanh.f32 %v2768_v22 }
0x13d1   :  { %3975 = vtanh.f32 %v2767_v2 }
0x13d2   :  { %3977 = vtanh.f32 %v2881_v53  ;;  %v3234_v53 = vld [vmem:[%s4981_s16] ss:$0 sm:$0xff] }
0x13d3   :  { %v3966_v9 = vpop.eup %3965  ;;  %3979 = vtanh.f32 %v2773_v58 }
0x13d4   :  { %v3968_v24 = vpop.eup %3967  ;;  %v2875_v37 = vmul.f32 0.5, %v3966_v9 }
0x13d5   :  { %v2876_v59 = vmul.f32 0.5, %v3968_v24  ;;  %v3970_v50 = vpop.eup %3969  ;;  %v3093_v24 = vld [vmem:[%s4980_s15 + $0x18] sm:$0xff] }
0x13d6   :  { %v2877_v52 = vadd.f32 0.5, %v2875_v37  ;;  %v3972_v44 = vpop.eup %3971 }
0x13d7   :  { %v2878_v45 = vadd.f32 0.5, %v2876_v59  ;;  %v3094_v59 = vld [vmem:[%s4980_s15 + $0x20] sm:$0xff] }
0x13d8   :  { %v2897_v27 = vmul.f32 %v3970_v50, %v2877_v52  ;;  %v2895_v0 = vmul.f32 %v2891_v4, %v2877_v52  ;;  %v3095_v4 = vld [vmem:[%s4980_s15 + $0x28] sm:$0xff]  ;;  %v3096_v50 = vld [vmem:[%s4980_s15 + $0x30] sm:$0xff] }
0x13d9   :  { %v2898_v23 = vmul.f32 %v3972_v44, %v2878_v45  ;;  %v2896_v25 = vmul.f32 %v2892_v13, %v2878_v45  ;;  %v3771_v52 = vpack.c.bf16 %v3095_v4, %v3094_v59 }
0x13da   :  { %v3974_v33 = vpop.eup %3973  ;;  %2901 = vrot.lane.b32.xlu0 %v2897_v27, %s4076_s18 }
0x13db   :  { %v2770_v28 = vmul.f32 0.5, %v3974_v33  ;;  %v3976_v60 = vpop.eup %3975 }
0x13dc   :  { %v3978_v35 = vpop.eup %3977 }
0x13dd   :  { %v2771_v42 = vadd.f32 0.5, %v2770_v28  ;;  %v2885_v16 = vmul.f32 0.5, %v3978_v35  ;;  %v3980_v62 = vpop.eup %3979 }
0x13de   :  { %v2775_v26 = vmul.f32 0.5, %v3980_v62 }
0x13df   :  { %v2778_v31 = vmul.f32 %v3976_v60, %v2771_v42  ;;  %v2777_v51 = vmul.f32 %v2771_v42, %v4862_v41  ;;  %v2887_v20 = vadd.f32 0.5, %v2885_v16 }
0x13e0   :  { %v2776_v11 = vadd.f32 0.5, %v2775_v26 }
0x13e1   :  { %2780 = vrot.lane.b32.xlu1 %v2778_v31, %s4076_s18 }
0x13e5   :  { %2903 = vrot.lane.b32.xlu1 %v2898_v23, %s4076_s18 }
0x144c   :  { %v2902_v34 = vpop.permute.xlu0 %2901 }
0x144d   :  { %v2907_v43 = vadd.f32 %v2902_v34, %v2895_v0 }
0x144f   :  { %3981 = vtanh.f32 %v2907_v43 }
0x1450   :  { %3983 = vtanh.f32 %v2882_v46 }
0x1453   :  { %v2781_v61 = vpop.permute.xlu1 %2780 }
0x1454   :  { %v4903_v57 = vadd.f32 %v2781_v61, %v2777_v51 }
0x1456   :  { %3985 = vtanh.f32 %v4903_v57 }
0x1457   :  { %v2904_v32 = vpop.permute.xlu1 %2903 }
0x1458   :  { %v2908_v3 = vadd.f32 %v2904_v32, %v2896_v25 }
0x1459   :  { %v3982_v5 = vpop.eup %3981 }
0x145a   :  { %3987 = vtanh.f32 %v2908_v3  ;;  %v2911_v6 = vmul.f32 %v3982_v5, %v2887_v20  ;;  %v3984_v39 = vpop.eup %3983 }
0x145b   :  { %v2886_v40 = vmul.f32 0.5, %v3984_v39 }
0x145c   :  { %v2991_v49 = vrot.slane %v2911_v6, 7 }
0x145d   :  { %v2888_v41 = vadd.f32 0.5, %v2886_v40 }
0x1460   :  { %v3986_v56 = vpop.eup %3985 }
0x1461   :  { %v2785_v48 = vmul.f32 %v3986_v56, %v2776_v11 }
0x1463   :  { %2914 = vrot.lane.b32.xlu0 %v2785_v48, %s4076_s18 }
0x1464   :  { %v3988_v14 = vpop.eup %3987 }
0x1465   :  { %v2912_v7 = vmul.f32 %v3988_v14, %v2888_v41 }
0x1467   :  { %v2992_v15 = vrot.slane %v2912_v7, 6 }
0x1469   :  { %v2993_v38 = vsel %vm874_vm4, %v2992_v15, %v2991_v49 }
0x146a   :  { %2994 = vrot.lane.b32.xlu1 %v2993_v38, %s4076_s18 }
0x14d5   :  { %v2915_v54 = vpop.permute.xlu0 %2914 }
0x14d6   :  { %3232 = vmatmul.mubr.msk.f32.vlgmr.msra.gmra.mrb[20].mxu0 %vm534_vm3, %v2915_v54 }
0x14d7   :  { %3751 = vmatpush1.bf16.msra.mxu0 %v4480_v8  ;;  %3062 = vmatprep.mubr.f32.mxu0 %v4078_v47  ;;  %v3097_v47 = vld [vmem:[%s4980_s15 + $0x38] sm:$0xff] }
0x14d8   :  { %3753 = vmatprep.subr.bf16.mxu0 %v4483_v10  ;;  %v3774_v13 = vpack.c.bf16 %v3097_v47, %v3096_v50 }
0x14db   :  { %3755 = vmatpush1.bf16.msra.mxu0 %v4499_v18 }
0x14dc   :  { %3757 = vmatprep.subr.bf16.mxu0 %v4503_v19  ;;  %v2995_v55 = vpop.permute.xlu1 %2994 }
0x14df   :  { %3759 = vmatpush1.bf16.msra.mxu0 %v4518_v29 }
0x14e0   :  { %3761 = vmatprep.subr.bf16.mxu0 %v4521_v30  ;;  %v3090_v30 = vld [vmem:[%s4980_s15] sm:$0xff] }
0x14e3   :  { %3763 = vmatpush1.bf16.msra.mxu0 %v4530_v36  ;;  %v3091_v36 = vld [vmem:[%s4980_s15 + $0x8] sm:$0xff] }
0x14e4   :  { %v3765_v9 = vpack.c.bf16 %v3091_v36, %v3090_v30 }
0x14e6   :  { %3233 = vmatmul.mubr.msk.f32.vlgmr.msra.gmra.mrb[20].mxu0 %vm534_vm3, %v2995_v55 }
0x15b9   :  { %v3064_v63 = vpop.f32.mrb[20].mxu0 }
0x15ba   :  { %v3069_v8 = vadd.f32 %v3064_v63, %v4572_v12  ;;  %v3066_v1 = vpop.f32.mrb[21].mxu0  ;;  %v3092_v12 = vld [vmem:[%s4980_s15 + $0x10] sm:$0xff] }
0x15bb   :  { %v3070_v10 = vadd.f32 %v3066_v1, %v4576_v17  ;;  %v4079_v17 = vmov 0.0|0.0   ;;  %v3768_v37 = vpack.c.bf16 %v3093_v24, %v3092_v12 }
0x15bc   :  { %v3071_v21 = vmul.f32 0.5, %v3069_v8  ;;  %3764 = vmatprep.subr.bf16.mxu1 %v4079_v17 }
0x15bd   :  { %3766 = vmatpush3.bf16.msra.mxu1 %v3765_v9  ;;  %v3076_v45 = vmul.f32 0.5, %v3070_v10 }
0x15be   :  { %3989 = vtanh.f32 %v3071_v21  ;;  %3767 = vmatprep.subr.bf16.mxu1 %v4079_v17 }
0x15bf   :  { %3991 = vtanh.f32 %v3070_v10 }
0x15c0   :  { %3993 = vtanh.f32 %v3076_v45 }
0x15c1   :  { %3769 = vmatpush3.bf16.msra.mxu1 %v3768_v37 }
0x15c2   :  { %3770 = vmatprep.subr.bf16.mxu1 %v4079_v17 }
0x15c5   :  { %3772 = vmatpush3.bf16.msra.mxu1 %v3771_v52 }
0x15c6   :  { %3773 = vmatprep.subr.bf16.mxu1 %v4079_v17 }
0x15c8   :  { %v3990_v18 = vpop.eup %3989 }
0x15c9   :  { %v3073_v19 = vmul.f32 0.5, %v3990_v18  ;;  %v3992_v29 = vpop.eup %3991  ;;  %3775 = vmatpush3.bf16.msra.mxu1 %v3774_v13 }
0x15ca   :  { %v3994_v23 = vpop.eup %3993 }
0x15cb   :  { %v3074_v22 = vadd.f32 0.5, %v3073_v19  ;;  %v3078_v25 = vmul.f32 0.5, %v3994_v23 }
0x15cd   :  { %v3081_v2 = vmul.f32 %v3992_v29, %v3074_v22  ;;  %v3080_v44 = vmul.f32 %v3074_v22, %v4903_v57  ;;  %v3079_v33 = vadd.f32 0.5, %v3078_v25 }
0x15cf   :  { %3083 = vrot.lane.b32.xlu0 %v3081_v2, %s4076_s18 }
0x1641   :  { %v3084_v27 = vpop.permute.xlu0 %3083 }
0x1642   :  { %v3086_v0 = vadd.f32 %v3084_v27, %v3080_v44 }
0x1644   :  { %3995 = vtanh.f32 %v3086_v0 }
0x164e   :  { %v3996_v28 = vpop.eup %3995 }
0x164f   :  { %v3088_v42 = vmul.f32 %v3996_v28, %v3079_v33 }
0x1651   :  { %v3089_v60 = vmax.f32 %v3088_v42, 0.0 }
0x1653   :  { %3106 = vrot.lane.b32.xlu1 %v3089_v60, %s4076_s18 }
0x16c5   :  { %v3107_v31 = vpop.permute.xlu1 %3106 }
0x16c6   :  { %3330 = vmatmul.mubr.msk.f32.vlgmr.msra.gmra.mrb[22].mxu1 %vm534_vm3, %v3107_v31 }
0x1799   :  { %v3176_v58 = vpop.f32.mrb[22].mxu1 }
0x179a   :  { %v3177_v34 = vadd.f32 %v3234_v53, %v3176_v58  ;;  %v3331_v43 = vpop.f32.mrb[23].mxu1 }
0x179c   :  { %3181 = vst.msk [vmem:[#allocation7] sm:$0x3] %vm3180_vm6, %v3177_v34 }
0x179d   :  { %4052 = shalt.err (!%p4049_p6)
}
0x179e   :  { %s4053_s29 = scalar_lea.hbm %s4982_s17, 32 }
0x179f   :  { %p4054_p7 = scmp.ne.s32.totalorder %s4982_s17, %s4053_s29  ;;  %p4057_p8 = scmp.lt.u32.totalorder %s4053_s29, %s4982_s17 }
0x17a1   :  { %p4059_p9 = pnand %p4057_p8, %p4054_p7 }
0x17a3   :  { %4062 = shalt.err (!%p4059_p9)
}
0x17a4   :  { %3191 = dma.vmem_to_hbm [thread:$0]  %s3189_s10, 32, %s4982_s17, [#allocation4]  }
0x17a5   :  { %4067 = dma.done.wait [#allocation4], 32  }
0x17a6   :  { %4068 = vsyncadd [#allocation4], 4294967264 }
0x17a7   :  { %3195 = vsyncpa [#allocation3], 1 }
0x17a8   :  { %3196 = vsyncpa [#allocation6], 1 }
0x17a9   :  { %3197 = vsyncpa [#allocation4], 1 }

</bundles_post_ra>
